<compile_context>
chip_gen: v7x
topology: tpu7x:2x2x1
jax: 0.10.0
libtpu: 0.0.40
codegen_flags: <defaults>
</compile_context>

<pallas_src>
import math

import jax
import jax.numpy as jnp
from jax.experimental import pallas as pl
from jax.experimental.pallas import tpu as pltpu

IN_DIM = 784       # input / reconstruction width (kept unpadded end-to-end)
ENC_DIM = 3
ENC_PAD = 128      # 3 padded up to 128 (lane-dense encoder output / matmul K)


# ----------------------------------------------------------------------------
# Pallas kernel: full forward pass for one (TB, 784) batch tile.
# ----------------------------------------------------------------------------
def _autoencoder_kernel(
    x_ref,
    w1, b1, w2, b2, w3, b3, w4, b4,      # encoder params (bf16 W, f32 b)
    w5, b5, w6, b6, w7, b7, w8, b8,      # decoder params
    enc_ref, dec_ref,
):
    f32 = jnp.float32
    bf16 = jnp.bfloat16

    def layer(h, w_ref, b_ref, relu):
        # bf16 operands, f32 accumulation on the MXU, f32 bias add.
        y = jnp.dot(h.astype(bf16), w_ref[...], preferred_element_type=f32)
        y = y + b_ref[...]
        return jnp.maximum(y, 0.0) if relu else y

    x = x_ref[...]                      # (TB, 784) f32, lane width == full dim

    # --- encoder ---
    h = layer(x, w1, b1, True)          # (TB, 128)
    h = layer(h, w2, b2, True)          # (TB, 64)
    h = layer(h, w3, b3, True)          # (TB, 12)
    enc = layer(h, w4, b4, False)       # (TB, 128); cols 3..127 are exactly 0
    enc_ref[...] = enc.astype(enc_ref.dtype)   # bf16 store (halves HBM bytes)

    # --- decoder --- (w5 rows 3..127 are zero -> padded enc cols are inert)
    h = layer(enc, w5, b5, True)        # (TB, 12)
    h = layer(h, w6, b6, True)          # (TB, 64)
    h = layer(h, w7, b7, True)          # (TB, 128)
    z = layer(h, w8, b8, False)         # (TB, 784) f32
    # Sigmoid: exp on the EUP + approx reciprocal on the EUP (frees VALU slots).
    # Kept in f32 (v5e has no bf16 VPU/EUP); only the store narrows to bf16.
    dec = pl.reciprocal(1.0 + jnp.exp(-z), approx=True)
    dec_ref[...] = dec.astype(dec_ref.dtype)   # bf16 store of the big stream


# ----------------------------------------------------------------------------
# Wrapper: batch-tiled pallas_call with VMEM-resident weights.
# ----------------------------------------------------------------------------
def _round_up(n, m):
    return ((n + m - 1) // m) * m


def _pick_tile(batch, tb_max):
    """Pick the batch tile: as large as requested, but keep >= 2 grid tiles
    when there is enough work so v7x's two TensorCores (which share the
    'parallel' grid axis) both get a share.  Multiple of 16 sublanes so f32
    and bf16 blocks are layout-clean."""
    if batch >= 128:
        return min(tb_max, _round_up(-(-batch // 2), 64))
    return _round_up(max(batch, 16), 16)


def autoencoder_forward(x, packed_params, *, tb=512):
    """x: [B, 784] f32.  packed_params: flat list from pack_params()
    (bf16 weights [in, out] padded where needed, f32 biases [1, out]).
    Returns (enc [B,3] bf16, dec [B,784] bf16)."""
    B = x.shape[0]
    tb = _pick_tile(B, tb)
    n_tiles = pl.cdiv(B, tb)
    Bp = n_tiles * tb

    # Pad only the ragged batch tail (no lane repack, no dtype-cast pass).
    if Bp != B:
        x = jnp.pad(x, ((0, Bp - B), (0, 0)))

    x_spec = pl.BlockSpec((tb, IN_DIM), lambda i: (i, 0))
    # Params: one full block each, constant index_map -> resident across steps.
    param_specs = [pl.BlockSpec(p.shape, lambda i: (0, 0)) for p in packed_params]

    out_specs = (
        pl.BlockSpec((tb, ENC_PAD), lambda i: (i, 0)),
        pl.BlockSpec((tb, IN_DIM), lambda i: (i, 0)),
    )
    out_shapes = (
        jax.ShapeDtypeStruct((Bp, ENC_PAD), jnp.bfloat16),   # padded encoded
        jax.ShapeDtypeStruct((Bp, IN_DIM), jnp.bfloat16),    # decoded (unpadded)
    )

    enc_p, dec_p = pl.pallas_call(
        _autoencoder_kernel,
        out_shape=out_shapes,
        grid=(n_tiles,),
        in_specs=[x_spec] + param_specs,
        out_specs=out_specs,
        compiler_params=pltpu.CompilerParams(
            dimension_semantics=("parallel",),   # megacore on v7x, no-op elsewhere
        ),
    )(x, *packed_params)

    return enc_p[:B, :ENC_DIM], dec_p[:B, :IN_DIM]


# ----------------------------------------------------------------------------
# Parameter init (matches nn.Linear default U(-1/sqrt(in), +1/sqrt(in)))
# and packing (padding + bf16 cast) for the kernel.
# ----------------------------------------------------------------------------
def init_params(key):
    # (in_features, out_features) per layer, encoder then decoder.
    layer_dims = [
        (784, 128), (128, 64), (64, 12), (12, 3),      # encoder
        (3, 12), (12, 64), (64, 128), (128, 784),      # decoder
    ]
    params = []
    for (fan_in, fan_out) in layer_dims:
        key, kw, kb = jax.random.split(key, 3)
        bound = 1.0 / math.sqrt(fan_in)
        # stored as [in, out] (transposed vs PyTorch's [out, in])
        w = jax.random.uniform(kw, (fan_in, fan_out), jnp.float32, -bound, bound)
        b = jax.random.uniform(kb, (1, fan_out), jnp.float32, -bound, bound)
        params.extend([w, b])
    return params


def pack_params(params_f32):
    """Zero-pad only the 3-wide bottleneck (3 -> 128) so the encoder output
    and the enc @ w5 matmul are lane-dense; cast W to bf16, b stays f32."""
    ws = params_f32[0::2]
    bs = params_f32[1::2]
    w1, w2, w3, w4, w5, w6, w7, w8 = ws
    b1, b2, b3, b4, b5, b6, b7, b8 = bs

    def padw(w, rows, cols):
        out = jnp.zeros((rows, cols), jnp.float32)
        return out.at[: w.shape[0], : w.shape[1]].set(w)

    def padb(b, cols):
        out = jnp.zeros((1, cols), jnp.float32)
        return out.at[:, : b.shape[1]].set(b)

    w4p = padw(w4, 12, ENC_PAD)     # extra enc columns are zero
    b4p = padb(b4, ENC_PAD)
    w5p = padw(w5, ENC_PAD, 12)     # extra enc rows are zero

    packed_ws = [w1, w2, w3, w4p, w5p, w6, w7, w8]
    packed_bs = [b1, b2, b3, b4p, b5, b6, b7, b8]

    packed = []
    for w, b in zip(packed_ws, packed_bs):
        packed.extend([w.astype(jnp.bfloat16), b.astype(jnp.float32)])
    return packed


# ----------------------------------------------------------------------------
# Pure-JAX reference (uses the same bf16-rounded weights as the kernel).
# ----------------------------------------------------------------------------
def reference_forward(x, params):
    ws = [w.astype(jnp.bfloat16).astype(jnp.float32) for w in params[0::2]]
    bs = params[1::2]
    h = x
    for i in range(4):
        h = h @ ws[i] + bs[i]
        if i < 3:
            h = jnp.maximum(h, 0.0)
    enc = h
    h = enc
    for i in range(4, 8):
        h = h @ ws[i] + bs[i]
        if i < 7:
            h = jnp.maximum(h, 0.0)
    dec = jax.nn.sigmoid(h)
    return enc, dec


if __name__ == "__main__":
    key = jax.random.PRNGKey(0)
    key, kx = jax.random.split(key)

    # B is deliberately not a tile multiple: exercises the ragged batch-tail
    # padding and a 2-step (even, v7x-friendly) grid.
    B = 300
    x = jax.random.uniform(kx, (B, IN_DIM), jnp.float32)
    params = init_params(key)
    kernel_params = pack_params(params)

    enc, dec = autoencoder_forward(x, kernel_params)
    enc, dec = jax.block_until_ready(enc), jax.block_until_ready(dec)

    enc_ref, dec_ref = reference_forward(x, params)
    assert enc.shape == (B, ENC_DIM) and dec.shape == (B, IN_DIM)
    enc_err = float(jnp.max(jnp.abs(enc.astype(jnp.float32) - enc_ref)))
    dec_err = float(jnp.max(jnp.abs(dec.astype(jnp.float32) - dec_ref)))
    assert enc_err < 5e-2, f"encoder mismatch: max abs err {enc_err}"
    assert dec_err < 5e-2, f"decoder mismatch: max abs err {dec_err}"

    print("KERNEL_OK")
</pallas_src>

<mosaic_0001>
module attributes {stable_mosaic.version = 11 : i64} {
  func.func @_autoencoder_kernel(%arg0: i32, %arg1: memref<192x784xf32, #tpu.memory_space<vmem>>, %arg2: memref<784x128xbf16, #tpu.memory_space<vmem>>, %arg3: memref<1x128xf32, #tpu.memory_space<vmem>>, %arg4: memref<128x64xbf16, #tpu.memory_space<vmem>>, %arg5: memref<1x64xf32, #tpu.memory_space<vmem>>, %arg6: memref<64x12xbf16, #tpu.memory_space<vmem>>, %arg7: memref<1x12xf32, #tpu.memory_space<vmem>>, %arg8: memref<12x128xbf16, #tpu.memory_space<vmem>>, %arg9: memref<1x128xf32, #tpu.memory_space<vmem>>, %arg10: memref<128x12xbf16, #tpu.memory_space<vmem>>, %arg11: memref<1x12xf32, #tpu.memory_space<vmem>>, %arg12: memref<12x64xbf16, #tpu.memory_space<vmem>>, %arg13: memref<1x64xf32, #tpu.memory_space<vmem>>, %arg14: memref<64x128xbf16, #tpu.memory_space<vmem>>, %arg15: memref<1x128xf32, #tpu.memory_space<vmem>>, %arg16: memref<128x784xbf16, #tpu.memory_space<vmem>>, %arg17: memref<1x784xf32, #tpu.memory_space<vmem>>, %arg18: memref<192x128xbf16, #tpu.memory_space<vmem>>, %arg19: memref<192x784xbf16, #tpu.memory_space<vmem>>) attributes {dimension_semantics = [#tpu.dimension_semantics<parallel>], iteration_bounds = array<i64: 2>, scalar_prefetch = 0 : i64, scratch_operands = 0 : i64, tpu.core_type = #tpu.core_type<tc>, window_params = [{transform_indices = @transform_0, window_bounds = array<i64: 192, 784>}, {pipeline_mode = #tpu.pipeline_mode<synchronous>, transform_indices = @transform_1, window_bounds = array<i64: 784, 128>}, {pipeline_mode = #tpu.pipeline_mode<synchronous>, transform_indices = @transform_2, window_bounds = array<i64: 1, 128>}, {pipeline_mode = #tpu.pipeline_mode<synchronous>, transform_indices = @transform_3, window_bounds = array<i64: 128, 64>}, {pipeline_mode = #tpu.pipeline_mode<synchronous>, transform_indices = @transform_4, window_bounds = array<i64: 1, 64>}, {pipeline_mode = #tpu.pipeline_mode<synchronous>, transform_indices = @transform_5, window_bounds = array<i64: 64, 12>}, {pipeline_mode = #tpu.pipeline_mode<synchronous>, transform_indices = @transform_6, window_bounds = array<i64: 1, 12>}, {pipeline_mode = #tpu.pipeline_mode<synchronous>, transform_indices = @transform_7, window_bounds = array<i64: 12, 128>}, {pipeline_mode = #tpu.pipeline_mode<synchronous>, transform_indices = @transform_8, window_bounds = array<i64: 1, 128>}, {pipeline_mode = #tpu.pipeline_mode<synchronous>, transform_indices = @transform_9, window_bounds = array<i64: 128, 12>}, {pipeline_mode = #tpu.pipeline_mode<synchronous>, transform_indices = @transform_10, window_bounds = array<i64: 1, 12>}, {pipeline_mode = #tpu.pipeline_mode<synchronous>, transform_indices = @transform_11, window_bounds = array<i64: 12, 64>}, {pipeline_mode = #tpu.pipeline_mode<synchronous>, transform_indices = @transform_12, window_bounds = array<i64: 1, 64>}, {pipeline_mode = #tpu.pipeline_mode<synchronous>, transform_indices = @transform_13, window_bounds = array<i64: 64, 128>}, {pipeline_mode = #tpu.pipeline_mode<synchronous>, transform_indices = @transform_14, window_bounds = array<i64: 1, 128>}, {pipeline_mode = #tpu.pipeline_mode<synchronous>, transform_indices = @transform_15, window_bounds = array<i64: 128, 784>}, {pipeline_mode = #tpu.pipeline_mode<synchronous>, transform_indices = @transform_16, window_bounds = array<i64: 1, 784>}, {transform_indices = @transform_17, window_bounds = array<i64: 192, 128>}, {transform_indices = @transform_18, window_bounds = array<i64: 192, 784>}]} {
    %c0 = arith.constant 0 : index
    %c0_0 = arith.constant 0 : index
    %0 = vector.load %arg1[%c0, %c0_0] : memref<192x784xf32, #tpu.memory_space<vmem>>, vector<192x784xf32>
    %1 = arith.truncf %0 : vector<192x784xf32> to vector<192x784xbf16>
    %c0_1 = arith.constant 0 : index
    %c0_2 = arith.constant 0 : index
    %2 = vector.load %arg2[%c0_1, %c0_2] : memref<784x128xbf16, #tpu.memory_space<vmem>>, vector<784x128xbf16>
    %cst = arith.constant dense<0.000000e+00> : vector<192x128xf32>
    %3 = tpu.matmul %1, %2, %cst {dimension_numbers = #tpu.dot_dimension_numbers<[1], [0], [0], [1], [0, 0, 1, 1], [], []>} : vector<192x784xbf16>, vector<784x128xbf16>, vector<192x128xf32> -> vector<192x128xf32>
    %c0_3 = arith.constant 0 : index
    %c0_4 = arith.constant 0 : index
    %4 = vector.load %arg3[%c0_3, %c0_4] : memref<1x128xf32, #tpu.memory_space<vmem>>, vector<1x128xf32>
    %5 = vector.broadcast %4 : vector<1x128xf32> to vector<192x128xf32>
    %6 = arith.addf %3, %5 : vector<192x128xf32>
    %cst_5 = arith.constant 0.000000e+00 : f32
    %7 = vector.broadcast %cst_5 : f32 to vector<192x128xf32>
    %8 = arith.maximumf %6, %7 : vector<192x128xf32>
    %9 = arith.truncf %8 : vector<192x128xf32> to vector<192x128xbf16>
    %c0_6 = arith.constant 0 : index
    %c0_7 = arith.constant 0 : index
    %10 = vector.load %arg4[%c0_6, %c0_7] : memref<128x64xbf16, #tpu.memory_space<vmem>>, vector<128x64xbf16>
    %cst_8 = arith.constant dense<0.000000e+00> : vector<192x64xf32>
    %11 = tpu.matmul %9, %10, %cst_8 {dimension_numbers = #tpu.dot_dimension_numbers<[1], [0], [0], [1], [0, 0, 1, 1], [], []>} : vector<192x128xbf16>, vector<128x64xbf16>, vector<192x64xf32> -> vector<192x64xf32>
    %c0_9 = arith.constant 0 : index
    %c0_10 = arith.constant 0 : index
    %12 = vector.load %arg5[%c0_9, %c0_10] : memref<1x64xf32, #tpu.memory_space<vmem>>, vector<1x64xf32>
    %13 = vector.broadcast %12 : vector<1x64xf32> to vector<192x64xf32>
    %14 = arith.addf %11, %13 : vector<192x64xf32>
    %cst_11 = arith.constant 0.000000e+00 : f32
    %15 = vector.broadcast %cst_11 : f32 to vector<192x64xf32>
    %16 = arith.maximumf %14, %15 : vector<192x64xf32>
    %17 = arith.truncf %16 : vector<192x64xf32> to vector<192x64xbf16>
    %c0_12 = arith.constant 0 : index
    %c0_13 = arith.constant 0 : index
    %18 = vector.load %arg6[%c0_12, %c0_13] : memref<64x12xbf16, #tpu.memory_space<vmem>>, vector<64x12xbf16>
    %cst_14 = arith.constant dense<0.000000e+00> : vector<192x12xf32>
    %19 = tpu.matmul %17, %18, %cst_14 {dimension_numbers = #tpu.dot_dimension_numbers<[1], [0], [0], [1], [0, 0, 1, 1], [], []>} : vector<192x64xbf16>, vector<64x12xbf16>, vector<192x12xf32> -> vector<192x12xf32>
    %c0_15 = arith.constant 0 : index
    %c0_16 = arith.constant 0 : index
    %20 = vector.load %arg7[%c0_15, %c0_16] : memref<1x12xf32, #tpu.memory_space<vmem>>, vector<1x12xf32>
    %21 = vector.broadcast %20 : vector<1x12xf32> to vector<192x12xf32>
    %22 = arith.addf %19, %21 : vector<192x12xf32>
    %cst_17 = arith.constant 0.000000e+00 : f32
    %23 = vector.broadcast %cst_17 : f32 to vector<192x12xf32>
    %24 = arith.maximumf %22, %23 : vector<192x12xf32>
    %25 = arith.truncf %24 : vector<192x12xf32> to vector<192x12xbf16>
    %c0_18 = arith.constant 0 : index
    %c0_19 = arith.constant 0 : index
    %26 = vector.load %arg8[%c0_18, %c0_19] : memref<12x128xbf16, #tpu.memory_space<vmem>>, vector<12x128xbf16>
    %cst_20 = arith.constant dense<0.000000e+00> : vector<192x128xf32>
    %27 = tpu.matmul %25, %26, %cst_20 {dimension_numbers = #tpu.dot_dimension_numbers<[1], [0], [0], [1], [0, 0, 1, 1], [], []>} : vector<192x12xbf16>, vector<12x128xbf16>, vector<192x128xf32> -> vector<192x128xf32>
    %c0_21 = arith.constant 0 : index
    %c0_22 = arith.constant 0 : index
    %28 = vector.load %arg9[%c0_21, %c0_22] : memref<1x128xf32, #tpu.memory_space<vmem>>, vector<1x128xf32>
    %29 = vector.broadcast %28 : vector<1x128xf32> to vector<192x128xf32>
    %30 = arith.addf %27, %29 : vector<192x128xf32>
    %31 = arith.truncf %30 : vector<192x128xf32> to vector<192x128xbf16>
    %c0_23 = arith.constant 0 : index
    %c0_24 = arith.constant 0 : index
    %32 = vector.load %arg18[%c0_23, %c0_24] : memref<192x128xbf16, #tpu.memory_space<vmem>>, vector<192x128xbf16>
    tpu.vector_store %arg18[%c0_23, %c0_24], %31 {strides = array<i32>} : memref<192x128xbf16, #tpu.memory_space<vmem>>, vector<192x128xbf16>,
    %33 = arith.truncf %30 : vector<192x128xf32> to vector<192x128xbf16>
    %c0_25 = arith.constant 0 : index
    %c0_26 = arith.constant 0 : index
    %34 = vector.load %arg10[%c0_25, %c0_26] : memref<128x12xbf16, #tpu.memory_space<vmem>>, vector<128x12xbf16>
    %cst_27 = arith.constant dense<0.000000e+00> : vector<192x12xf32>
    %35 = tpu.matmul %33, %34, %cst_27 {dimension_numbers = #tpu.dot_dimension_numbers<[1], [0], [0], [1], [0, 0, 1, 1], [], []>} : vector<192x128xbf16>, vector<128x12xbf16>, vector<192x12xf32> -> vector<192x12xf32>
    %c0_28 = arith.constant 0 : index
    %c0_29 = arith.constant 0 : index
    %36 = vector.load %arg11[%c0_28, %c0_29] : memref<1x12xf32, #tpu.memory_space<vmem>>, vector<1x12xf32>
    %37 = vector.broadcast %36 : vector<1x12xf32> to vector<192x12xf32>
    %38 = arith.addf %35, %37 : vector<192x12xf32>
    %cst_30 = arith.constant 0.000000e+00 : f32
    %39 = vector.broadcast %cst_30 : f32 to vector<192x12xf32>
    %40 = arith.maximumf %38, %39 : vector<192x12xf32>
    %41 = arith.truncf %40 : vector<192x12xf32> to vector<192x12xbf16>
    %c0_31 = arith.constant 0 : index
    %c0_32 = arith.constant 0 : index
    %42 = vector.load %arg12[%c0_31, %c0_32] : memref<12x64xbf16, #tpu.memory_space<vmem>>, vector<12x64xbf16>
    %cst_33 = arith.constant dense<0.000000e+00> : vector<192x64xf32>
    %43 = tpu.matmul %41, %42, %cst_33 {dimension_numbers = #tpu.dot_dimension_numbers<[1], [0], [0], [1], [0, 0, 1, 1], [], []>} : vector<192x12xbf16>, vector<12x64xbf16>, vector<192x64xf32> -> vector<192x64xf32>
    %c0_34 = arith.constant 0 : index
    %c0_35 = arith.constant 0 : index
    %44 = vector.load %arg13[%c0_34, %c0_35] : memref<1x64xf32, #tpu.memory_space<vmem>>, vector<1x64xf32>
    %45 = vector.broadcast %44 : vector<1x64xf32> to vector<192x64xf32>
    %46 = arith.addf %43, %45 : vector<192x64xf32>
    %cst_36 = arith.constant 0.000000e+00 : f32
    %47 = vector.broadcast %cst_36 : f32 to vector<192x64xf32>
    %48 = arith.maximumf %46, %47 : vector<192x64xf32>
    %49 = arith.truncf %48 : vector<192x64xf32> to vector<192x64xbf16>
    %c0_37 = arith.constant 0 : index
    %c0_38 = arith.constant 0 : index
    %50 = vector.load %arg14[%c0_37, %c0_38] : memref<64x128xbf16, #tpu.memory_space<vmem>>, vector<64x128xbf16>
    %cst_39 = arith.constant dense<0.000000e+00> : vector<192x128xf32>
    %51 = tpu.matmul %49, %50, %cst_39 {dimension_numbers = #tpu.dot_dimension_numbers<[1], [0], [0], [1], [0, 0, 1, 1], [], []>} : vector<192x64xbf16>, vector<64x128xbf16>, vector<192x128xf32> -> vector<192x128xf32>
    %c0_40 = arith.constant 0 : index
    %c0_41 = arith.constant 0 : index
    %52 = vector.load %arg15[%c0_40, %c0_41] : memref<1x128xf32, #tpu.memory_space<vmem>>, vector<1x128xf32>
    %53 = vector.broadcast %52 : vector<1x128xf32> to vector<192x128xf32>
    %54 = arith.addf %51, %53 : vector<192x128xf32>
    %cst_42 = arith.constant 0.000000e+00 : f32
    %55 = vector.broadcast %cst_42 : f32 to vector<192x128xf32>
    %56 = arith.maximumf %54, %55 : vector<192x128xf32>
    %57 = arith.truncf %56 : vector<192x128xf32> to vector<192x128xbf16>
    %c0_43 = arith.constant 0 : index
    %c0_44 = arith.constant 0 : index
    %58 = vector.load %arg16[%c0_43, %c0_44] : memref<128x784xbf16, #tpu.memory_space<vmem>>, vector<128x784xbf16>
    %cst_45 = arith.constant dense<0.000000e+00> : vector<192x784xf32>
    %59 = tpu.matmul %57, %58, %cst_45 {dimension_numbers = #tpu.dot_dimension_numbers<[1], [0], [0], [1], [0, 0, 1, 1], [], []>} : vector<192x128xbf16>, vector<128x784xbf16>, vector<192x784xf32> -> vector<192x784xf32>
    %c0_46 = arith.constant 0 : index
    %c0_47 = arith.constant 0 : index
    %60 = vector.load %arg17[%c0_46, %c0_47] : memref<1x784xf32, #tpu.memory_space<vmem>>, vector<1x784xf32>
    %61 = vector.broadcast %60 : vector<1x784xf32> to vector<192x784xf32>
    %62 = arith.addf %59, %61 : vector<192x784xf32>
    %cst_48 = arith.constant 0.000000e+00 : f32
    %63 = vector.broadcast %cst_48 : f32 to vector<192x784xf32>
    %64 = arith.subf %63, %62 : vector<192x784xf32>
    %65 = math.exp %64 : vector<192x784xf32>
    %cst_49 = arith.constant 1.000000e+00 : f32
    %66 = vector.broadcast %cst_49 : f32 to vector<192x784xf32>
    %67 = arith.addf %66, %65 : vector<192x784xf32>
    %68 = tpu.reciprocal %67 {approx = true} : vector<192x784xf32> -> vector<192x784xf32>
    %69 = arith.truncf %68 : vector<192x784xf32> to vector<192x784xbf16>
    %c0_50 = arith.constant 0 : index
    %c0_51 = arith.constant 0 : index
    %70 = vector.load %arg19[%c0_50, %c0_51] : memref<192x784xbf16, #tpu.memory_space<vmem>>, vector<192x784xbf16>
    tpu.vector_store %arg19[%c0_50, %c0_51], %69 {strides = array<i32>} : memref<192x784xbf16, #tpu.memory_space<vmem>>, vector<192x784xbf16>,
    return
  }
  func.func @transform_0(%arg0: i32) -> (i32, i32) {
    %c0_i32 = arith.constant 0 : i32
    %c0_i32_0 = arith.constant 0 : i32
    return %arg0, %c0_i32 : i32, i32
  }
  func.func @transform_1(%arg0: i32) -> (i32, i32) {
    %c0_i32 = arith.constant 0 : i32
    %c0_i32_0 = arith.constant 0 : i32
    %c0_i32_1 = arith.constant 0 : i32
    return %c0_i32, %c0_i32_0 : i32, i32
  }
  func.func @transform_2(%arg0: i32) -> (i32, i32) {
    %c0_i32 = arith.constant 0 : i32
    %c0_i32_0 = arith.constant 0 : i32
    %c0_i32_1 = arith.constant 0 : i32
    return %c0_i32, %c0_i32_0 : i32, i32
  }
  func.func @transform_3(%arg0: i32) -> (i32, i32) {
    %c0_i32 = arith.constant 0 : i32
    %c0_i32_0 = arith.constant 0 : i32
    %c0_i32_1 = arith.constant 0 : i32
    return %c0_i32, %c0_i32_0 : i32, i32
  }
  func.func @transform_4(%arg0: i32) -> (i32, i32) {
    %c0_i32 = arith.constant 0 : i32
    %c0_i32_0 = arith.constant 0 : i32
    %c0_i32_1 = arith.constant 0 : i32
    return %c0_i32, %c0_i32_0 : i32, i32
  }
  func.func @transform_5(%arg0: i32) -> (i32, i32) {
    %c0_i32 = arith.constant 0 : i32
    %c0_i32_0 = arith.constant 0 : i32
    %c0_i32_1 = arith.constant 0 : i32
    return %c0_i32, %c0_i32_0 : i32, i32
  }
  func.func @transform_6(%arg0: i32) -> (i32, i32) {
    %c0_i32 = arith.constant 0 : i32
    %c0_i32_0 = arith.constant 0 : i32
    %c0_i32_1 = arith.constant 0 : i32
    return %c0_i32, %c0_i32_0 : i32, i32
  }
  func.func @transform_7(%arg0: i32) -> (i32, i32) {
    %c0_i32 = arith.constant 0 : i32
    %c0_i32_0 = arith.constant 0 : i32
    %c0_i32_1 = arith.constant 0 : i32
    return %c0_i32, %c0_i32_0 : i32, i32
  }
  func.func @transform_8(%arg0: i32) -> (i32, i32) {
    %c0_i32 = arith.constant 0 : i32
    %c0_i32_0 = arith.constant 0 : i32
    %c0_i32_1 = arith.constant 0 : i32
    return %c0_i32, %c0_i32_0 : i32, i32
  }
  func.func @transform_9(%arg0: i32) -> (i32, i32) {
    %c0_i32 = arith.constant 0 : i32
    %c0_i32_0 = arith.constant 0 : i32
    %c0_i32_1 = arith.constant 0 : i32
    return %c0_i32, %c0_i32_0 : i32, i32
  }
  func.func @transform_10(%arg0: i32) -> (i32, i32) {
    %c0_i32 = arith.constant 0 : i32
    %c0_i32_0 = arith.constant 0 : i32
    %c0_i32_1 = arith.constant 0 : i32
    return %c0_i32, %c0_i32_0 : i32, i32
  }
  func.func @transform_11(%arg0: i32) -> (i32, i32) {
    %c0_i32 = arith.constant 0 : i32
    %c0_i32_0 = arith.constant 0 : i32
    %c0_i32_1 = arith.constant 0 : i32
    return %c0_i32, %c0_i32_0 : i32, i32
  }
  func.func @transform_12(%arg0: i32) -> (i32, i32) {
    %c0_i32 = arith.constant 0 : i32
    %c0_i32_0 = arith.constant 0 : i32
    %c0_i32_1 = arith.constant 0 : i32
    return %c0_i32, %c0_i32_0 : i32, i32
  }
  func.func @transform_13(%arg0: i32) -> (i32, i32) {
    %c0_i32 = arith.constant 0 : i32
    %c0_i32_0 = arith.constant 0 : i32
    %c0_i32_1 = arith.constant 0 : i32
    return %c0_i32, %c0_i32_0 : i32, i32
  }
  func.func @transform_14(%arg0: i32) -> (i32, i32) {
    %c0_i32 = arith.constant 0 : i32
    %c0_i32_0 = arith.constant 0 : i32
    %c0_i32_1 = arith.constant 0 : i32
    return %c0_i32, %c0_i32_0 : i32, i32
  }
  func.func @transform_15(%arg0: i32) -> (i32, i32) {
    %c0_i32 = arith.constant 0 : i32
    %c0_i32_0 = arith.constant 0 : i32
    %c0_i32_1 = arith.constant 0 : i32
    return %c0_i32, %c0_i32_0 : i32, i32
  }
  func.func @transform_16(%arg0: i32) -> (i32, i32) {
    %c0_i32 = arith.constant 0 : i32
    %c0_i32_0 = arith.constant 0 : i32
    %c0_i32_1 = arith.constant 0 : i32
    return %c0_i32, %c0_i32_0 : i32, i32
  }
  func.func @transform_17(%arg0: i32) -> (i32, i32) {
    %c0_i32 = arith.constant 0 : i32
    %c0_i32_0 = arith.constant 0 : i32
    return %arg0, %c0_i32 : i32, i32
  }
  func.func @transform_18(%arg0: i32) -> (i32, i32) {
    %c0_i32 = arith.constant 0 : i32
    %c0_i32_0 = arith.constant 0 : i32
    return %arg0, %c0_i32 : i32, i32
  }
}

</mosaic_0001>

<bundles_post_ra>
// kernel: tpu_custom_call.1
= control target key start
LH: loop header
LB: loop body
LE: loop exit
PB: predicated region body
PF: predicated region fallthrough
CT: control target
= control target key end

     0   :  { %s10032_s0 = inlined_call_operand.vmem [shape: f32[384,784], index: 0, kind: input, shape index: {}]   ;;  %s10033_s1 = inlined_call_operand.vmem [shape: bf16[784,128], index: 1, kind: input, shape index: {}]   ;;  %s10034_s2 = inlined_call_operand.vmem [shape: f32[1,128], index: 2, kind: input, shape index: {}]   ;;  %s10035_s3 = inlined_call_operand.vmem [shape: bf16[128,64], index: 3, kind: input, shape index: {}]   ;;  %s10036_s4 = inlined_call_operand.vmem [shape: f32[1,64], index: 4, kind: input, shape index: {}]   ;;  %s10037_s5 = inlined_call_operand.vmem [shape: bf16[64,12], index: 5, kind: input, shape index: {}]   ;;  %s10038_s6 = inlined_call_operand.vmem [shape: f32[1,12], index: 6, kind: input, shape index: {}]   ;;  %s10039_s7 = inlined_call_operand.vmem [shape: bf16[12,128], index: 7, kind: input, shape index: {}]   ;;  %s10040_s8 = inlined_call_operand.vmem [shape: f32[1,128], index: 8, kind: input, shape index: {}]   ;;  %s10041_s9 = inlined_call_operand.vmem [shape: bf16[128,12], index: 9, kind: input, shape index: {}]   ;;  %s10042_s10 = inlined_call_operand.vmem [shape: f32[1,12], index: 10, kind: input, shape index: {}]   ;;  %s10043_s11 = inlined_call_operand.vmem [shape: bf16[12,64], index: 11, kind: input, shape index: {}]   ;;  %s10044_s12 = inlined_call_operand.vmem [shape: f32[1,64], index: 12, kind: input, shape index: {}]   ;;  %s10045_s13 = inlined_call_operand.vmem [shape: bf16[64,128], index: 13, kind: input, shape index: {}]   ;;  %s10046_s14 = inlined_call_operand.vmem [shape: f32[1,128], index: 14, kind: input, shape index: {}]   ;;  %s10047_s15 = inlined_call_operand.vmem [shape: bf16[128,784], index: 15, kind: input, shape index: {}]   ;;  %s10048_s16 = inlined_call_operand.vmem [shape: f32[1,784], index: 16, kind: input, shape index: {}]   ;;  %s10049_s17 = inlined_call_operand.hbm [shape: bf16[384,128], index: 17, kind: output, shape index: {0}]   ;;  %s10050_s18 = inlined_call_operand.vmem [shape: bf16[384,784], index: 18, kind: output, shape index: {1}]  }
   0x1   :  { %10063 = sst [smem:[#allocation40_spill]] %s10032_s0 }
   0x2   :  { %10064 = sst [smem:[#allocation41_spill]] %s10033_s1 }
   0x3   :  { %10065 = sst [smem:[#allocation42_spill]] %s10034_s2 }
   0x4   :  { %10066 = sst [smem:[#allocation43_spill]] %s10049_s17 }
   0x5   :  { %24 = vsyncpa [#allocation3], 0 }
   0x6   :  { %26 = vsyncpa [#allocation3 + $0x1], 0  ;;  %s8080_s27 = smov 0   ;;  %s8082_s28 = smov 0  }
   0x7   :  { %s8084_s29 = smov 0   ;;  %s8086_s30 = smov 0  }
   0x8 LB: > { %10067 = sst [smem:[#allocation5_spill]] %s7967_s27  ;;  %s8101_s0 = sadd.s32 4294967295, %s7979_s30   ;;  %s7979_s30 = sphi %s8086_s30, %s10157_s30   ;;  %s7975_s29 = sphi %s8084_s29, %s10159_s29   ;;  %s7971_s28 = sphi %s8082_s28, %s10161_s28   ;;  %s7967_s27 = sphi %s8080_s27, %s10160_s27  }
   0x9   : > { %10068 = sst [smem:[#allocation6_spill]] %s7975_s29  ;;  %s5866_s19 = sadd.s32 4294967294, %s7979_s30  }
   0xa   : > { %10069 = sst [smem:[#allocation7_spill]] %s7979_s30  ;;  %s8105_s1 = sadd.s32 1, %s7979_s30  }
   0xb   : > { %10070 = sst [smem:[#allocation8_spill]] %s8105_s1  ;;  %s401_s20 = sadd.s32 1, %s7975_s29 }
   0xc   : > { %s398_s21 = ssub.s32 %s7979_s30, %s8105_s1  ;;  %p411_p0 = scmp.ne.s32.totalorder %s7975_s29, %s7971_s28 }
   0xd   : > { %p399_p1 = scmp.eq.s32.totalorder %s398_s21, 0  ;;  %p412_p2 = scmp.eq.s32.totalorder %s8101_s0, 1 }
   0xe   : > { %p417_p3 = scmp.ne.s32.totalorder %s7971_s28, %s7967_s27  ;;  %p418_p4 = scmp.eq.s32.totalorder %s5866_s19, 1 }
   0xf   : > { %s8116_s22 = scalar_select %p399_p1, %s7975_s29, %s401_s20  }
  0x10   : > { %p8118_p5 = por %p412_p2, %p411_p0  ;;  %p8122_p6 = por %p418_p4, %p417_p3 }
  0x11   : > { %10071 = sst [smem:[#allocation9_spill]] %s8116_s22  ;;  %p5869_p7 = scmp.ge.s32.totalorder %s7979_s30, 1 }
  0x12   : > { %s10072_s2 = scalar_select %p8118_p5, 1, 0 }
  0x13   : > { %s10074_s23 = scalar_select %p8122_p6, 1, 0 }
  0x14   : > { %10073 = sst [smem:[#allocation10_spill]] %s10072_s2  ;;  %p520_p8 = scmp.lt.s32.totalorder %s7979_s30, 3 }
  0x15   : > { %10075 = sst [smem:[#allocation11_spill]] %s10074_s23 }
  0x16   : > { %p521_p9 = pnand %p5869_p7, %p520_p8 }
  0x18   : > { %524 = sbr.rel (%p521_p9) target bundleno = 2312 (0x908), region = 88 }
  0x1f   : > { %s10076_s26 = sld [smem:[#allocation41_spill]]  ;;  %s581_s1 = smul.u32 24, %s8101_s0  ;;  %vm1248_vm0 = vcmask 130048   ;;  %vm2365_vm1 = vcmask 1045504   ;;  %vm2112_vm2 = vcmask 523264   ;;  %vm2328_vm3 = vcmask 97280  }
  0x20   : > { %s10077_s2 = sld [smem:[#allocation40_spill]]  ;;  %s10078_s27 = sld [smem:[#allocation42_spill]]  ;;  %vm5660_vm4 = vcmask 125952  }
  0x21   : > { %p582_p10 = scmp.lt.s32.totalorder %s581_s1, 47  ;;  %s570_s21 = sand.u32 1, %s7971_s28  }
  0x22   : > { %s6313_s20 = smul.u32 1536, %s8101_s0 }
  0x23   : > { %s10163_s1 = smov (!%p582_p10, %s581_s1), 47 }
  0x24   : > { %s7045_s22 = smul.u32 56, %s10163_s1 }
  0x25   : > { %v7089_v0 = vld [vmem:[%s10076_s26 + $0x40] sm:$0xff]   ;;  %v7093_v4 = vld [vmem:[%s10076_s26 + $0x48] sm:$0xff]   ;;  %v7097_v8 = vld [vmem:[%s10076_s26 + $0x50] sm:$0xff]   ;;  %s7046_s29 = smul.u32 28, %s10163_s1  ;;  %s9835_s1 = scalar_lea.sflag [#allocation3], %s570_s21 }
  0x26   : > { %v7090_v1 = vld [vmem:[%s10076_s26] sm:$0xff]   ;;  %6385 = vmatprep.subr.bf16.mxu0 %v7089_v0  ;;  %v7094_v5 = vld [vmem:[%s10076_s26 + $0x8] sm:$0xff]   ;;  %v7098_v9 = vld [vmem:[%s10076_s26 + $0x10] sm:$0xff]   ;;  %s8222_s30 = scalar_lea.vmem %s10077_s2, %s7045_s22  ;;  %s7982_s2 = smov [#allocation2]  }
  0x27   : > { %v7091_v2 = vld [vmem:[%s10076_s26 + $0xc0] sm:$0xff]   ;;  %6386 = vmatpush3.bf16.msra.mxu0 %v7090_v1  ;;  %v7095_v6 = vld [vmem:[%s10076_s26 + $0xc8] sm:$0xff]   ;;  %v7099_v10 = vld [vmem:[%s10076_s26 + $0xd0] sm:$0xff]   ;;  %s9222_s17 = scalar_lea.vmem %s10050_s18, %s7046_s29  ;;  %s7921_s22 = sshll.u32 %s7982_s2, 4  ;;  %s7922_s22 = int_to_ptr.vmem [resolvable:$false] %s7921_s22 }
  0x28   : > { %v7092_v3 = vld [vmem:[%s10076_s26 + $0x80] sm:$0xff]   ;;  %6473 = vmatprep.subr.bf16.mxu1 %v7091_v2  ;;  %6387 = vmatprep.subr.bf16.mxu0 %v7093_v4  ;;  %v7096_v7 = vld [vmem:[%s10076_s26 + $0x88] sm:$0xff]   ;;  %v7100_v11 = vld [vmem:[%s10076_s26 + $0x90] sm:$0xff]  }
  0x29   : > { %6474 = vmatpush3.bf16.msra.mxu1 %v7092_v3  ;;  %v7101_v12 = vld [vmem:[%s10076_s26 + $0x58] sm:$0xff]   ;;  %v7105_v16 = vld [vmem:[%s10076_s26 + $0x60] sm:$0xff]   ;;  %v7109_v20 = vld [vmem:[%s10076_s26 + $0x68] sm:$0xff]  }
  0x2a   : > { %6475 = vmatprep.subr.bf16.mxu1 %v7095_v6  ;;  %v7102_v13 = vld [vmem:[%s10076_s26 + $0x18] sm:$0xff]   ;;  %v7106_v17 = vld [vmem:[%s10076_s26 + $0x20] sm:$0xff]   ;;  %v7110_v21 = vld [vmem:[%s10076_s26 + $0x28] sm:$0xff]  }
  0x2b   : > { %6388 = vmatpush3.bf16.msra.mxu0 %v7094_v5  ;;  %v7103_v14 = vld [vmem:[%s10076_s26 + $0xd8] sm:$0xff]   ;;  %v7107_v18 = vld [vmem:[%s10076_s26 + $0xe0] sm:$0xff]   ;;  %v7111_v22 = vld [vmem:[%s10076_s26 + $0xe8] sm:$0xff]  }
  0x2c   : > { %6389 = vmatprep.subr.bf16.mxu0 %v7097_v8  ;;  %v7104_v15 = vld [vmem:[%s10076_s26 + $0x98] sm:$0xff]   ;;  %v7108_v19 = vld [vmem:[%s10076_s26 + $0xa0] sm:$0xff]   ;;  %v7112_v23 = vld [vmem:[%s10076_s26 + $0xa8] sm:$0xff]  }
  0x2d   : > { %6476 = vmatpush3.bf16.msra.mxu1 %v7096_v7  ;;  %v7113_v24 = vld [vmem:[%s10076_s26 + $0x70] sm:$0xff]   ;;  %v7117_v28 = vld [vmem:[%s10076_s26 + $0x78] sm:$0xff]   ;;  %v598_v31 = vld [vmem:[%s8222_s30 + $0x8] sm:$0xff] }
  0x2e   : > { %6477 = vmatprep.subr.bf16.mxu1 %v7099_v10  ;;  %v7114_v25 = vld [vmem:[%s10076_s26 + $0x30] sm:$0xff]   ;;  %v7118_v29 = vld [vmem:[%s10076_s26 + $0x38] sm:$0xff]   ;;  %v605_v32 = vld [vmem:[%s8222_s30 + $0x40] sm:$0xff] }
  0x2f   : > { %6390 = vmatpush3.bf16.msra.mxu0 %v7098_v9  ;;  %v7115_v26 = vld [vmem:[%s10076_s26 + $0xf0] sm:$0xff]   ;;  %v7119_v30 = vld [vmem:[%s10076_s26 + $0xf8] sm:$0xff]   ;;  %v766_v33 = vpack.c.bf16 %v605_v32, %v598_v31  ;;  %v597_v35 = vld [vmem:[%s8222_s30] sm:$0xff] }
  0x30   : > { %6391 = vmatprep.subr.bf16.mxu0 %v7101_v12  ;;  %v7116_v27 = vld [vmem:[%s10076_s26 + $0xb0] sm:$0xff]   ;;  %v7120_v34 = vld [vmem:[%s10076_s26 + $0xb8] sm:$0xff]   ;;  %v7121_v38 = vld [vmem:[%s10076_s26 + $0x140] sm:$0xff]  }
  0x31   : > { %6478 = vmatpush3.bf16.msra.mxu1 %v7100_v11  ;;  %v604_v36 = vld [vmem:[%s8222_s30 + $0x38] sm:$0xff]  ;;  %1317 = vmatprep.mubr.bf16.mxu0 %v766_v33  ;;  %v607_v40 = vld [vmem:[%s8222_s30 + $0x50] sm:$0xff]  ;;  %v7122_v42 = vld [vmem:[%s10076_s26 + $0x100] sm:$0xff]  }
  0x32   : > { %6479 = vmatprep.subr.bf16.mxu1 %v7103_v14  ;;  %v765_v37 = vpack.c.bf16 %v604_v36, %v597_v35  ;;  %v600_v39 = vld [vmem:[%s8222_s30 + $0x18] sm:$0xff]  ;;  %v599_v43 = vld [vmem:[%s8222_s30 + $0x10] sm:$0xff]  ;;  %v606_v44 = vld [vmem:[%s8222_s30 + $0x48] sm:$0xff] }
  0x33   : > { %6392 = vmatpush3.bf16.msra.mxu0 %v7102_v13  ;;  %v768_v41 = vpack.c.bf16 %v607_v40, %v600_v39  ;;  %v612_v45 = vld [vmem:[%s8222_s30 + $0x78] sm:$0xff]  ;;  %v767_v46 = vpack.c.bf16 %v606_v44, %v599_v43  ;;  %v619_v47 = vld [vmem:[%s8222_s30 + $0xb0] sm:$0xff]  ;;  %v618_v49 = vld [vmem:[%s8222_s30 + $0xa8] sm:$0xff] }
  0x34   : > { %6393 = vmatprep.subr.bf16.mxu0 %v7105_v16  ;;  %v611_v48 = vld [vmem:[%s8222_s30 + $0x70] sm:$0xff]  ;;  %v773_v50 = vpack.c.bf16 %v619_v47, %v612_v45  ;;  %v614_v51 = vld [vmem:[%s8222_s30 + $0x88] sm:$0xff]  ;;  %v621_v52 = vld [vmem:[%s8222_s30 + $0xc0] sm:$0xff] }
  0x35   : > { %6480 = vmatpush3.bf16.msra.mxu1 %v7104_v15  ;;  %1446 = vmatprep.mubr.bf16.mxu1 %v768_v41  ;;  %v613_v53 = vld [vmem:[%s8222_s30 + $0x80] sm:$0xff]  ;;  %v775_v54 = vpack.c.bf16 %v621_v52, %v614_v51  ;;  %v620_v55 = vld [vmem:[%s8222_s30 + $0xb8] sm:$0xff]  ;;  %v772_v56 = vpack.c.bf16 %v618_v49, %v611_v48  ;;  %v7124_v58 = vld [vmem:[%s10076_s26 + $0x148] sm:$0xff]  }
  0x36   : > { %6481 = vmatprep.subr.bf16.mxu1 %v7107_v18  ;;  %v7123_v57 = vld [vmem:[%s10076_s26 + $0x180] sm:$0xff]   ;;  %v7125_v59 = vld [vmem:[%s10076_s26 + $0x108] sm:$0xff]   ;;  %v774_v62 = vpack.c.bf16 %v620_v55, %v613_v53  ;;  %v628_v0 = vld [vmem:[%s8222_s30 + $0xf8] sm:$0xff] }
  0x37   : > { %6394 = vmatpush3.bf16.msra.mxu0 %v7106_v17  ;;  %v626_v60 = vld [vmem:[%s8222_s30 + $0xe8] sm:$0xff]  ;;  %v633_v61 = vld [vmem:[%s8222_s30 + $0x120] sm:$0xff]  ;;  %v635_v1 = vld [vmem:[%s8222_s30 + $0x130] sm:$0xff] }
  0x38   : > { %6395 = vmatprep.subr.bf16.mxu0 %v7109_v20  ;;  %v780_v63 = vpack.c.bf16 %v633_v61, %v626_v60  ;;  %v625_v2 = vld [vmem:[%s8222_s30 + $0xe0] sm:$0xff]  ;;  %v632_v3 = vld [vmem:[%s8222_s30 + $0x118] sm:$0xff]  ;;  %v782_v4 = vpack.c.bf16 %v635_v1, %v628_v0  ;;  %v647_v6 = vld [vmem:[%s8222_s30 + $0x190] sm:$0xff] }
  0x39   : > { %6482 = vmatpush3.bf16.msra.mxu1 %v7108_v19  ;;  %v640_v5 = vld [vmem:[%s8222_s30 + $0x158] sm:$0xff]  ;;  %v627_v7 = vld [vmem:[%s8222_s30 + $0xf0] sm:$0xff]  ;;  %v634_v8 = vld [vmem:[%s8222_s30 + $0x128] sm:$0xff]  ;;  %v779_v10 = vpack.c.bf16 %v632_v3, %v625_v2 }
  0x3a   : > { %6483 = vmatprep.subr.bf16.mxu1 %v7111_v22  ;;  %v7126_v9 = vld [vmem:[%s10076_s26 + $0x150] sm:$0xff]   ;;  %v787_v12 = vpack.c.bf16 %v647_v6, %v640_v5  ;;  %v642_v13 = vld [vmem:[%s8222_s30 + $0x168] sm:$0xff]  ;;  %v649_v14 = vld [vmem:[%s8222_s30 + $0x1a0] sm:$0xff]  ;;  %v781_v15 = vpack.c.bf16 %v634_v8, %v627_v7 }
  0x3b   : > { %6396 = vmatpush3.bf16.msra.mxu0 %v7110_v21  ;;  %v7127_v11 = vld [vmem:[%s10076_s26 + $0x110] sm:$0xff]   ;;  %v646_v17 = vld [vmem:[%s8222_s30 + $0x188] sm:$0xff]  ;;  %v789_v18 = vpack.c.bf16 %v649_v14, %v642_v13  ;;  %v7128_v19 = vld [vmem:[%s10076_s26 + $0x158] sm:$0xff]  }
  0x3c   : > { %6397 = vmatprep.subr.bf16.mxu0 %v7113_v24  ;;  %v639_v16 = vld [vmem:[%s8222_s30 + $0x150] sm:$0xff]  ;;  %v654_v20 = vld [vmem:[%s8222_s30 + $0x1c8] sm:$0xff]  ;;  %v661_v21 = vld [vmem:[%s8222_s30 + $0x200] sm:$0xff] }
  0x3d   : > { %6484 = vmatpush3.bf16.msra.mxu1 %v7112_v23  ;;  %v7129_v22 = vld [vmem:[%s10076_s26 + $0x118] sm:$0xff]   ;;  %v786_v23 = vpack.c.bf16 %v646_v17, %v639_v16  ;;  %v641_v24 = vld [vmem:[%s8222_s30 + $0x160] sm:$0xff]  ;;  %v675_v36 = vld [vmem:[%s8222_s30 + $0x270] sm:$0xff] }
  0x3e   : > { %6485 = vmatprep.subr.bf16.mxu1 %v7115_v26  ;;  %v794_v26 = vpack.c.bf16 %v661_v21, %v654_v20  ;;  %v7131_v32 = vld [vmem:[%s10076_s26 + $0x120] sm:$0xff]   ;;  %v668_v35 = vld [vmem:[%s8222_s30 + $0x238] sm:$0xff]  ;;  %v670_v39 = vld [vmem:[%s8222_s30 + $0x248] sm:$0xff] }
  0x3f   : > { %6398 = vmatpush3.bf16.msra.mxu0 %v7114_v25  ;;  %v648_v25 = vld [vmem:[%s8222_s30 + $0x198] sm:$0xff]  ;;  %v653_v33 = vld [vmem:[%s8222_s30 + $0x1c0] sm:$0xff]  ;;  %v7132_v43 = vld [vmem:[%s10076_s26 + $0x168] sm:$0xff]  }
  0x40   : > { %6399 = vmatprep.subr.bf16.mxu0 %v7117_v28  ;;  %v663_v28 = vld [vmem:[%s8222_s30 + $0x210] sm:$0xff]  ;;  %v677_v41 = vld [vmem:[%s8222_s30 + $0x280] sm:$0xff]  ;;  %v7133_v44 = vld [vmem:[%s10076_s26 + $0x128] sm:$0xff]  }
  0x41   : > { %6486 = vmatpush3.bf16.msra.mxu1 %v7116_v27  ;;  %v656_v27 = vld [vmem:[%s8222_s30 + $0x1d8] sm:$0xff]  ;;  %v667_v47 = vld [vmem:[%s8222_s30 + $0x230] sm:$0xff]  ;;  %v674_v48 = vld [vmem:[%s8222_s30 + $0x268] sm:$0xff] }
  0x42   : > { %6487 = vmatprep.subr.bf16.mxu1 %v7119_v30  ;;  %v7130_v30 = vld [vmem:[%s10076_s26 + $0x160] sm:$0xff]   ;;  %v796_v31 = vpack.c.bf16 %v663_v28, %v656_v27  ;;  %v682_v49 = vld [vmem:[%s8222_s30 + $0x2a8] sm:$0xff]  ;;  %v676_v52 = vld [vmem:[%s8222_s30 + $0x278] sm:$0xff] }
  0x43   : > { %6400 = vmatpush3.bf16.msra.mxu0 %v7118_v29  ;;  %v788_v29 = vpack.c.bf16 %v648_v25, %v641_v24  ;;  %v669_v51 = vld [vmem:[%s8222_s30 + $0x240] sm:$0xff]  ;;  %v7134_v53 = vld [vmem:[%s10076_s26 + $0x170] sm:$0xff]   ;;  %v688_v61 = vld [vmem:[%s8222_s30 + $0x2d8] sm:$0xff] }
  0x44   : > { %6561 = vmatprep.subr.bf16.mxu0 %v7121_v38  ;;  %v662_v38 = vld [vmem:[%s8222_s30 + $0x208] sm:$0xff]  ;;  %v7135_v55 = vld [vmem:[%s10076_s26 + $0x130] sm:$0xff]   ;;  %v681_v60 = vld [vmem:[%s8222_s30 + $0x2a0] sm:$0xff] }
  0x45   : > { %6488 = vmatpush3.bf16.msra.mxu1 %v7120_v34  ;;  %v660_v34 = vld [vmem:[%s8222_s30 + $0x1f8] sm:$0xff]  ;;  %v703_v1 = vld [vmem:[%s8222_s30 + $0x350] sm:$0xff]  ;;  %v807_v3 = vpack.c.bf16 %v688_v61, %v681_v60  ;;  %v690_v5 = vld [vmem:[%s8222_s30 + $0x2e8] sm:$0xff] }
  0x46   : > { %1318 = vmatmul.mubr.bf16.vlgmr.msra.gmra.mrb[0].mxu0 %v765_v37  ;;  %6780 = vmatprep.subr.bf16.mxu1 %v7123_v57  ;;  %v655_v37 = vld [vmem:[%s8222_s30 + $0x1d0] sm:$0xff]  ;;  %v793_v40 = vpack.c.bf16 %v660_v34, %v653_v33  ;;  %v696_v0 = vld [vmem:[%s8222_s30 + $0x318] sm:$0xff]  ;;  %v698_v7 = vld [vmem:[%s8222_s30 + $0x328] sm:$0xff] }
  0x47   : > { %6562 = vmatpush3.bf16.msra.mxu0 %v7122_v42  ;;  %1325 = vmatprep.mubr.bf16.mxu0 %v773_v50  ;;  %v801_v42 = vpack.c.bf16 %v675_v36, %v668_v35  ;;  %v795_v45 = vpack.c.bf16 %v662_v38, %v655_v37  ;;  %v689_v50 = vld [vmem:[%s8222_s30 + $0x2e0] sm:$0xff]  ;;  %v7137_v2 = vld [vmem:[%s10076_s26 + $0x138] sm:$0xff]   ;;  %v815_v6 = vpack.c.bf16 %v703_v1, %v696_v0  ;;  %v710_v13 = vld [vmem:[%s8222_s30 + $0x388] sm:$0xff] }
  0x48   : > { %1447 = vmatmul.mubr.bf16.vlgmr.msra.gmra.mrb[0].mxu1 %v767_v46  ;;  %6563 = vmatprep.subr.bf16.mxu0 %v7124_v58  ;;  %v803_v46 = vpack.c.bf16 %v677_v41, %v670_v39  ;;  %v691_v58 = vld [vmem:[%s8222_s30 + $0x2f0] sm:$0xff]  ;;  %v705_v8 = vld [vmem:[%s8222_s30 + $0x360] sm:$0xff]  ;;  %v704_v17 = vld [vmem:[%s8222_s30 + $0x358] sm:$0xff] }
  0x49   : > { %1454 = vmatprep.mubr.bf16.mxu1 %v775_v54  ;;  %6781 = vmatpush3.bf16.msra.mxu1 %v7123_v57  ;;  %v800_v54 = vpack.c.bf16 %v674_v48, %v667_v47  ;;  %v684_v57 = vld [vmem:[%s8222_s30 + $0x2b8] sm:$0xff]  ;;  %v717_v14 = vld [vmem:[%s8222_s30 + $0x3c0] sm:$0xff]  ;;  %v719_v20 = vld [vmem:[%s8222_s30 + $0x3d0] sm:$0xff] }
  0x4a   : > { %v697_v16 = vld [vmem:[%s8222_s30 + $0x320] sm:$0xff]  ;;  %v716_v24 = vld [vmem:[%s8222_s30 + $0x3b8] sm:$0xff]  ;;  %v711_v28 = vld [vmem:[%s8222_s30 + $0x390] sm:$0xff] }
  0x4b   : > { %6564 = vmatpush3.bf16.msra.mxu0 %v7125_v59  ;;  %v802_v59 = vpack.c.bf16 %v676_v52, %v669_v51  ;;  %v816_v21 = vpack.c.bf16 %v704_v17, %v697_v16  ;;  %v724_v25 = vld [vmem:[%s8222_s30 + $0x3f8] sm:$0xff]  ;;  %v723_v35 = vld [vmem:[%s8222_s30 + $0x3f0] sm:$0xff]  ;;  %v730_v36 = vld [vmem:[%s8222_s30 + $0x428] sm:$0xff] }
  0x4c   : > { %6565 = vmatprep.subr.bf16.mxu0 %v7126_v9  ;;  %v738_v37 = vld [vmem:[%s8222_s30 + $0x468] sm:$0xff]  ;;  %v745_v38 = vld [vmem:[%s8222_s30 + $0x4a0] sm:$0xff]  ;;  %v732_v41 = vld [vmem:[%s8222_s30 + $0x438] sm:$0xff] }
  0x4d   : > { %v725_v39 = vld [vmem:[%s8222_s30 + $0x400] sm:$0xff]  ;;  %v744_v47 = vld [vmem:[%s8222_s30 + $0x498] sm:$0xff]  ;;  %v739_v51 = vld [vmem:[%s8222_s30 + $0x470] sm:$0xff] }
  0x4e   : > { %1326 = vmatmul.mubr.bf16.gmra.mrb[4].mxu0 %v772_v56  ;;  %v808_v56 = vpack.c.bf16 %v689_v50, %v682_v49  ;;  %v752_v49 = vld [vmem:[%s8222_s30 + $0x4d8] sm:$0xff]  ;;  %v759_v50 = vld [vmem:[%s8222_s30 + $0x510] sm:$0xff]  ;;  %v746_v52 = vld [vmem:[%s8222_s30 + $0x4a8] sm:$0xff] }
  0x4f   : > { %1333 = vmatprep.mubr.bf16.mxu0 %v780_v63  ;;  %6566 = vmatpush3.bf16.msra.mxu0 %v7127_v11  ;;  %v7136_v63 = vld [vmem:[%s10076_s26 + $0x178] sm:$0xff]   ;;  %v695_v11 = vld [vmem:[%s8222_s30 + $0x310] sm:$0xff]  ;;  %v602_v61 = vld [vmem:[%s8222_s30 + $0x28] sm:$0xff] }
  0x50   : > { %1455 = vmatmul.mubr.bf16.gmra.mrb[4].mxu1 %v774_v62  ;;  %6567 = vmatprep.subr.bf16.mxu0 %v7128_v19  ;;  %v810_v62 = vpack.c.bf16 %v691_v58, %v684_v57  ;;  %v712_v19 = vld [vmem:[%s8222_s30 + $0x398] sm:$0xff]  ;;  %v837_v57 = vpack.c.bf16 %v746_v52, %v739_v51  ;;  %v751_v58 = vld [vmem:[%s8222_s30 + $0x4d0] sm:$0xff]  ;;  %v722_v52 = vld [vmem:[%s8222_s30 + $0x3e8] sm:$0xff] }
  0x51   : > { %1462 = vmatprep.mubr.bf16.mxu1 %v782_v4  ;;  %v683_v4 = vld [vmem:[%s8222_s30 + $0x2b0] sm:$0xff]  ;;  %v760_v0 = vld [vmem:[%s8222_s30 + $0x518] sm:$0xff] }
  0x52   : > { %v809_v9 = vpack.c.bf16 %v690_v5, %v683_v4  ;;  %v603_v1 = vld [vmem:[%s8222_s30 + $0x30] sm:$0xff] }
  0x53   : > { %6568 = vmatpush3.bf16.msra.mxu0 %v7129_v22  ;;  %v824_v22 = vpack.c.bf16 %v719_v20, %v712_v19  ;;  %v622_v19 = vld [vmem:[%s8222_s30 + $0xc8] sm:$0xff]  ;;  %v715_v51 = vld [vmem:[%s8222_s30 + $0x3b0] sm:$0xff] }
  0x54   : > { %6569 = vmatprep.subr.bf16.mxu0 %v7130_v30  ;;  %v630_v20 = vld [vmem:[%s8222_s30 + $0x108] sm:$0xff] }
  0x56   : > { %1334 = vmatmul.mubr.bf16.gmra.mrb[8].mxu0 %v779_v10  ;;  %v817_v10 = vpack.c.bf16 %v705_v8, %v698_v7  ;;  %v608_v7 = vld [vmem:[%s8222_s30 + $0x58] sm:$0xff] }
  0x57   : > { %1341 = vmatprep.mubr.bf16.mxu0 %v787_v12  ;;  %6570 = vmatpush3.bf16.msra.mxu0 %v7131_v32  ;;  %v702_v12 = vld [vmem:[%s8222_s30 + $0x348] sm:$0xff]  ;;  %v733_v32 = vld [vmem:[%s8222_s30 + $0x440] sm:$0xff] }
  0x58   : > { %1463 = vmatmul.mubr.bf16.gmra.mrb[8].mxu1 %v781_v15  ;;  %6571 = vmatprep.subr.bf16.mxu0 %v7132_v43  ;;  %v814_v15 = vpack.c.bf16 %v702_v12, %v695_v11  ;;  %v747_v43 = vld [vmem:[%s8222_s30 + $0x4b0] sm:$0xff]  ;;  %v617_v11 = vld [vmem:[%s8222_s30 + $0xa0] sm:$0xff]  ;;  %v624_v12 = vld [vmem:[%s8222_s30 + $0xd8] sm:$0xff] }
  0x59   : > { %1470 = vmatprep.mubr.bf16.mxu1 %v789_v18  ;;  %v822_v18 = vpack.c.bf16 %v717_v14, %v710_v13  ;;  %v631_v13 = vld [vmem:[%s8222_s30 + $0x110] sm:$0xff]  ;;  %v638_v14 = vld [vmem:[%s8222_s30 + $0x148] sm:$0xff]  ;;  %v778_v17 = vpack.c.bf16 %v624_v12, %v617_v11  ;;  %v685_v12 = vld [vmem:[%s8222_s30 + $0x2c0] sm:$0xff] }
  0x5b   : > { %6572 = vmatpush3.bf16.msra.mxu0 %v7133_v44  ;;  %v836_v44 = vpack.c.bf16 %v745_v38, %v738_v37  ;;  %v680_v37 = vld [vmem:[%s8222_s30 + $0x298] sm:$0xff] }
  0x5c   : > { %6573 = vmatprep.subr.bf16.mxu0 %v7134_v53  ;;  %v754_v53 = vld [vmem:[%s8222_s30 + $0x4e8] sm:$0xff] }
  0x5e   : > { %1342 = vmatmul.mubr.bf16.gmra.mrb[12].mxu0 %v786_v23  ;;  %v709_v23 = vld [vmem:[%s8222_s30 + $0x380] sm:$0xff] }
  0x5f   : > { %1349 = vmatprep.mubr.bf16.mxu0 %v794_v26  ;;  %6574 = vmatpush3.bf16.msra.mxu0 %v7135_v55  ;;  %v731_v26 = vld [vmem:[%s8222_s30 + $0x430] sm:$0xff]  ;;  %v821_v27 = vpack.c.bf16 %v716_v24, %v709_v23  ;;  %v645_v23 = vld [vmem:[%s8222_s30 + $0x180] sm:$0xff]  ;;  %v652_v24 = vld [vmem:[%s8222_s30 + $0x1b8] sm:$0xff] }
  0x60   : > { %1471 = vmatmul.mubr.bf16.gmra.mrb[12].mxu1 %v788_v29  ;;  %6575 = vmatprep.subr.bf16.mxu0 %v7136_v63  ;;  %v718_v29 = vld [vmem:[%s8222_s30 + $0x3c8] sm:$0xff]  ;;  %v829_v30 = vpack.c.bf16 %v731_v26, %v724_v25  ;;  %v753_v63 = vld [vmem:[%s8222_s30 + $0x4e0] sm:$0xff]  ;;  %v659_v25 = vld [vmem:[%s8222_s30 + $0x1f0] sm:$0xff] }
  0x61   : > { %1478 = vmatprep.mubr.bf16.mxu1 %v796_v31  ;;  %v726_v31 = vld [vmem:[%s8222_s30 + $0x408] sm:$0xff]  ;;  %v823_v33 = vpack.c.bf16 %v718_v29, %v711_v28  ;;  %v844_v5 = vpack.c.bf16 %v760_v0, %v753_v63  ;;  %v629_v29 = vld [vmem:[%s8222_s30 + $0x100] sm:$0xff]  ;;  %v743_v63 = vld [vmem:[%s8222_s30 + $0x490] sm:$0xff] }
  0x62   : > { %v831_v34 = vpack.c.bf16 %v733_v32, %v726_v31  ;;  %v666_v26 = vld [vmem:[%s8222_s30 + $0x228] sm:$0xff]  ;;  %v792_v31 = vpack.c.bf16 %v652_v24, %v645_v23  ;;  %v644_v32 = vld [vmem:[%s8222_s30 + $0x178] sm:$0xff]  ;;  %v713_v24 = vld [vmem:[%s8222_s30 + $0x3a0] sm:$0xff] }
  0x63   : > { %6576 = vmatpush3.bf16.msra.mxu0 %v7137_v2  ;;  %v610_v2 = vld [vmem:[%s8222_s30 + $0x68] sm:$0xff] }
  0x64   : > { %v771_v8 = vpack.c.bf16 %v610_v2, %v603_v1  ;;  %v750_v0 = vld [vmem:[%s8222_s30 + $0x4c8] sm:$0xff] }
  0x65   : > { %v841_v2 = vpack.c.bf16 %v750_v0, %v743_v63 }
  0x66   : > { %1350 = vmatmul.mubr.bf16.gmra.mrb[16].mxu0 %v793_v40  ;;  %v828_v40 = vpack.c.bf16 %v730_v36, %v723_v35  ;;  %v673_v36 = vld [vmem:[%s8222_s30 + $0x260] sm:$0xff] }
  0x67   : > { %1357 = vmatprep.mubr.bf16.mxu0 %v801_v42  ;;  %v740_v42 = vld [vmem:[%s8222_s30 + $0x478] sm:$0xff] }
  0x68   : > { %1479 = vmatmul.mubr.bf16.gmra.mrb[16].mxu1 %v795_v45  ;;  %v830_v45 = vpack.c.bf16 %v732_v41, %v725_v39  ;;  %v838_v48 = vpack.c.bf16 %v747_v43, %v740_v42  ;;  %v687_v39 = vld [vmem:[%s8222_s30 + $0x2d0] sm:$0xff]  ;;  %v806_v41 = vpack.c.bf16 %v680_v37, %v673_v36 }
  0x69   : > { %1486 = vmatprep.mubr.bf16.mxu1 %v803_v46  ;;  %v737_v46 = vld [vmem:[%s8222_s30 + $0x460] sm:$0xff]  ;;  %v643_v43 = vld [vmem:[%s8222_s30 + $0x170] sm:$0xff] }
  0x6a   : > { %v835_v55 = vpack.c.bf16 %v744_v47, %v737_v46  ;;  %v665_v46 = vld [vmem:[%s8222_s30 + $0x220] sm:$0xff] }
  0x6e   : > { %1358 = vmatmul.mubr.bf16.gmra.mrb[20].mxu0 %v800_v54  ;;  %v761_v54 = vld [vmem:[%s8222_s30 + $0x520] sm:$0xff] }
  0x6f   : > { %1365 = vmatprep.mubr.bf16.mxu0 %v808_v56  ;;  %v843_v56 = vpack.c.bf16 %v759_v50, %v752_v49  ;;  %v845_v60 = vpack.c.bf16 %v761_v54, %v754_v53  ;;  %v708_v49 = vld [vmem:[%s8222_s30 + $0x378] sm:$0xff]  ;;  %v827_v54 = vpack.c.bf16 %v722_v52, %v715_v51  ;;  %v7144_v51 = vld [vmem:[%s10035_s3 + $0x30] sm:$0xff]  }
  0x70   : > { %1487 = vmatmul.mubr.bf16.gmra.mrb[20].mxu1 %v802_v59  ;;  %v758_v59 = vld [vmem:[%s8222_s30 + $0x508] sm:$0xff]  ;;  %v7145_v52 = vld [vmem:[%s10035_s3 + $0x38] sm:$0xff]  }
  0x71   : > { %1494 = vmatprep.mubr.bf16.mxu1 %v810_v62  ;;  %v609_v62 = vld [vmem:[%s8222_s30 + $0x60] sm:$0xff] }
  0x72   : > { %v770_v4 = vpack.c.bf16 %v609_v62, %v602_v61  ;;  %v736_v61 = vld [vmem:[%s8222_s30 + $0x458] sm:$0xff] }
  0x76   : > { %1366 = vmatmul.mubr.bf16.gmra.mrb[24].mxu0 %v807_v3  ;;  %v842_v3 = vpack.c.bf16 %v758_v59, %v751_v58  ;;  %v679_v58 = vld [vmem:[%s8222_s30 + $0x290] sm:$0xff] }
  0x77   : > { %1373 = vmatprep.mubr.bf16.mxu0 %v815_v6  ;;  %v601_v6 = vld [vmem:[%s8222_s30 + $0x20] sm:$0xff] }
  0x78   : > { %1495 = vmatmul.mubr.bf16.gmra.mrb[24].mxu1 %v809_v9  ;;  %v616_v9 = vld [vmem:[%s8222_s30 + $0x98] sm:$0xff] }
  0x79   : > { %1502 = vmatprep.mubr.bf16.mxu1 %v817_v10  ;;  %v623_v10 = vld [vmem:[%s8222_s30 + $0xd0] sm:$0xff] }
  0x7a   : > { %v777_v16 = vpack.c.bf16 %v623_v10, %v616_v9  ;;  %v764_v9 = vld [vmem:[%s8222_s30 + $0x538] sm:$0xff] }
  0x7e   : > { %1374 = vmatmul.mubr.bf16.gmra.mrb[28].mxu0 %v814_v15  ;;  %v769_v15 = vpack.c.bf16 %v608_v7, %v601_v6  ;;  %v693_v6 = vld [vmem:[%s8222_s30 + $0x300] sm:$0xff] }
  0x7f   : > { %1381 = vmatprep.mubr.bf16.mxu0 %v822_v18  ;;  %v615_v18 = vld [vmem:[%s8222_s30 + $0x90] sm:$0xff] }
  0x80   : > { %1503 = vmatmul.mubr.bf16.gmra.mrb[28].mxu1 %v816_v21  ;;  %v637_v21 = vld [vmem:[%s8222_s30 + $0x140] sm:$0xff] }
  0x81   : > { %1510 = vmatprep.mubr.bf16.mxu1 %v824_v22  ;;  %v785_v22 = vpack.c.bf16 %v638_v14, %v631_v13  ;;  %v784_v28 = vpack.c.bf16 %v637_v21, %v630_v20  ;;  %v692_v13 = vld [vmem:[%s8222_s30 + $0x2f8] sm:$0xff]  ;;  %v714_v20 = vld [vmem:[%s8222_s30 + $0x3a8] sm:$0xff]  ;;  %v721_v21 = vld [vmem:[%s8222_s30 + $0x3e0] sm:$0xff] }
  0x82   : > { %v700_v14 = vld [vmem:[%s8222_s30 + $0x338] sm:$0xff]  ;;  %v826_v23 = vpack.c.bf16 %v721_v21, %v714_v20 }
  0x86   : > { %1382 = vmatmul.mubr.bf16.gmra.mrb[32].mxu0 %v821_v27  ;;  %v776_v27 = vpack.c.bf16 %v622_v19, %v615_v18  ;;  %v699_v18 = vld [vmem:[%s8222_s30 + $0x330] sm:$0xff]  ;;  %v706_v19 = vld [vmem:[%s8222_s30 + $0x368] sm:$0xff] }
  0x87   : > { %1389 = vmatprep.mubr.bf16.mxu0 %v829_v30  ;;  %v636_v30 = vld [vmem:[%s8222_s30 + $0x138] sm:$0xff] }
  0x88   : > { %1511 = vmatmul.mubr.bf16.gmra.mrb[32].mxu1 %v823_v33  ;;  %v651_v33 = vld [vmem:[%s8222_s30 + $0x1b0] sm:$0xff]  ;;  %v783_v35 = vpack.c.bf16 %v636_v30, %v629_v29  ;;  %v7138_v29 = vld [vmem:[%s10035_s3] sm:$0xff]  }
  0x89   : > { %1518 = vmatprep.mubr.bf16.mxu1 %v831_v34  ;;  %v799_v34 = vpack.c.bf16 %v666_v26, %v659_v25  ;;  %v791_v38 = vpack.c.bf16 %v651_v33, %v644_v32  ;;  %v720_v25 = vld [vmem:[%s8222_s30 + $0x3d8] sm:$0xff]  ;;  %6806 = vmatprep.subr.bf16.mxu1 %v7138_v29  ;;  %v734_v32 = vld [vmem:[%s8222_s30 + $0x448] sm:$0xff] }
  0x8a   : > { %v728_v26 = vld [vmem:[%s8222_s30 + $0x418] sm:$0xff]  ;;  %v742_v33 = vld [vmem:[%s8222_s30 + $0x488] sm:$0xff] }
  0x8e   : > { %1390 = vmatmul.mubr.bf16.gmra.mrb[36].mxu0 %v828_v40  ;;  %v694_v40 = vld [vmem:[%s8222_s30 + $0x308] sm:$0xff] }
  0x8f   : > { %1397 = vmatprep.mubr.bf16.mxu0 %v836_v44  ;;  %v813_v42 = vpack.c.bf16 %v694_v40, %v687_v39  ;;  %v650_v44 = vld [vmem:[%s8222_s30 + $0x1a8] sm:$0xff]  ;;  %v741_v39 = vld [vmem:[%s8222_s30 + $0x480] sm:$0xff]  ;;  %v748_v40 = vld [vmem:[%s8222_s30 + $0x4b8] sm:$0xff] }
  0x90   : > { %1519 = vmatmul.mubr.bf16.gmra.mrb[36].mxu1 %v830_v45  ;;  %v658_v45 = vld [vmem:[%s8222_s30 + $0x1e8] sm:$0xff]  ;;  %v790_v47 = vpack.c.bf16 %v650_v44, %v643_v43  ;;  %v839_v43 = vpack.c.bf16 %v748_v40, %v741_v39  ;;  %v7141_v44 = vld [vmem:[%s10035_s3 + $0x18] sm:$0xff]  }
  0x91   : > { %1526 = vmatprep.mubr.bf16.mxu1 %v838_v48  ;;  %v701_v48 = vld [vmem:[%s8222_s30 + $0x340] sm:$0xff]  ;;  %v798_v50 = vpack.c.bf16 %v665_v46, %v658_v45  ;;  %v755_v46 = vld [vmem:[%s8222_s30 + $0x4f0] sm:$0xff] }
  0x92   : > { %v820_v53 = vpack.c.bf16 %v708_v49, %v701_v48  ;;  %v7142_v49 = vld [vmem:[%s10035_s3 + $0x20] sm:$0xff]  }
  0x96   : > { %1398 = vmatmul.mubr.bf16.gmra.mrb[40].mxu0 %v835_v55  ;;  %v657_v55 = vld [vmem:[%s8222_s30 + $0x1e0] sm:$0xff] }
  0x97   : > { %1405 = vmatprep.mubr.bf16.mxu0 %v843_v56  ;;  %v664_v56 = vld [vmem:[%s8222_s30 + $0x218] sm:$0xff] }
  0x98   : > { %1527 = vmatmul.mubr.bf16.gmra.mrb[40].mxu1 %v837_v57  ;;  %v672_v57 = vld [vmem:[%s8222_s30 + $0x258] sm:$0xff]  ;;  %v797_v59 = vpack.c.bf16 %v664_v56, %v657_v55 }
  0x99   : > { %1534 = vmatprep.mubr.bf16.mxu1 %v845_v60  ;;  %v729_v60 = vld [vmem:[%s8222_s30 + $0x420] sm:$0xff]  ;;  %v805_v62 = vpack.c.bf16 %v679_v58, %v672_v57 }
  0x9a   : > { %v834_v1 = vpack.c.bf16 %v736_v61, %v729_v60 }
  0x9e   : > { %1406 = vmatmul.mubr.bf16.gmra.mrb[44].mxu0 %v842_v3  ;;  %v671_v3 = vld [vmem:[%s8222_s30 + $0x250] sm:$0xff] }
  0x9f   : > { %1575 = vmatprep.mubr.bf16.mxu0 %v770_v4  ;;  %v678_v4 = vld [vmem:[%s8222_s30 + $0x288] sm:$0xff] }
  0xa0   : > { %1535 = vmatmul.mubr.bf16.gmra.mrb[44].mxu1 %v844_v5  ;;  %v686_v5 = vld [vmem:[%s8222_s30 + $0x2c8] sm:$0xff]  ;;  %v804_v7 = vpack.c.bf16 %v678_v4, %v671_v3 }
  0xa1   : > { %6782 = vmatprep.mubr.msk.bf16.mxu1 %vm1248_vm0, %v771_v8  ;;  %v757_v8 = vld [vmem:[%s8222_s30 + $0x500] sm:$0xff]  ;;  %v812_v10 = vpack.c.bf16 %v693_v6, %v686_v5 }
  0xa2   : > { %v848_v11 = vpack.c.bf16 %v764_v9, %v757_v8 }
  0xa6   : > { %1576 = vmatmul.mubr.bf16.vlgmr.msra.gmra.mrb[48].mxu0 %v769_v15  ;;  %v707_v15 = vld [vmem:[%s8222_s30 + $0x370] sm:$0xff] }
  0xa7   : > { %1583 = vmatprep.mubr.bf16.mxu0 %v777_v16  ;;  %v811_v16 = vpack.c.bf16 %v692_v13, %v685_v12 }
  0xa8   : > { %6783 = vmatmul.mubr.msk.bf16.vlgmr.msra.gmra.mrb[48].mxu1 %vm1248_vm0, %v778_v17  ;;  %v819_v17 = vpack.c.bf16 %v707_v15, %v700_v14 }
  0xa9   : > { %6786 = vmatprep.mubr.msk.bf16.mxu1 %vm1248_vm0, %v785_v22  ;;  %v818_v22 = vpack.c.bf16 %v706_v19, %v699_v18  ;;  %6807 = vmatpush3.bf16.msra.mxu1 %v7138_v29 }
  0xae   : > { %1584 = vmatmul.mubr.bf16.gmra.mrb[52].mxu0 %v776_v27  ;;  %v735_v27 = vld [vmem:[%s8222_s30 + $0x450] sm:$0xff] }
  0xaf   : > { %1591 = vmatprep.mubr.bf16.mxu0 %v784_v28  ;;  %v825_v28 = vpack.c.bf16 %v720_v25, %v713_v24  ;;  %v833_v30 = vpack.c.bf16 %v735_v27, %v728_v26 }
  0xb0   : > { %6787 = vmatmul.mubr.msk.bf16.gmra.mrb[52].mxu1 %vm1248_vm0, %v792_v31  ;;  %v727_v31 = vld [vmem:[%s8222_s30 + $0x410] sm:$0xff] }
  0xb1   : > { %6790 = vmatprep.mubr.msk.bf16.mxu1 %vm1248_vm0, %v799_v34  ;;  %v749_v34 = vld [vmem:[%s8222_s30 + $0x4c0] sm:$0xff]  ;;  %v832_v36 = vpack.c.bf16 %v734_v32, %v727_v31 }
  0xb2   : > { %v840_v37 = vpack.c.bf16 %v749_v34, %v742_v33 }
  0xb6   : > { %1592 = vmatmul.mubr.bf16.gmra.mrb[56].mxu0 %v783_v35  ;;  %v7139_v35 = vld [vmem:[%s10035_s3 + $0x8] sm:$0xff]  }
  0xb7   : > { %1599 = vmatprep.mubr.bf16.mxu0 %v791_v38  ;;  %6808 = vmatprep.subr.bf16.mxu1 %v7139_v35  ;;  %v7140_v38 = vld [vmem:[%s10035_s3 + $0x10] sm:$0xff]  }
  0xb8   : > { %6791 = vmatmul.mubr.msk.bf16.gmra.mrb[56].mxu1 %vm1248_vm0, %v806_v41  ;;  %v756_v41 = vld [vmem:[%s8222_s30 + $0x4f8] sm:$0xff] }
  0xb9   : > { %6794 = vmatprep.mubr.msk.bf16.mxu1 %vm1248_vm0, %v813_v42  ;;  %6809 = vmatpush3.bf16.msra.mxu1 %v7139_v35  ;;  %v763_v42 = vld [vmem:[%s8222_s30 + $0x530] sm:$0xff] }
  0xba   : > { %6810 = vmatprep.subr.bf16.mxu1 %v7140_v38  ;;  %v847_v45 = vpack.c.bf16 %v763_v42, %v756_v41 }
  0xbd   : > { %6811 = vmatpush3.bf16.msra.mxu1 %v7140_v38 }
  0xbe   : > { %1600 = vmatmul.mubr.bf16.gmra.mrb[60].mxu0 %v790_v47  ;;  %6812 = vmatprep.subr.bf16.mxu1 %v7141_v44  ;;  %v762_v47 = vld [vmem:[%s8222_s30 + $0x528] sm:$0xff]  ;;  %s10135_s30 = sld [smem:[#allocation43_spill]] }
  0xbf   : > { %1607 = vmatprep.mubr.bf16.mxu0 %v798_v50  ;;  %v846_v48 = vpack.c.bf16 %v762_v47, %v755_v46  ;;  %v7143_v50 = vld [vmem:[%s10035_s3 + $0x28] sm:$0xff]  }
  0xc0   : > { %6795 = vmatmul.mubr.msk.bf16.gmra.mrb[60].mxu1 %vm1248_vm0, %v820_v53 }
  0xc1   : > { %6798 = vmatprep.mubr.msk.bf16.mxu1 %vm1248_vm0, %v827_v54  ;;  %6813 = vmatpush3.bf16.msra.mxu1 %v7141_v44  ;;  %v8491_v54 = vld [vmem:[%s10078_s27] ss:$0 sm:$0xff]  ;;  %s7044_s27 = smul.u32 96, %s570_s21 }
  0xc2   : > { %6814 = vmatprep.subr.bf16.mxu1 %v7142_v49 }
  0xc3   : > { %s8756_s23 = scalar_lea.vmem [#allocation2], %s7044_s27 }
  0xc4   : > { %s5774_s24 = sshll.u32 %s8756_s23, 4  ;;  %s10136_s19 = smov %s10135_s30  ;;  %s9821_s24 = int_to_ptr.vmem [resolvable:$true] %s5774_s24 }
  0xc5   : > { %6815 = vmatpush3.bf16.msra.mxu1 %v7142_v49  ;;  %s9827_s29 = scalar_lea.hbm %s10135_s30, %s6313_s20  ;;  %s7917_s27 = scalar_lea.vmem %s9821_s24, 1536 }
  0xc6   : > { %1608 = vmatmul.mubr.bf16.gmra.mrb[64].mxu0 %v797_v59  ;;  %6816 = vmatprep.subr.bf16.mxu1 %v7143_v50  ;;  %p7918_p11 = scmp.ne.s32.totalorder %s9821_s24, %s7917_s27  ;;  %s7923_s20 = scalar_lea.vmem %s7922_s22, 3072 }
  0xc7   : > { %1615 = vmatprep.mubr.bf16.mxu0 %v805_v62  ;;  %p7924_p0 = scmp.lt.s32.totalorder %s9821_s24, %s7922_s22  ;;  %p7925_p1 = scmp.lt.s32.totalorder %s7923_s20, %s7917_s27 }
  0xc8   : > { %6799 = vmatmul.mubr.msk.bf16.gmra.mrb[64].mxu1 %vm1248_vm0, %v834_v1  ;;  %p7919_p12 = pnand %p7918_p11, %p8118_p5 }
  0xc9   : > { %6802 = vmatprep.mubr.msk.bf16.mxu1 %vm1248_vm0, %v841_v2  ;;  %6817 = vmatpush3.bf16.msra.mxu1 %v7143_v50  ;;  %p7926_p2 = por %p7925_p1, %p7924_p0 }
  0xca   : > { %6818 = vmatprep.subr.bf16.mxu1 %v7144_v51  ;;  %p7920_p13 = pneg %p7919_p12 }
  0xcc   : > { %p7927_p3 = pnand %p7926_p2, %p7920_p13 }
  0xcd   : > { %6819 = vmatpush3.bf16.msra.mxu1 %v7144_v51 }
  0xce   : > { %1616 = vmatmul.mubr.bf16.gmra.mrb[68].mxu0 %v804_v7  ;;  %6820 = vmatprep.subr.bf16.mxu1 %v7145_v52 }
  0xcf   : > { %1623 = vmatprep.mubr.bf16.mxu0 %v812_v10 }
  0xd0   : > { %6803 = vmatmul.mubr.msk.bf16.gmra.mrb[68].mxu1 %vm1248_vm0, %v848_v11 }
  0xd1   : > { %6821 = vmatpush3.bf16.msra.mxu1 %v7145_v52 }
  0xd6   : > { %1624 = vmatmul.mubr.bf16.gmra.mrb[72].mxu0 %v811_v16 }
  0xd7   : > { %1631 = vmatprep.mubr.bf16.mxu0 %v819_v17 }
  0xde   : > { %1632 = vmatmul.mubr.bf16.gmra.mrb[76].mxu0 %v818_v22 }
  0xdf   : > { %1639 = vmatprep.mubr.bf16.mxu0 %v826_v23 }
  0xe6   : > { %1640 = vmatmul.mubr.bf16.gmra.mrb[80].mxu0 %v825_v28 }
  0xe7   : > { %1647 = vmatprep.mubr.bf16.mxu0 %v833_v30 }
  0xee   : > { %1648 = vmatmul.mubr.bf16.gmra.mrb[84].mxu0 %v832_v36 }
  0xef   : > { %1655 = vmatprep.mubr.bf16.mxu0 %v840_v37 }
  0xf6   : > { %1656 = vmatmul.mubr.bf16.gmra.mrb[88].mxu0 %v839_v43 }
  0xf7   : > { %1663 = vmatprep.mubr.bf16.mxu0 %v847_v45 }
  0xfe   : > { %1664 = vmatmul.mubr.bf16.gmra.mrb[92].mxu0 %v846_v48 }
 0x119   : > { %v6401_v53 = vpop.f32.mrb[0].mxu0 }
 0x11a   : > { %v6402_v55 = vpop.f32.mrb[1].mxu0 }
 0x11b   : > { %v6403_v56 = vadd.f32 %v6402_v55, %v6401_v53  ;;  %v6404_v57 = vpop.f32.mrb[2].mxu0  ;;  %v6489_v58 = vpop.f32.mrb[0].mxu1 }
 0x11c   : > { %v6405_v59 = vpop.f32.mrb[3].mxu0  ;;  %v6490_v62 = vpop.f32.mrb[1].mxu1 }
 0x11d   : > { %v1320_v60 = vadd.f32 %v6403_v56, %v8491_v54  ;;  %v6406_v61 = vadd.f32 %v6405_v59, %v6404_v57  ;;  %v6491_v63 = vadd.f32 %v6490_v62, %v6489_v58  ;;  %v6492_v0 = vpop.f32.mrb[2].mxu1 }
 0x11e   : > { %v6493_v2 = vpop.f32.mrb[3].mxu1 }
 0x11f   : > { %v1323_v1 = vadd.f32 %v6406_v61, %v8491_v54  ;;  %v8495_v3 = vadd.f32 %v6491_v63, %v1320_v60  ;;  %v6494_v4 = vadd.f32 %v6493_v2, %v6492_v0 }
 0x121   : > { %v6407_v5 = vpop.f32.mrb[4].mxu0  ;;  %v8497_v6 = vadd.f32 %v6494_v4, %v1323_v1 }
 0x122   : > { %v6408_v7 = vpop.f32.mrb[5].mxu0 }
 0x123   : > { %v6409_v8 = vadd.f32 %v6408_v7, %v6407_v5  ;;  %v6410_v9 = vpop.f32.mrb[6].mxu0  ;;  %v6495_v10 = vpop.f32.mrb[4].mxu1 }
 0x124   : > { %v6411_v11 = vpop.f32.mrb[7].mxu0  ;;  %v6496_v14 = vpop.f32.mrb[5].mxu1 }
 0x125   : > { %v1328_v12 = vadd.f32 %v6409_v8, %v8491_v54  ;;  %v6412_v13 = vadd.f32 %v6411_v11, %v6410_v9  ;;  %v6497_v15 = vadd.f32 %v6496_v14, %v6495_v10  ;;  %v6498_v16 = vpop.f32.mrb[6].mxu1 }
 0x126   : > { %v6499_v18 = vpop.f32.mrb[7].mxu1 }
 0x127   : > { %v1331_v17 = vadd.f32 %v6412_v13, %v8491_v54  ;;  %v8501_v19 = vadd.f32 %v6497_v15, %v1328_v12  ;;  %v6500_v20 = vadd.f32 %v6499_v18, %v6498_v16 }
 0x129   : > { %v6413_v21 = vpop.f32.mrb[8].mxu0  ;;  %v8503_v22 = vadd.f32 %v6500_v20, %v1331_v17 }
 0x12a   : > { %v6414_v23 = vpop.f32.mrb[9].mxu0 }
 0x12b   : > { %v6415_v24 = vadd.f32 %v6414_v23, %v6413_v21  ;;  %v6416_v25 = vpop.f32.mrb[10].mxu0  ;;  %v6501_v26 = vpop.f32.mrb[8].mxu1 }
 0x12c   : > { %v6417_v27 = vpop.f32.mrb[11].mxu0  ;;  %v6502_v30 = vpop.f32.mrb[9].mxu1 }
 0x12d   : > { %v1336_v28 = vadd.f32 %v6415_v24, %v8491_v54  ;;  %v6418_v29 = vadd.f32 %v6417_v27, %v6416_v25  ;;  %v6503_v31 = vadd.f32 %v6502_v30, %v6501_v26  ;;  %v6504_v32 = vpop.f32.mrb[10].mxu1 }
 0x12e   : > { %v6505_v34 = vpop.f32.mrb[11].mxu1 }
 0x12f   : > { %v1339_v33 = vadd.f32 %v6418_v29, %v8491_v54  ;;  %v8507_v35 = vadd.f32 %v6503_v31, %v1336_v28  ;;  %v6506_v36 = vadd.f32 %v6505_v34, %v6504_v32 }
 0x131   : > { %v6419_v37 = vpop.f32.mrb[12].mxu0  ;;  %v8509_v38 = vadd.f32 %v6506_v36, %v1339_v33 }
 0x132   : > { %v6420_v39 = vpop.f32.mrb[13].mxu0 }
 0x133   : > { %v6421_v40 = vadd.f32 %v6420_v39, %v6419_v37  ;;  %v6422_v41 = vpop.f32.mrb[14].mxu0  ;;  %v6507_v42 = vpop.f32.mrb[12].mxu1 }
 0x134   : > { %v6423_v43 = vpop.f32.mrb[15].mxu0  ;;  %v6508_v46 = vpop.f32.mrb[13].mxu1 }
 0x135   : > { %v1344_v44 = vadd.f32 %v6421_v40, %v8491_v54  ;;  %v6424_v45 = vadd.f32 %v6423_v43, %v6422_v41  ;;  %v6509_v47 = vadd.f32 %v6508_v46, %v6507_v42  ;;  %v6510_v48 = vpop.f32.mrb[14].mxu1 }
 0x136   : > { %v6511_v50 = vpop.f32.mrb[15].mxu1 }
 0x137   : > { %v1347_v49 = vadd.f32 %v6424_v45, %v8491_v54  ;;  %v8513_v51 = vadd.f32 %v6509_v47, %v1344_v44  ;;  %v6512_v52 = vadd.f32 %v6511_v50, %v6510_v48 }
 0x139   : > { %v6425_v53 = vpop.f32.mrb[16].mxu0  ;;  %v8515_v55 = vadd.f32 %v6512_v52, %v1347_v49 }
 0x13a   : > { %v6426_v56 = vpop.f32.mrb[17].mxu0 }
 0x13b   : > { %v6427_v57 = vadd.f32 %v6426_v56, %v6425_v53  ;;  %v6428_v58 = vpop.f32.mrb[18].mxu0  ;;  %v6513_v59 = vpop.f32.mrb[16].mxu1 }
 0x13c   : > { %v6429_v60 = vpop.f32.mrb[19].mxu0  ;;  %v6514_v63 = vpop.f32.mrb[17].mxu1 }
 0x13d   : > { %v1352_v61 = vadd.f32 %v6427_v57, %v8491_v54  ;;  %v6430_v62 = vadd.f32 %v6429_v60, %v6428_v58  ;;  %v6515_v0 = vadd.f32 %v6514_v63, %v6513_v59  ;;  %v6516_v1 = vpop.f32.mrb[18].mxu1 }
 0x13e   : > { %v6517_v4 = vpop.f32.mrb[19].mxu1 }
 0x13f   : > { %v1355_v2 = vadd.f32 %v6430_v62, %v8491_v54  ;;  %v8519_v5 = vadd.f32 %v6515_v0, %v1352_v61  ;;  %v6518_v7 = vadd.f32 %v6517_v4, %v6516_v1 }
 0x141   : > { %v6431_v8 = vpop.f32.mrb[20].mxu0  ;;  %v8521_v9 = vadd.f32 %v6518_v7, %v1355_v2 }
 0x142   : > { %v6432_v10 = vpop.f32.mrb[21].mxu0 }
 0x143   : > { %v6433_v11 = vadd.f32 %v6432_v10, %v6431_v8  ;;  %v6434_v12 = vpop.f32.mrb[22].mxu0  ;;  %v6519_v13 = vpop.f32.mrb[20].mxu1 }
 0x144   : > { %v6435_v14 = vpop.f32.mrb[23].mxu0  ;;  %v6520_v17 = vpop.f32.mrb[21].mxu1 }
 0x145   : > { %v1360_v15 = vadd.f32 %v6433_v11, %v8491_v54  ;;  %v6436_v16 = vadd.f32 %v6435_v14, %v6434_v12  ;;  %v6521_v18 = vadd.f32 %v6520_v17, %v6519_v13  ;;  %v6522_v20 = vpop.f32.mrb[22].mxu1  ;;  %v7146_v17 = vld [vmem:[%s10037_s5] sm:$0xff]  }
 0x146   : > { %v6523_v23 = vpop.f32.mrb[23].mxu1  ;;  %6846 = vmatprep.subr.bf16.mxu0 %v7146_v17 }
 0x147   : > { %v1363_v21 = vadd.f32 %v6436_v16, %v8491_v54  ;;  %v8525_v24 = vadd.f32 %v6521_v18, %v1360_v15  ;;  %v6524_v25 = vadd.f32 %v6523_v23, %v6522_v20  ;;  %v7147_v18 = vld [vmem:[%s10037_s5 + $0x8] sm:$0xff]   ;;  %6847 = vmatpush3.bf16.msra.mxu0 %v7146_v17 }
 0x148   : > { %6848 = vmatprep.subr.bf16.mxu0 %v7147_v18 }
 0x149   : > { %v6437_v26 = vpop.f32.mrb[24].mxu0  ;;  %v8527_v27 = vadd.f32 %v6524_v25, %v1363_v21 }
 0x14a   : > { %v6438_v28 = vpop.f32.mrb[25].mxu0 }
 0x14b   : > { %v6439_v29 = vadd.f32 %v6438_v28, %v6437_v26  ;;  %v6440_v30 = vpop.f32.mrb[26].mxu0  ;;  %v6525_v31 = vpop.f32.mrb[24].mxu1  ;;  %6849 = vmatpush3.bf16.msra.mxu0 %v7147_v18 }
 0x14c   : > { %v6441_v32 = vpop.f32.mrb[27].mxu0  ;;  %v6526_v36 = vpop.f32.mrb[25].mxu1 }
 0x14d   : > { %v1368_v33 = vadd.f32 %v6439_v29, %v8491_v54  ;;  %v6442_v34 = vadd.f32 %v6441_v32, %v6440_v30  ;;  %v6527_v37 = vadd.f32 %v6526_v36, %v6525_v31  ;;  %v6528_v39 = vpop.f32.mrb[26].mxu1  ;;  %v7148_v30 = vld [vmem:[%s10037_s5 + $0x10] sm:$0xff]  }
 0x14e   : > { %v6529_v41 = vpop.f32.mrb[27].mxu1  ;;  %6850 = vmatprep.subr.bf16.mxu0 %v7148_v30 }
 0x14f   : > { %v1371_v40 = vadd.f32 %v6442_v34, %v8491_v54  ;;  %v8531_v42 = vadd.f32 %v6527_v37, %v1368_v33  ;;  %v6530_v43 = vadd.f32 %v6529_v41, %v6528_v39  ;;  %6851 = vmatpush3.bf16.msra.mxu0 %v7148_v30 }
 0x151   : > { %v6443_v44 = vpop.f32.mrb[28].mxu0  ;;  %v8533_v45 = vadd.f32 %v6530_v43, %v1371_v40  ;;  %v7149_v43 = vld [vmem:[%s10037_s5 + $0x18] sm:$0xff]  }
 0x152   : > { %v6444_v46 = vpop.f32.mrb[29].mxu0  ;;  %6852 = vmatprep.subr.bf16.mxu0 %v7149_v43 }
 0x153   : > { %v6445_v47 = vadd.f32 %v6444_v46, %v6443_v44  ;;  %v6446_v48 = vpop.f32.mrb[30].mxu0  ;;  %v6531_v49 = vpop.f32.mrb[28].mxu1  ;;  %6853 = vmatpush3.bf16.msra.mxu0 %v7149_v43 }
 0x154   : > { %v6447_v50 = vpop.f32.mrb[31].mxu0  ;;  %v6532_v56 = vpop.f32.mrb[29].mxu1 }
 0x155   : > { %v1376_v52 = vadd.f32 %v6445_v47, %v8491_v54  ;;  %v6448_v53 = vadd.f32 %v6447_v50, %v6446_v48  ;;  %v6533_v57 = vadd.f32 %v6532_v56, %v6531_v49  ;;  %v6534_v58 = vpop.f32.mrb[30].mxu1 }
 0x156   : > { %v6535_v60 = vpop.f32.mrb[31].mxu1 }
 0x157   : > { %v1379_v59 = vadd.f32 %v6448_v53, %v8491_v54  ;;  %v8537_v61 = vadd.f32 %v6533_v57, %v1376_v52  ;;  %v6536_v62 = vadd.f32 %v6535_v60, %v6534_v58 }
 0x159   : > { %v6449_v63 = vpop.f32.mrb[32].mxu0  ;;  %v8539_v0 = vadd.f32 %v6536_v62, %v1379_v59 }
 0x15a   : > { %v6450_v1 = vpop.f32.mrb[33].mxu0 }
 0x15b   : > { %v6451_v2 = vadd.f32 %v6450_v1, %v6449_v63  ;;  %v6452_v4 = vpop.f32.mrb[34].mxu0  ;;  %v6537_v7 = vpop.f32.mrb[32].mxu1 }
 0x15c   : > { %v6453_v8 = vpop.f32.mrb[35].mxu0  ;;  %v6538_v12 = vpop.f32.mrb[33].mxu1 }
 0x15d   : > { %v1384_v10 = vadd.f32 %v6451_v2, %v8491_v54  ;;  %v6454_v11 = vadd.f32 %v6453_v8, %v6452_v4  ;;  %v6539_v13 = vadd.f32 %v6538_v12, %v6537_v7  ;;  %v6540_v14 = vpop.f32.mrb[34].mxu1 }
 0x15e   : > { %v6541_v16 = vpop.f32.mrb[35].mxu1 }
 0x15f   : > { %v1387_v15 = vadd.f32 %v6454_v11, %v8491_v54  ;;  %v8549_v20 = vadd.f32 %v6539_v13, %v1384_v10  ;;  %v6542_v21 = vadd.f32 %v6541_v16, %v6540_v14 }
 0x161   : > { %v6455_v23 = vpop.f32.mrb[36].mxu0  ;;  %v8551_v25 = vadd.f32 %v6542_v21, %v1387_v15 }
 0x162   : > { %v6456_v26 = vpop.f32.mrb[37].mxu0 }
 0x163   : > { %v6457_v28 = vadd.f32 %v6456_v26, %v6455_v23  ;;  %v6458_v29 = vpop.f32.mrb[38].mxu0  ;;  %v6543_v31 = vpop.f32.mrb[36].mxu1 }
 0x164   : > { %v6459_v32 = vpop.f32.mrb[39].mxu0  ;;  %v6544_v36 = vpop.f32.mrb[37].mxu1 }
 0x165   : > { %v1392_v33 = vadd.f32 %v6457_v28, %v8491_v54  ;;  %v6460_v34 = vadd.f32 %v6459_v32, %v6458_v29  ;;  %v6545_v37 = vadd.f32 %v6544_v36, %v6543_v31  ;;  %v6546_v39 = vpop.f32.mrb[38].mxu1 }
 0x166   : > { %v6547_v41 = vpop.f32.mrb[39].mxu1 }
 0x167   : > { %v1395_v40 = vadd.f32 %v6460_v34, %v8491_v54  ;;  %v8561_v44 = vadd.f32 %v6545_v37, %v1392_v33  ;;  %v6548_v46 = vadd.f32 %v6547_v41, %v6546_v39 }
 0x169   : > { %v6461_v47 = vpop.f32.mrb[40].mxu0  ;;  %v8563_v48 = vadd.f32 %v6548_v46, %v1395_v40 }
 0x16a   : > { %v6462_v49 = vpop.f32.mrb[41].mxu0 }
 0x16b   : > { %v6463_v50 = vadd.f32 %v6462_v49, %v6461_v47  ;;  %v6464_v52 = vpop.f32.mrb[42].mxu0  ;;  %v6549_v53 = vpop.f32.mrb[40].mxu1 }
 0x16c   : > { %v6465_v56 = vpop.f32.mrb[43].mxu0  ;;  %v6550_v59 = vpop.f32.mrb[41].mxu1 }
 0x16d   : > { %v1400_v57 = vadd.f32 %v6463_v50, %v8491_v54  ;;  %v6466_v58 = vadd.f32 %v6465_v56, %v6464_v52  ;;  %v6551_v60 = vadd.f32 %v6550_v59, %v6549_v53  ;;  %v6552_v62 = vpop.f32.mrb[42].mxu1 }
 0x16e   : > { %v6553_v1 = vpop.f32.mrb[43].mxu1 }
 0x16f   : > { %v1403_v63 = vadd.f32 %v6466_v58, %v8491_v54  ;;  %v8567_v2 = vadd.f32 %v6551_v60, %v1400_v57  ;;  %v6554_v4 = vadd.f32 %v6553_v1, %v6552_v62 }
 0x171   : > { %v6467_v7 = vpop.f32.mrb[44].mxu0  ;;  %v8569_v8 = vadd.f32 %v6554_v4, %v1403_v63 }
 0x172   : > { %v6468_v10 = vpop.f32.mrb[45].mxu0 }
 0x173   : > { %v6469_v11 = vadd.f32 %v6468_v10, %v6467_v7  ;;  %v6470_v12 = vpop.f32.mrb[46].mxu0  ;;  %v6555_v13 = vpop.f32.mrb[44].mxu1 }
 0x174   : > { %v6471_v14 = vpop.f32.mrb[47].mxu0  ;;  %v6556_v17 = vpop.f32.mrb[45].mxu1 }
 0x175   : > { %v1408_v15 = vadd.f32 %v6469_v11, %v8491_v54  ;;  %v6472_v16 = vadd.f32 %v6471_v14, %v6470_v12  ;;  %v6557_v18 = vadd.f32 %v6556_v17, %v6555_v13  ;;  %v6558_v21 = vpop.f32.mrb[46].mxu1 }
 0x176   : > { %v6559_v26 = vpop.f32.mrb[47].mxu1 }
 0x177   : > { %v1411_v23 = vadd.f32 %v6472_v16, %v8491_v54  ;;  %v8573_v28 = vadd.f32 %v6557_v18, %v1408_v15  ;;  %v6560_v29 = vadd.f32 %v6559_v26, %v6558_v21 }
 0x179   : > { %v6577_v30 = vpop.f32.mrb[48].mxu0  ;;  %v8575_v31 = vadd.f32 %v6560_v29, %v1411_v23 }
 0x17a   : > { %v6578_v32 = vpop.f32.mrb[49].mxu0 }
 0x17b   : > { %v6579_v33 = vadd.f32 %v6578_v32, %v6577_v30  ;;  %v6580_v34 = vpop.f32.mrb[50].mxu0  ;;  %v6784_v37 = vpop.f32.mrb[48].mxu1 }
 0x17c   : > { %v6581_v36 = vpop.f32.mrb[51].mxu0  ;;  %v1706_v41 = vpop.f32.mrb[49].mxu1 }
 0x17d   : > { %v6582_v39 = vadd.f32 %v6581_v36, %v6580_v34  ;;  %v1578_v40 = vadd.f32 %v6579_v33, %v8495_v3  ;;  %v6785_v43 = vpop.f32.mrb[50].mxu1 }
 0x17e   : > { %v1709_v47 = vpop.f32.mrb[51].mxu1 }
 0x17f   : > { %v1707_v46 = vadd.f32 %v1706_v41, %v1578_v40  ;;  %v1581_v54 = vadd.f32 %v6582_v39, %v8497_v6 }
 0x181   : > { %v1710_v49 = vadd.f32 %v1709_v47, %v1581_v54  ;;  %v6583_v50 = vpop.f32.mrb[52].mxu0  ;;  %v1801_v53 = vmax.f32 %v1707_v46, 0.0 }
 0x182   : > { %v6584_v52 = vpop.f32.mrb[53].mxu0 }
 0x183   : > { %v1802_v56 = vmax.f32 %v1710_v49, 0.0  ;;  %v6585_v57 = vadd.f32 %v6584_v52, %v6583_v50  ;;  %v6586_v58 = vpop.f32.mrb[54].mxu0  ;;  %v6788_v60 = vpop.f32.mrb[52].mxu1 }
 0x184   : > { %v6587_v59 = vpop.f32.mrb[55].mxu0  ;;  %v1722_v3 = vpop.f32.mrb[53].mxu1 }
 0x185   : > { %v1825_v62 = vpack.c.bf16 %v1802_v56, %v1801_v53  ;;  %v1586_v63 = vadd.f32 %v6585_v57, %v8501_v19  ;;  %v6588_v1 = vadd.f32 %v6587_v59, %v6586_v58  ;;  %v6789_v4 = vpop.f32.mrb[54].mxu1 }
 0x186   : > { %v1725_v6 = vpop.f32.mrb[55].mxu1 }
 0x187   : > { %v1715_v7 = vadd.f32 %v6784_v37, %v1586_v63  ;;  %v1589_v10 = vadd.f32 %v6588_v1, %v8503_v22  ;;  %6822 = vmatprep.mubr.bf16.mxu1 %v1825_v62 }
 0x189   : > { %v1718_v11 = vadd.f32 %v6785_v43, %v1589_v10  ;;  %v6589_v12 = vpop.f32.mrb[56].mxu0  ;;  %v1803_v14 = vmax.f32 %v1715_v7, 0.0 }
 0x18a   : > { %v6590_v13 = vpop.f32.mrb[57].mxu0 }
 0x18b   : > { %v1804_v15 = vmax.f32 %v1718_v11, 0.0  ;;  %v6591_v16 = vadd.f32 %v6590_v13, %v6589_v12  ;;  %v6592_v17 = vpop.f32.mrb[58].mxu0  ;;  %v6792_v21 = vpop.f32.mrb[56].mxu1 }
 0x18c   : > { %v6593_v18 = vpop.f32.mrb[59].mxu0  ;;  %v1738_v29 = vpop.f32.mrb[57].mxu1 }
 0x18d   : > { %v1826_v23 = vpack.c.bf16 %v1804_v15, %v1803_v14  ;;  %v6594_v26 = vadd.f32 %v6593_v18, %v6592_v17  ;;  %v1594_v19 = vadd.f32 %v6591_v16, %v8507_v35  ;;  %v6793_v30 = vpop.f32.mrb[58].mxu1 }
 0x18e   : > { %v1741_v33 = vpop.f32.mrb[59].mxu1 }
 0x18f   : > { %v1723_v32 = vadd.f32 %v1722_v3, %v1594_v19  ;;  %6823 = vmatmul.mubr.bf16.vlgmr.msra.gmra.mrb[72].mxu1 %v1826_v23  ;;  %v1597_v22 = vadd.f32 %v6594_v26, %v8509_v38 }
 0x191   : > { %v1726_v34 = vadd.f32 %v1725_v6, %v1597_v22  ;;  %v6595_v36 = vpop.f32.mrb[60].mxu0  ;;  %v1805_v39 = vmax.f32 %v1723_v32, 0.0 }
 0x192   : > { %v6596_v37 = vpop.f32.mrb[61].mxu0 }
 0x193   : > { %v1806_v40 = vmax.f32 %v1726_v34, 0.0  ;;  %v6597_v41 = vadd.f32 %v6596_v37, %v6595_v36  ;;  %v6598_v43 = vpop.f32.mrb[62].mxu0  ;;  %v8583_v54 = vpop.f32.mrb[60].mxu1 }
 0x194   : > { %v6599_v46 = vpop.f32.mrb[63].mxu0  ;;  %v1754_v50 = vpop.f32.mrb[61].mxu1 }
 0x195   : > { %v1827_v47 = vpack.c.bf16 %v1806_v40, %v1805_v39  ;;  %v1602_v35 = vadd.f32 %v6597_v41, %v8513_v51  ;;  %v6600_v49 = vadd.f32 %v6599_v46, %v6598_v43  ;;  %v8586_v52 = vpop.f32.mrb[62].mxu1 }
 0x196   : > { %v1757_v56 = vpop.f32.mrb[63].mxu1 }
 0x197   : > { %v1731_v53 = vadd.f32 %v6788_v60, %v1602_v35  ;;  %v1605_v38 = vadd.f32 %v6600_v49, %v8515_v55  ;;  %6826 = vmatprep.mubr.bf16.mxu1 %v1827_v47 }
 0x199   : > { %v1734_v57 = vadd.f32 %v6789_v4, %v1605_v38  ;;  %v6601_v58 = vpop.f32.mrb[64].mxu0  ;;  %v1807_v62 = vmax.f32 %v1731_v53, 0.0 }
 0x19a   : > { %v6602_v59 = vpop.f32.mrb[65].mxu0 }
 0x19b   : > { %v1808_v63 = vmax.f32 %v1734_v57, 0.0  ;;  %v6603_v1 = vadd.f32 %v6602_v59, %v6601_v58  ;;  %v6604_v3 = vpop.f32.mrb[66].mxu0  ;;  %v8589_v10 = vpop.f32.mrb[64].mxu1 }
 0x19c   : > { %v6605_v7 = vpop.f32.mrb[67].mxu0  ;;  %v8592_v12 = vpop.f32.mrb[65].mxu1 }
 0x19d   : > { %v6606_v51 = vadd.f32 %v6605_v7, %v6604_v3  ;;  %v1610_v6 = vadd.f32 %v6603_v1, %v8519_v5  ;;  %v1828_v11 = vpack.c.bf16 %v1808_v63, %v1807_v62  ;;  %v8594_v60 = vpop.f32.mrb[66].mxu1 }
 0x19e   : > { %v1773_v13 = vpop.f32.mrb[67].mxu1 }
 0x19f   : > { %v1739_v55 = vadd.f32 %v1738_v29, %v1610_v6  ;;  %6827 = vmatmul.mubr.bf16.gmra.mrb[76].mxu1 %v1828_v11  ;;  %v1613_v4 = vadd.f32 %v6606_v51, %v8521_v9 }
 0x1a1   : > { %v1742_v14 = vadd.f32 %v1741_v33, %v1613_v4  ;;  %v6607_v15 = vpop.f32.mrb[68].mxu0  ;;  %v1809_v17 = vmax.f32 %v1739_v55, 0.0 }
 0x1a2   : > { %v6608_v16 = vpop.f32.mrb[69].mxu0 }
 0x1a3   : > { %v1810_v18 = vmax.f32 %v1742_v14, 0.0  ;;  %v6609_v23 = vadd.f32 %v6608_v16, %v6607_v15  ;;  %v6610_v26 = vpop.f32.mrb[70].mxu0  ;;  %v8597_v32 = vpop.f32.mrb[68].mxu1 }
 0x1a4   : > { %v6611_v19 = vpop.f32.mrb[71].mxu0  ;;  %v8600_v36 = vpop.f32.mrb[69].mxu1 }
 0x1a5   : > { %v1829_v5 = vpack.c.bf16 %v1810_v18, %v1809_v17  ;;  %v1618_v22 = vadd.f32 %v6609_v23, %v8525_v24  ;;  %v6612_v34 = vadd.f32 %v6611_v19, %v6610_v26  ;;  %v8602_v29 = vpop.f32.mrb[70].mxu1 }
 0x1a6   : > { %v8605_v37 = vpop.f32.mrb[71].mxu1 }
 0x1a7   : > { %v1747_v9 = vadd.f32 %v6792_v21, %v1618_v22  ;;  %v1621_v33 = vadd.f32 %v6612_v34, %v8527_v27  ;;  %6830 = vmatprep.mubr.bf16.mxu1 %v1829_v5 }
 0x1a9   : > { %v1750_v39 = vadd.f32 %v6793_v30, %v1621_v33  ;;  %v6613_v40 = vpop.f32.mrb[72].mxu0  ;;  %v1811_v43 = vmax.f32 %v1747_v9, 0.0 }
 0x1aa   : > { %v6614_v41 = vpop.f32.mrb[73].mxu0 }
 0x1ab   : > { %v1812_v46 = vmax.f32 %v1750_v39, 0.0  ;;  %v6615_v47 = vadd.f32 %v6614_v41, %v6613_v40  ;;  %v6616_v35 = vpop.f32.mrb[74].mxu0 }
 0x1ac   : > { %v6617_v49 = vpop.f32.mrb[75].mxu0 }
 0x1ad   : > { %v6618_v24 = vadd.f32 %v6617_v49, %v6616_v35  ;;  %v1626_v53 = vadd.f32 %v6615_v47, %v8531_v42  ;;  %v1830_v38 = vpack.c.bf16 %v1812_v46, %v1811_v43 }
 0x1af   : > { %v1755_v57 = vadd.f32 %v1754_v50, %v1626_v53  ;;  %6831 = vmatmul.mubr.bf16.gmra.mrb[80].mxu1 %v1830_v38  ;;  %v1629_v21 = vadd.f32 %v6618_v24, %v8533_v45 }
 0x1b1   : > { %v1758_v27 = vadd.f32 %v1757_v56, %v1629_v21  ;;  %v6619_v58 = vpop.f32.mrb[76].mxu0  ;;  %v1813_v62 = vmax.f32 %v1755_v57, 0.0 }
 0x1b2   : > { %v6620_v59 = vpop.f32.mrb[77].mxu0 }
 0x1b3   : > { %v1814_v30 = vmax.f32 %v1758_v27, 0.0  ;;  %v6621_v63 = vadd.f32 %v6620_v59, %v6619_v58  ;;  %v6622_v1 = vpop.f32.mrb[78].mxu0 }
 0x1b4   : > { %v6623_v3 = vpop.f32.mrb[79].mxu0 }
 0x1b5   : > { %v1831_v7 = vpack.c.bf16 %v1814_v30, %v1813_v62  ;;  %v1634_v51 = vadd.f32 %v6621_v63, %v8537_v61  ;;  %v6624_v6 = vadd.f32 %v6623_v3, %v6622_v1 }
 0x1b7   : > { %v1763_v11 = vadd.f32 %v8583_v54, %v1634_v51  ;;  %v1637_v42 = vadd.f32 %v6624_v6, %v8539_v0  ;;  %6834 = vmatprep.mubr.bf16.mxu1 %v1831_v7  ;;  %v7150_v51 = vld [vmem:[%s10039_s7] sm:$0x3f]  }
 0x1b8   : > { %7042 = vmatprep.subr.msk.bf16.mxu1 %vm2365_vm1, %v7150_v51 }
 0x1b9   : > { %v1766_v50 = vadd.f32 %v8586_v52, %v1637_v42  ;;  %v6625_v45 = vpop.f32.mrb[80].mxu0  ;;  %v1815_v55 = vmax.f32 %v1763_v11, 0.0 }
 0x1ba   : > { %v6626_v56 = vpop.f32.mrb[81].mxu0 }
 0x1bb   : > { %v1816_v4 = vmax.f32 %v1766_v50, 0.0  ;;  %v6627_v14 = vadd.f32 %v6626_v56, %v6625_v45  ;;  %v6628_v15 = vpop.f32.mrb[82].mxu0 }
 0x1bc   : > { %v6629_v16 = vpop.f32.mrb[83].mxu0 }
 0x1bd   : > { %v6630_v17 = vadd.f32 %v6629_v16, %v6628_v15  ;;  %v1642_v18 = vadd.f32 %v6627_v14, %v8549_v20  ;;  %v1832_v23 = vpack.c.bf16 %v1816_v4, %v1815_v55 }
 0x1bf   : > { %v1771_v61 = vadd.f32 %v8592_v12, %v1642_v18  ;;  %6835 = vmatmul.mubr.bf16.gmra.mrb[84].mxu1 %v1832_v23  ;;  %v1645_v54 = vadd.f32 %v6630_v17, %v8551_v25 }
 0x1c1   : > { %v1774_v0 = vadd.f32 %v1773_v13, %v1645_v54  ;;  %v6631_v26 = vpop.f32.mrb[84].mxu0  ;;  %v1817_v52 = vmax.f32 %v1771_v61, 0.0 }
 0x1c2   : > { %v6632_v19 = vpop.f32.mrb[85].mxu0 }
 0x1c3   : > { %v1818_v5 = vmax.f32 %v1774_v0, 0.0  ;;  %v6633_v22 = vadd.f32 %v6632_v19, %v6631_v26  ;;  %v6634_v34 = vpop.f32.mrb[86].mxu0 }
 0x1c4   : > { %v6635_v9 = vpop.f32.mrb[87].mxu0 }
 0x1c5   : > { %v1833_v33 = vpack.c.bf16 %v1818_v5, %v1817_v52  ;;  %v1650_v39 = vadd.f32 %v6633_v22, %v8561_v44  ;;  %v6636_v40 = vadd.f32 %v6635_v9, %v6634_v34 }
 0x1c7   : > { %v1779_v20 = vadd.f32 %v8589_v10, %v1650_v39  ;;  %v1653_v41 = vadd.f32 %v6636_v40, %v8563_v48  ;;  %6838 = vmatprep.mubr.bf16.mxu1 %v1833_v33 }
 0x1c9   : > { %v1782_v12 = vadd.f32 %v8594_v60, %v1653_v41  ;;  %v6637_v25 = vpop.f32.mrb[88].mxu0  ;;  %v1819_v43 = vmax.f32 %v1779_v20, 0.0 }
 0x1ca   : > { %v6638_v13 = vpop.f32.mrb[89].mxu0 }
 0x1cb   : > { %v1820_v46 = vmax.f32 %v1782_v12, 0.0  ;;  %v6639_v47 = vadd.f32 %v6638_v13, %v6637_v25  ;;  %v6640_v35 = vpop.f32.mrb[90].mxu0 }
 0x1cc   : > { %v6641_v49 = vpop.f32.mrb[91].mxu0 }
 0x1cd   : > { %v6642_v24 = vadd.f32 %v6641_v49, %v6640_v35  ;;  %v1658_v53 = vadd.f32 %v6639_v47, %v8567_v2  ;;  %v1834_v38 = vpack.c.bf16 %v1820_v46, %v1819_v43 }
 0x1cf   : > { %v1787_v44 = vadd.f32 %v8600_v36, %v1658_v53  ;;  %6839 = vmatmul.mubr.bf16.gmra.mrb[88].mxu1 %v1834_v38  ;;  %v1661_v10 = vadd.f32 %v6642_v24, %v8569_v8 }
 0x1d1   : > { %v1790_v48 = vadd.f32 %v8605_v37, %v1661_v10  ;;  %v6643_v57 = vpop.f32.mrb[92].mxu0  ;;  %v1821_v21 = vmax.f32 %v1787_v44, 0.0 }
 0x1d2   : > { %v6644_v60 = vpop.f32.mrb[93].mxu0 }
 0x1d3   : > { %v1822_v27 = vmax.f32 %v1790_v48, 0.0  ;;  %v6645_v58 = vadd.f32 %v6644_v60, %v6643_v57  ;;  %v6646_v59 = vpop.f32.mrb[94].mxu0 }
 0x1d4   : > { %v6647_v62 = vpop.f32.mrb[95].mxu0 }
 0x1d5   : > { %v1835_v30 = vpack.c.bf16 %v1822_v27, %v1821_v21  ;;  %v1666_v63 = vadd.f32 %v6645_v58, %v8573_v28  ;;  %v6648_v1 = vadd.f32 %v6647_v62, %v6646_v59  ;;  %v2367_v28 = vsel %vm2365_vm1, %v7150_v51, 0 }
 0x1d6   : > { %6879 = vmatpush3.bf16.msra.mxu1 %v2367_v28 }
 0x1d7   : > { %v1795_v2 = vadd.f32 %v8597_v32, %v1666_v63  ;;  %v1669_v36 = vadd.f32 %v6648_v1, %v8575_v31  ;;  %6842 = vmatprep.mubr.bf16.mxu1 %v1835_v30  ;;  %v8636_v31 = vld [vmem:[%s10036_s4] ss:$0 sm:$0xff] }
 0x1d9   : > { %v1798_v8 = vadd.f32 %v8602_v29, %v1669_v36  ;;  %v1823_v3 = vmax.f32 %v1795_v2, 0.0 }
 0x1db   : > { %v1824_v37 = vmax.f32 %v1798_v8, 0.0 }
 0x1dd   : > { %v1836_v7 = vpack.c.bf16 %v1824_v37, %v1823_v3 }
 0x1df   : > { %6843 = vmatmul.mubr.bf16.gmra.mrb[92].mxu1 %v1836_v7 }
 0x262   : > { %v6824_v32 = vpop.f32.mrb[72].mxu1 }
 0x263   : > { %v1951_v29 = vadd.f32 %v6824_v32, %v8636_v31  ;;  %v1942_v6 = vpop.f32.mrb[73].mxu1 }
 0x264   : > { %v1943_v11 = vadd.f32 %v8636_v31, %v1942_v6  ;;  %v6825_v42 = vpop.f32.mrb[74].mxu1 }
 0x265   : > { %v1954_v50 = vadd.f32 %v6825_v42, %v8636_v31  ;;  %v1945_v45 = vpop.f32.mrb[75].mxu1  ;;  %v2039_v55 = vmax.f32 %v1951_v29, 0.0 }
 0x266   : > { %v1946_v56 = vadd.f32 %v8636_v31, %v1945_v45  ;;  %v2037_v14 = vmax.f32 %v1943_v11, 0.0 }
 0x267   : > { %v2040_v4 = vmax.f32 %v1954_v50, 0.0 }
 0x268   : > { %v2038_v15 = vmax.f32 %v1946_v56, 0.0 }
 0x269   : > { %v2062_v16 = vpack.c.bf16 %v2040_v4, %v2039_v55 }
 0x26a   : > { %v2061_v17 = vpack.c.bf16 %v2038_v15, %v2037_v14 }
 0x26c   : > { %6854 = vmatprep.mubr.msk.bf16.mxu0 %vm2112_vm2, %v2061_v17 }
 0x26d   : > { %6855 = vmatmul.mubr.msk.bf16.vlgmr.msra.gmra.mrb[96].mxu0 %vm2112_vm2, %v2062_v16 }
 0x272   : > { %v6828_v18 = vpop.f32.mrb[76].mxu1 }
 0x273   : > { %v1967_v23 = vadd.f32 %v6828_v18, %v8636_v31  ;;  %v1958_v61 = vpop.f32.mrb[77].mxu1 }
 0x274   : > { %v1959_v54 = vadd.f32 %v8636_v31, %v1958_v61  ;;  %v6829_v0 = vpop.f32.mrb[78].mxu1 }
 0x275   : > { %v1970_v26 = vadd.f32 %v6829_v0, %v8636_v31  ;;  %v1961_v19 = vpop.f32.mrb[79].mxu1  ;;  %v2043_v5 = vmax.f32 %v1967_v23, 0.0 }
 0x276   : > { %v1962_v52 = vadd.f32 %v8636_v31, %v1961_v19  ;;  %v2041_v34 = vmax.f32 %v1959_v54, 0.0 }
 0x277   : > { %v2044_v22 = vmax.f32 %v1970_v26, 0.0 }
 0x278   : > { %v2042_v9 = vmax.f32 %v1962_v52, 0.0  ;;  %v7151_v52 = vld [vmem:[%s10041_s9] sm:$0xff]  }
 0x279   : > { %v2064_v33 = vpack.c.bf16 %v2044_v22, %v2043_v5  ;;  %v7152_v5 = vld [vmem:[%s10041_s9 + $0x8] sm:$0xff]   ;;  %6904 = vmatprep.subr.bf16.mxu0 %v7151_v52  ;;  %v7154_v22 = vld [vmem:[%s10041_s9 + $0x18] sm:$0xff]  }
 0x27a   : > { %v2063_v39 = vpack.c.bf16 %v2042_v9, %v2041_v34  ;;  %6905 = vmatpush3.bf16.msra.mxu0 %v7151_v52  ;;  %v7155_v34 = vld [vmem:[%s10041_s9 + $0x20] sm:$0xff]   ;;  %v7156_v9 = vld [vmem:[%s10041_s9 + $0x28] sm:$0xff]  }
 0x27b   : > { %6906 = vmatprep.subr.bf16.mxu0 %v7152_v5 }
 0x27c   : > { %6858 = vmatprep.mubr.msk.bf16.mxu0 %vm2112_vm2, %v2063_v39  ;;  %v8698_v39 = vld [vmem:[%s10038_s6] ss:$0 sm:$0xff] }
 0x27d   : > { %6859 = vmatmul.mubr.msk.bf16.gmra.mrb[100].mxu0 %vm2112_vm2, %v2064_v33  ;;  %v7157_v33 = vld [vmem:[%s10041_s9 + $0x30] sm:$0xff]  }
 0x27e   : > { %6907 = vmatpush3.bf16.msra.mxu0 %v7152_v5 }
 0x282   : > { %v6832_v40 = vpop.f32.mrb[80].mxu1 }
 0x283   : > { %v1983_v20 = vadd.f32 %v6832_v40, %v8636_v31  ;;  %v1974_v41 = vpop.f32.mrb[81].mxu1 }
 0x284   : > { %v1975_v12 = vadd.f32 %v8636_v31, %v1974_v41  ;;  %v6833_v25 = vpop.f32.mrb[82].mxu1 }
 0x285   : > { %v1986_v13 = vadd.f32 %v6833_v25, %v8636_v31  ;;  %v1977_v43 = vpop.f32.mrb[83].mxu1  ;;  %v2047_v47 = vmax.f32 %v1983_v20, 0.0 }
 0x286   : > { %v1978_v46 = vadd.f32 %v8636_v31, %v1977_v43  ;;  %v2045_v49 = vmax.f32 %v1975_v12, 0.0 }
 0x287   : > { %v2048_v35 = vmax.f32 %v1986_v13, 0.0 }
 0x288   : > { %v2046_v24 = vmax.f32 %v1978_v46, 0.0 }
 0x289   : > { %v2066_v53 = vpack.c.bf16 %v2048_v35, %v2047_v47 }
 0x28a   : > { %v2065_v38 = vpack.c.bf16 %v2046_v24, %v2045_v49 }
 0x28c   : > { %6862 = vmatprep.mubr.msk.bf16.mxu0 %vm2112_vm2, %v2065_v38 }
 0x28d   : > { %6863 = vmatmul.mubr.msk.bf16.gmra.mrb[104].mxu0 %vm2112_vm2, %v2066_v53 }
 0x292   : > { %v6836_v44 = vpop.f32.mrb[84].mxu1 }
 0x293   : > { %v1999_v10 = vadd.f32 %v6836_v44, %v8636_v31  ;;  %v1990_v48 = vpop.f32.mrb[85].mxu1 }
 0x294   : > { %v1991_v57 = vadd.f32 %v8636_v31, %v1990_v48  ;;  %v6837_v60 = vpop.f32.mrb[86].mxu1 }
 0x295   : > { %v2002_v21 = vadd.f32 %v6837_v60, %v8636_v31  ;;  %v1993_v27 = vpop.f32.mrb[87].mxu1  ;;  %v2051_v59 = vmax.f32 %v1999_v10, 0.0 }
 0x296   : > { %v1994_v58 = vadd.f32 %v8636_v31, %v1993_v27  ;;  %v2049_v30 = vmax.f32 %v1991_v57, 0.0 }
 0x297   : > { %v2052_v62 = vmax.f32 %v2002_v21, 0.0 }
 0x298   : > { %v2050_v63 = vmax.f32 %v1994_v58, 0.0 }
 0x299   : > { %v2068_v1 = vpack.c.bf16 %v2052_v62, %v2051_v59 }
 0x29a   : > { %v2067_v2 = vpack.c.bf16 %v2050_v63, %v2049_v30 }
 0x29c   : > { %6866 = vmatprep.mubr.msk.bf16.mxu0 %vm2112_vm2, %v2067_v2 }
 0x29d   : > { %6867 = vmatmul.mubr.msk.bf16.gmra.mrb[108].mxu0 %vm2112_vm2, %v2068_v1 }
 0x2a2   : > { %v6840_v36 = vpop.f32.mrb[88].mxu1 }
 0x2a3   : > { %v2015_v8 = vadd.f32 %v6840_v36, %v8636_v31  ;;  %v2006_v3 = vpop.f32.mrb[89].mxu1 }
 0x2a4   : > { %v2007_v37 = vadd.f32 %v8636_v31, %v2006_v3  ;;  %v6841_v7 = vpop.f32.mrb[90].mxu1 }
 0x2a5   : > { %v2018_v51 = vadd.f32 %v6841_v7, %v8636_v31  ;;  %v2009_v28 = vpop.f32.mrb[91].mxu1  ;;  %v2055_v29 = vmax.f32 %v2015_v8, 0.0 }
 0x2a6   : > { %v2010_v32 = vadd.f32 %v8636_v31, %v2009_v28  ;;  %v2053_v11 = vmax.f32 %v2007_v37, 0.0 }
 0x2a7   : > { %v2056_v6 = vmax.f32 %v2018_v51, 0.0 }
 0x2a8   : > { %v2054_v42 = vmax.f32 %v2010_v32, 0.0 }
 0x2a9   : > { %v2070_v50 = vpack.c.bf16 %v2056_v6, %v2055_v29 }
 0x2aa   : > { %v2069_v45 = vpack.c.bf16 %v2054_v42, %v2053_v11 }
 0x2ac   : > { %6870 = vmatprep.mubr.msk.bf16.mxu0 %vm2112_vm2, %v2069_v45 }
 0x2ad   : > { %6871 = vmatmul.mubr.msk.bf16.gmra.mrb[112].mxu0 %vm2112_vm2, %v2070_v50 }
 0x2b2   : > { %v6844_v56 = vpop.f32.mrb[92].mxu1 }
 0x2b3   : > { %v2031_v55 = vadd.f32 %v6844_v56, %v8636_v31  ;;  %v2022_v4 = vpop.f32.mrb[93].mxu1 }
 0x2b4   : > { %v2023_v14 = vadd.f32 %v8636_v31, %v2022_v4  ;;  %v6845_v15 = vpop.f32.mrb[94].mxu1 }
 0x2b5   : > { %v2034_v16 = vadd.f32 %v6845_v15, %v8636_v31  ;;  %v2025_v17 = vpop.f32.mrb[95].mxu1  ;;  %v2059_v23 = vmax.f32 %v2031_v55, 0.0 }
 0x2b6   : > { %v2026_v18 = vadd.f32 %v8636_v31, %v2025_v17  ;;  %v2057_v54 = vmax.f32 %v2023_v14, 0.0  ;;  %v7153_v31 = vld [vmem:[%s10041_s9 + $0x10] sm:$0xff]  }
 0x2b7   : > { %v2060_v61 = vmax.f32 %v2034_v16, 0.0  ;;  %6908 = vmatprep.subr.bf16.mxu0 %v7153_v31 }
 0x2b8   : > { %v2058_v0 = vmax.f32 %v2026_v18, 0.0  ;;  %6909 = vmatpush3.bf16.msra.mxu0 %v7153_v31 }
 0x2b9   : > { %v2072_v26 = vpack.c.bf16 %v2060_v61, %v2059_v23  ;;  %6910 = vmatprep.subr.bf16.mxu0 %v7154_v22 }
 0x2ba   : > { %v2071_v19 = vpack.c.bf16 %v2058_v0, %v2057_v54 }
 0x2bc   : > { %6874 = vmatprep.mubr.msk.bf16.mxu0 %vm2112_vm2, %v2071_v19  ;;  %6911 = vmatpush3.bf16.msra.mxu0 %v7154_v22 }
 0x2bd   : > { %6875 = vmatmul.mubr.msk.bf16.gmra.mrb[116].mxu0 %vm2112_vm2, %v2072_v26  ;;  %6912 = vmatprep.subr.bf16.mxu0 %v7155_v34 }
 0x2c0   : > { %6913 = vmatpush3.bf16.msra.mxu0 %v7155_v34 }
 0x2c1   : > { %6914 = vmatprep.subr.bf16.mxu0 %v7156_v9 }
 0x2c4   : > { %6915 = vmatpush3.bf16.msra.mxu0 %v7156_v9 }
 0x2c5   : > { %6916 = vmatprep.subr.bf16.mxu0 %v7157_v33 }
 0x2c8   : > { %6917 = vmatpush3.bf16.msra.mxu0 %v7157_v33 }
 0x340   : > { %v6856_v40 = vpop.f32.mrb[96].mxu0 }
 0x341   : > { %v2192_v20 = vadd.f32 %v6856_v40, %v8698_v39  ;;  %v2183_v41 = vpop.f32.mrb[97].mxu0 }
 0x342   : > { %v2184_v12 = vadd.f32 %v8698_v39, %v2183_v41  ;;  %v6857_v25 = vpop.f32.mrb[98].mxu0 }
 0x343   : > { %v2195_v13 = vadd.f32 %v6857_v25, %v8698_v39  ;;  %v2186_v43 = vpop.f32.mrb[99].mxu0  ;;  %v2280_v47 = vmax.f32 %v2192_v20, 0.0 }
 0x344   : > { %v2187_v46 = vadd.f32 %v8698_v39, %v2186_v43  ;;  %v2278_v49 = vmax.f32 %v2184_v12, 0.0 }
 0x345   : > { %v2281_v35 = vmax.f32 %v2195_v13, 0.0 }
 0x346   : > { %v2279_v24 = vmax.f32 %v2187_v46, 0.0 }
 0x347   : > { %v2303_v53 = vpack.c.bf16 %v2281_v35, %v2280_v47 }
 0x348   : > { %v2302_v38 = vpack.c.bf16 %v2279_v24, %v2278_v49 }
 0x34a   : > { %6880 = vmatprep.mubr.msk.bf16.mxu1 %vm2328_vm3, %v2302_v38 }
 0x34b   : > { %6881 = vmatmul.mubr.msk.bf16.vlgmr.msra.gmra.mrb[96].mxu1 %vm2328_vm3, %v2303_v53 }
 0x350   : > { %v6860_v44 = vpop.f32.mrb[100].mxu0 }
 0x351   : > { %v2208_v10 = vadd.f32 %v6860_v44, %v8698_v39  ;;  %v2199_v48 = vpop.f32.mrb[101].mxu0 }
 0x352   : > { %v2200_v57 = vadd.f32 %v8698_v39, %v2199_v48  ;;  %v6861_v60 = vpop.f32.mrb[102].mxu0 }
 0x353   : > { %v2211_v21 = vadd.f32 %v6861_v60, %v8698_v39  ;;  %v2202_v27 = vpop.f32.mrb[103].mxu0  ;;  %v2284_v59 = vmax.f32 %v2208_v10, 0.0 }
 0x354   : > { %v2203_v58 = vadd.f32 %v8698_v39, %v2202_v27  ;;  %v2282_v30 = vmax.f32 %v2200_v57, 0.0 }
 0x355   : > { %v2285_v62 = vmax.f32 %v2211_v21, 0.0 }
 0x356   : > { %v2283_v63 = vmax.f32 %v2203_v58, 0.0  ;;  %v7158_v58 = vld [vmem:[%s10041_s9 + $0x38] sm:$0xff]  }
 0x357   : > { %v2305_v1 = vpack.c.bf16 %v2285_v62, %v2284_v59  ;;  %6918 = vmatprep.subr.bf16.mxu0 %v7158_v58 }
 0x358   : > { %v2304_v2 = vpack.c.bf16 %v2283_v63, %v2282_v30  ;;  %6919 = vmatpush3.bf16.msra.mxu0 %v7158_v58  ;;  %v8748_v30 = vld [vmem:[%s10040_s8] ss:$0 sm:$0xff] }
 0x359   : > { %v7160_v58 = vld [vmem:[%s10045_s13] sm:$0xff]  }
 0x35a   : > { %6884 = vmatprep.mubr.msk.bf16.mxu1 %vm2328_vm3, %v2304_v2  ;;  %6970 = vmatprep.subr.bf16.mxu0 %v7160_v58 }
 0x35b   : > { %6885 = vmatmul.mubr.msk.bf16.gmra.mrb[100].mxu1 %vm2328_vm3, %v2305_v1 }
 0x360   : > { %v6864_v36 = vpop.f32.mrb[104].mxu0 }
 0x361   : > { %v2224_v8 = vadd.f32 %v6864_v36, %v8698_v39  ;;  %v2215_v3 = vpop.f32.mrb[105].mxu0 }
 0x362   : > { %v2216_v37 = vadd.f32 %v8698_v39, %v2215_v3  ;;  %v6865_v7 = vpop.f32.mrb[106].mxu0 }
 0x363   : > { %v2227_v51 = vadd.f32 %v6865_v7, %v8698_v39  ;;  %v2218_v28 = vpop.f32.mrb[107].mxu0  ;;  %v2288_v29 = vmax.f32 %v2224_v8, 0.0 }
 0x364   : > { %v2219_v32 = vadd.f32 %v8698_v39, %v2218_v28  ;;  %v2286_v11 = vmax.f32 %v2216_v37, 0.0 }
 0x365   : > { %v2289_v6 = vmax.f32 %v2227_v51, 0.0 }
 0x366   : > { %v2287_v42 = vmax.f32 %v2219_v32, 0.0 }
 0x367   : > { %v2307_v50 = vpack.c.bf16 %v2289_v6, %v2288_v29 }
 0x368   : > { %v2306_v45 = vpack.c.bf16 %v2287_v42, %v2286_v11 }
 0x36a   : > { %6888 = vmatprep.mubr.msk.bf16.mxu1 %vm2328_vm3, %v2306_v45 }
 0x36b   : > { %6889 = vmatmul.mubr.msk.bf16.gmra.mrb[104].mxu1 %vm2328_vm3, %v2307_v50 }
 0x370   : > { %v6868_v56 = vpop.f32.mrb[108].mxu0 }
 0x371   : > { %v2240_v55 = vadd.f32 %v6868_v56, %v8698_v39  ;;  %v2231_v4 = vpop.f32.mrb[109].mxu0 }
 0x372   : > { %v2232_v14 = vadd.f32 %v8698_v39, %v2231_v4  ;;  %v6869_v15 = vpop.f32.mrb[110].mxu0 }
 0x373   : > { %v2243_v16 = vadd.f32 %v6869_v15, %v8698_v39  ;;  %v2234_v17 = vpop.f32.mrb[111].mxu0  ;;  %v2292_v23 = vmax.f32 %v2240_v55, 0.0 }
 0x374   : > { %v2235_v18 = vadd.f32 %v8698_v39, %v2234_v17  ;;  %v2290_v54 = vmax.f32 %v2232_v14, 0.0 }
 0x375   : > { %v2293_v61 = vmax.f32 %v2243_v16, 0.0 }
 0x376   : > { %v2291_v0 = vmax.f32 %v2235_v18, 0.0 }
 0x377   : > { %v2309_v26 = vpack.c.bf16 %v2293_v61, %v2292_v23 }
 0x378   : > { %v2308_v19 = vpack.c.bf16 %v2291_v0, %v2290_v54 }
 0x37a   : > { %6892 = vmatprep.mubr.msk.bf16.mxu1 %vm2328_vm3, %v2308_v19 }
 0x37b   : > { %6893 = vmatmul.mubr.msk.bf16.gmra.mrb[108].mxu1 %vm2328_vm3, %v2309_v26 }
 0x380   : > { %v6872_v52 = vpop.f32.mrb[112].mxu0 }
 0x381   : > { %v2256_v5 = vadd.f32 %v6872_v52, %v8698_v39  ;;  %v2247_v31 = vpop.f32.mrb[113].mxu0 }
 0x382   : > { %v2248_v22 = vadd.f32 %v8698_v39, %v2247_v31  ;;  %v6873_v34 = vpop.f32.mrb[114].mxu0 }
 0x383   : > { %v2259_v9 = vadd.f32 %v6873_v34, %v8698_v39  ;;  %v2250_v33 = vpop.f32.mrb[115].mxu0  ;;  %v2296_v20 = vmax.f32 %v2256_v5, 0.0 }
 0x384   : > { %v2251_v40 = vadd.f32 %v8698_v39, %v2250_v33  ;;  %v2294_v12 = vmax.f32 %v2248_v22, 0.0 }
 0x385   : > { %v2297_v41 = vmax.f32 %v2259_v9, 0.0 }
 0x386   : > { %v2295_v25 = vmax.f32 %v2251_v40, 0.0 }
 0x387   : > { %v2311_v13 = vpack.c.bf16 %v2297_v41, %v2296_v20 }
 0x388   : > { %v2310_v43 = vpack.c.bf16 %v2295_v25, %v2294_v12 }
 0x38a   : > { %6896 = vmatprep.mubr.msk.bf16.mxu1 %vm2328_vm3, %v2310_v43 }
 0x38b   : > { %6897 = vmatmul.mubr.msk.bf16.gmra.mrb[112].mxu1 %vm2328_vm3, %v2311_v13 }
 0x390   : > { %v6876_v46 = vpop.f32.mrb[116].mxu0 }
 0x391   : > { %v2272_v47 = vadd.f32 %v6876_v46, %v8698_v39  ;;  %v2263_v35 = vpop.f32.mrb[117].mxu0 }
 0x392   : > { %v2264_v49 = vadd.f32 %v8698_v39, %v2263_v35  ;;  %v6877_v24 = vpop.f32.mrb[118].mxu0 }
 0x393   : > { %v2275_v53 = vadd.f32 %v6877_v24, %v8698_v39  ;;  %v2266_v38 = vpop.f32.mrb[119].mxu0  ;;  %v2300_v10 = vmax.f32 %v2272_v47, 0.0 }
 0x394   : > { %v2267_v44 = vadd.f32 %v8698_v39, %v2266_v38  ;;  %v2298_v57 = vmax.f32 %v2264_v49, 0.0  ;;  %v7159_v39 = vld [vmem:[%s10043_s11] sm:$0x3f]  }
 0x395   : > { %v2301_v48 = vmax.f32 %v2275_v53, 0.0  ;;  %7043 = vmatprep.subr.msk.bf16.mxu1 %vm2365_vm1, %v7159_v39  ;;  %v2905_v59 = vsel %vm2365_vm1, %v7159_v39, 0  ;;  %v7161_v39 = vld [vmem:[%s10045_s13 + $0x8] sm:$0xff]  }
 0x396   : > { %v2299_v60 = vmax.f32 %v2267_v44, 0.0  ;;  %6945 = vmatpush3.bf16.msra.mxu1 %v2905_v59  ;;  %v7162_v59 = vld [vmem:[%s10045_s13 + $0x10] sm:$0xff]  }
 0x397   : > { %v2313_v21 = vpack.c.bf16 %v2301_v48, %v2300_v10 }
 0x398   : > { %v2312_v27 = vpack.c.bf16 %v2299_v60, %v2298_v57 }
 0x39a   : > { %6900 = vmatprep.mubr.msk.bf16.mxu1 %vm2328_vm3, %v2312_v27 }
 0x39b   : > { %6901 = vmatmul.mubr.msk.bf16.gmra.mrb[116].mxu1 %vm2328_vm3, %v2313_v21 }
 0x41e   : > { %v6882_v62 = vpop.f32.mrb[96].mxu1 }
 0x41f   : > { %v2403_v63 = vpop.f32.mrb[97].mxu1  ;;  %v2412_v2 = vadd.f32 %v6882_v62, %v8748_v30  ;;  %v7163_v62 = vld [vmem:[%s10045_s13 + $0x18] sm:$0xff]  }
 0x420   : > { %v6883_v1 = vpop.f32.mrb[98].mxu1  ;;  %v2404_v3 = vadd.f32 %v8748_v30, %v2403_v63 }
 0x421   : > { %v2415_v36 = vadd.f32 %v6883_v1, %v8748_v30  ;;  %v2406_v8 = vpop.f32.mrb[99].mxu1 }
 0x422   : > { %v2407_v37 = vadd.f32 %v8748_v30, %v2406_v8 }
 0x423   : > { %v2499_v7 = vpack.c.bf16 %v2415_v36, %v2412_v2 }
 0x424   : > { %v2498_v51 = vpack.c.bf16 %v2407_v37, %v2404_v3 }
 0x425   : > { %6374 = vst [vmem:[%s8756_s23 + $0x8] sm:$0xff] %v2499_v7  }
 0x426   : > { %6318 = vst [vmem:[%s8756_s23] sm:$0xff] %v2498_v51   ;;  %6920 = vmatprep.mubr.bf16.mxu0 %v2498_v51 }
 0x427   : > { %6921 = vmatmul.mubr.bf16.vlgmr.msra.gmra.mrb[120].mxu0 %v2499_v7 }
 0x428   : > { %6971 = vmatpush3.bf16.msra.mxu0 %v7160_v58 }
 0x429   : > { %6972 = vmatprep.subr.bf16.mxu0 %v7161_v39 }
 0x42c   : > { %6973 = vmatpush3.bf16.msra.mxu0 %v7161_v39 }
 0x42d   : > { %6974 = vmatprep.subr.bf16.mxu0 %v7162_v59 }
 0x42e   : > { %v6886_v28 = vpop.f32.mrb[100].mxu1 }
 0x42f   : > { %v2419_v32 = vpop.f32.mrb[101].mxu1  ;;  %v2428_v6 = vadd.f32 %v6886_v28, %v8748_v30 }
 0x430   : > { %v6887_v29 = vpop.f32.mrb[102].mxu1  ;;  %v2420_v50 = vadd.f32 %v8748_v30, %v2419_v32  ;;  %6975 = vmatpush3.bf16.msra.mxu0 %v7162_v59 }
 0x431   : > { %v2431_v11 = vadd.f32 %v6887_v29, %v8748_v30  ;;  %v2422_v42 = vpop.f32.mrb[103].mxu1  ;;  %6976 = vmatprep.subr.bf16.mxu0 %v7163_v62 }
 0x432   : > { %v2423_v45 = vadd.f32 %v8748_v30, %v2422_v42 }
 0x433   : > { %v2501_v56 = vpack.c.bf16 %v2431_v11, %v2428_v6 }
 0x434   : > { %v2500_v55 = vpack.c.bf16 %v2423_v45, %v2420_v50  ;;  %6977 = vmatpush3.bf16.msra.mxu0 %v7163_v62 }
 0x435   : > { %6376 = vst [vmem:[%s8756_s23 + $0x18] sm:$0xff] %v2501_v56  }
 0x436   : > { %6375 = vst [vmem:[%s8756_s23 + $0x10] sm:$0xff] %v2500_v55   ;;  %6924 = vmatprep.mubr.bf16.mxu0 %v2500_v55 }
 0x437   : > { %6925 = vmatmul.mubr.bf16.gmra.mrb[124].mxu0 %v2501_v56 }
 0x43e   : > { %v6890_v4 = vpop.f32.mrb[104].mxu1 }
 0x43f   : > { %v2435_v14 = vpop.f32.mrb[105].mxu1  ;;  %v2444_v16 = vadd.f32 %v6890_v4, %v8748_v30 }
 0x440   : > { %v6891_v15 = vpop.f32.mrb[106].mxu1  ;;  %v2436_v23 = vadd.f32 %v8748_v30, %v2435_v14 }
 0x441   : > { %v2447_v17 = vadd.f32 %v6891_v15, %v8748_v30  ;;  %v2438_v18 = vpop.f32.mrb[107].mxu1 }
 0x442   : > { %v2439_v61 = vadd.f32 %v8748_v30, %v2438_v18 }
 0x443   : > { %v2503_v54 = vpack.c.bf16 %v2447_v17, %v2444_v16 }
 0x444   : > { %v2502_v0 = vpack.c.bf16 %v2439_v61, %v2436_v23 }
 0x445   : > { %6378 = vst [vmem:[%s8756_s23 + $0x28] sm:$0xff] %v2503_v54  }
 0x446   : > { %6377 = vst [vmem:[%s8756_s23 + $0x20] sm:$0xff] %v2502_v0   ;;  %6928 = vmatprep.mubr.bf16.mxu0 %v2502_v0 }
 0x447   : > { %6929 = vmatmul.mubr.bf16.gmra.mrb[128].mxu0 %v2503_v54 }
 0x44e   : > { %v6894_v26 = vpop.f32.mrb[108].mxu1 }
 0x44f   : > { %v2451_v19 = vpop.f32.mrb[109].mxu1  ;;  %v2460_v5 = vadd.f32 %v6894_v26, %v8748_v30 }
 0x450   : > { %v6895_v52 = vpop.f32.mrb[110].mxu1  ;;  %v2452_v34 = vadd.f32 %v8748_v30, %v2451_v19 }
 0x451   : > { %v2463_v31 = vadd.f32 %v6895_v52, %v8748_v30  ;;  %v2454_v22 = vpop.f32.mrb[111].mxu1 }
 0x452   : > { %v2455_v9 = vadd.f32 %v8748_v30, %v2454_v22 }
 0x453   : > { %v2505_v33 = vpack.c.bf16 %v2463_v31, %v2460_v5 }
 0x454   : > { %v2504_v40 = vpack.c.bf16 %v2455_v9, %v2452_v34 }
 0x455   : > { %6380 = vst [vmem:[%s8756_s23 + $0x38] sm:$0xff] %v2505_v33  }
 0x456   : > { %6379 = vst [vmem:[%s8756_s23 + $0x30] sm:$0xff] %v2504_v40   ;;  %6932 = vmatprep.mubr.bf16.mxu0 %v2504_v40 }
 0x457   : > { %6933 = vmatmul.mubr.bf16.gmra.mrb[132].mxu0 %v2505_v33 }
 0x45e   : > { %v6898_v20 = vpop.f32.mrb[112].mxu1 }
 0x45f   : > { %v2467_v41 = vpop.f32.mrb[113].mxu1  ;;  %v2476_v25 = vadd.f32 %v6898_v20, %v8748_v30 }
 0x460   : > { %v6899_v12 = vpop.f32.mrb[114].mxu1  ;;  %v2468_v46 = vadd.f32 %v8748_v30, %v2467_v41 }
 0x461   : > { %v2479_v13 = vadd.f32 %v6899_v12, %v8748_v30  ;;  %v2470_v43 = vpop.f32.mrb[115].mxu1 }
 0x462   : > { %v2471_v47 = vadd.f32 %v8748_v30, %v2470_v43 }
 0x463   : > { %v2507_v35 = vpack.c.bf16 %v2479_v13, %v2476_v25 }
 0x464   : > { %v2506_v49 = vpack.c.bf16 %v2471_v47, %v2468_v46 }
 0x465   : > { %6382 = vst [vmem:[%s8756_s23 + $0x48] sm:$0xff] %v2507_v35  }
 0x466   : > { %6381 = vst [vmem:[%s8756_s23 + $0x40] sm:$0xff] %v2506_v49   ;;  %6936 = vmatprep.mubr.bf16.mxu0 %v2506_v49 }
 0x467   : > { %6937 = vmatmul.mubr.bf16.gmra.mrb[136].mxu0 %v2507_v35 }
 0x46e   : > { %v6902_v24 = vpop.f32.mrb[116].mxu1 }
 0x46f   : > { %v2483_v53 = vpop.f32.mrb[117].mxu1  ;;  %v2492_v44 = vadd.f32 %v6902_v24, %v8748_v30 }
 0x470   : > { %v6903_v38 = vpop.f32.mrb[118].mxu1  ;;  %v2484_v57 = vadd.f32 %v8748_v30, %v2483_v53 }
 0x471   : > { %v2495_v10 = vadd.f32 %v6903_v38, %v8748_v30  ;;  %v2486_v48 = vpop.f32.mrb[119].mxu1 }
 0x472   : > { %v2487_v60 = vadd.f32 %v8748_v30, %v2486_v48  ;;  %v8805_v30 = vld [vmem:[%s10042_s10] ss:$0 sm:$0xff] }
 0x473   : > { %v2509_v21 = vpack.c.bf16 %v2495_v10, %v2492_v44 }
 0x474   : > { %v2508_v27 = vpack.c.bf16 %v2487_v60, %v2484_v57 }
 0x475   : > { %6384 = vst [vmem:[%s8756_s23 + $0x58] sm:$0xff] %v2509_v21  }
 0x476   : > { %6383 = vst [vmem:[%s8756_s23 + $0x50] sm:$0xff] %v2508_v27   ;;  %6940 = vmatprep.mubr.bf16.mxu0 %v2508_v27 }
 0x477   : > { %6941 = vmatmul.mubr.bf16.gmra.mrb[140].mxu0 %v2509_v21 }
 0x4fa   : > { %v6922_v63 = vpop.f32.mrb[120].mxu0 }
 0x4fb   : > { %v2732_v1 = vadd.f32 %v6922_v63, %v8805_v30  ;;  %v2723_v2 = vpop.f32.mrb[121].mxu0 }
 0x4fc   : > { %v2724_v36 = vadd.f32 %v8805_v30, %v2723_v2  ;;  %v6923_v8 = vpop.f32.mrb[122].mxu0 }
 0x4fd   : > { %v2735_v3 = vadd.f32 %v6923_v8, %v8805_v30  ;;  %v2726_v37 = vpop.f32.mrb[123].mxu0  ;;  %v2820_v51 = vmax.f32 %v2732_v1, 0.0 }
 0x4fe   : > { %v2727_v7 = vadd.f32 %v8805_v30, %v2726_v37  ;;  %v2818_v32 = vmax.f32 %v2724_v36, 0.0 }
 0x4ff   : > { %v2821_v28 = vmax.f32 %v2735_v3, 0.0 }
 0x500   : > { %v2819_v29 = vmax.f32 %v2727_v7, 0.0 }
 0x501   : > { %v2843_v6 = vpack.c.bf16 %v2821_v28, %v2820_v51 }
 0x502   : > { %v2842_v11 = vpack.c.bf16 %v2819_v29, %v2818_v32 }
 0x504   : > { %6946 = vmatprep.mubr.msk.bf16.mxu1 %vm2328_vm3, %v2842_v11 }
 0x505   : > { %6947 = vmatmul.mubr.msk.bf16.vlgmr.msra.gmra.mrb[120].mxu1 %vm2328_vm3, %v2843_v6 }
 0x50a   : > { %v6926_v42 = vpop.f32.mrb[124].mxu0 }
 0x50b   : > { %v2748_v50 = vadd.f32 %v6926_v42, %v8805_v30  ;;  %v2739_v45 = vpop.f32.mrb[125].mxu0 }
 0x50c   : > { %v2740_v56 = vadd.f32 %v8805_v30, %v2739_v45  ;;  %v6927_v55 = vpop.f32.mrb[126].mxu0 }
 0x50d   : > { %v2751_v4 = vadd.f32 %v6927_v55, %v8805_v30  ;;  %v2742_v14 = vpop.f32.mrb[127].mxu0  ;;  %v2824_v16 = vmax.f32 %v2748_v50, 0.0 }
 0x50e   : > { %v2743_v15 = vadd.f32 %v8805_v30, %v2742_v14  ;;  %v2822_v18 = vmax.f32 %v2740_v56, 0.0 }
 0x50f   : > { %v2825_v17 = vmax.f32 %v2751_v4, 0.0 }
 0x510   : > { %v2823_v23 = vmax.f32 %v2743_v15, 0.0  ;;  %v7164_v15 = vld [vmem:[%s10047_s15] ss:$28 sps:$4 sm:$0xff]  }
 0x511   : > { %v2845_v61 = vpack.c.bf16 %v2825_v17, %v2824_v16  ;;  %v7166_v16 = vld [vmem:[%s10047_s15 + $0x4] ss:$28 sps:$4 sm:$0xff]   ;;  %v7175_v17 = vld [vmem:[%s10047_s15 + $0xc] ss:$28 sps:$4 sm:$0xff]  }
 0x512   : > { %v2844_v54 = vpack.c.bf16 %v2823_v23, %v2822_v18  ;;  %3701 = vmatprep.subr.bf16.mxu1 %v7166_v16  ;;  %v7167_v18 = vld [vmem:[%s10047_s15 + $0x38] ss:$28 sps:$4 sm:$0xff]   ;;  %3854 = vmatprep.subr.bf16.mxu0 %v7175_v17 }
 0x513   : > { %3702 = vmatpush1.bf16.msra.mxu1 %v7164_v15  ;;  %v7172_v23 = vld [vmem:[%s10047_s15 + $0x74] ss:$28 sps:$4 sm:$0xff]  }
 0x514   : > { %6950 = vmatprep.mubr.msk.bf16.mxu1 %vm2328_vm3, %v2844_v54  ;;  %v7178_v54 = vld [vmem:[%s10047_s15 + $0xac] ss:$28 sps:$4 sm:$0xff]  }
 0x515   : > { %6951 = vmatmul.mubr.msk.bf16.gmra.mrb[124].mxu1 %vm2328_vm3, %v2845_v61  ;;  %v7170_v61 = vld [vmem:[%s10047_s15 + $0x70] ss:$28 sps:$4 sm:$0xff]  }
 0x51a   : > { %v6930_v0 = vpop.f32.mrb[128].mxu0 }
 0x51b   : > { %v2764_v26 = vadd.f32 %v6930_v0, %v8805_v30  ;;  %v2755_v19 = vpop.f32.mrb[129].mxu0  ;;  %v7176_v0 = vld [vmem:[%s10047_s15 + $0xa8] ss:$28 sps:$4 sm:$0xff]  }
 0x51c   : > { %v2756_v52 = vadd.f32 %v8805_v30, %v2755_v19  ;;  %v6931_v5 = vpop.f32.mrb[130].mxu0  ;;  %v7182_v19 = vld [vmem:[%s10047_s15 + $0xe0] ss:$28 sps:$4 sm:$0xff]  }
 0x51d   : > { %v2767_v31 = vadd.f32 %v6931_v5, %v8805_v30  ;;  %v2758_v22 = vpop.f32.mrb[131].mxu0  ;;  %v2828_v9 = vmax.f32 %v2764_v26, 0.0  ;;  %v7184_v26 = vld [vmem:[%s10047_s15 + $0xe4] ss:$28 sps:$4 sm:$0xff]   ;;  %v7191_v5 = vld [vmem:[%s10047_s15 + $0x118] ss:$28 sps:$4 sm:$0xff]  }
 0x51e   : > { %v2759_v34 = vadd.f32 %v8805_v30, %v2758_v22  ;;  %v2826_v40 = vmax.f32 %v2756_v52, 0.0  ;;  %v7193_v52 = vld [vmem:[%s10047_s15 + $0x11c] ss:$28 sps:$4 sm:$0xff]   ;;  %v7197_v22 = vld [vmem:[%s10047_s15 + $0x150] ss:$28 sps:$4 sm:$0xff]  }
 0x51f   : > { %v2829_v33 = vmax.f32 %v2767_v31, 0.0  ;;  %v7199_v31 = vld [vmem:[%s10047_s15 + $0x154] ss:$28 sps:$4 sm:$0xff]  }
 0x520   : > { %v2827_v20 = vmax.f32 %v2759_v34, 0.0  ;;  %v8891_v34 = vld [vmem:[%s10044_s12] ss:$0 sm:$0xff] }
 0x521   : > { %v2847_v41 = vpack.c.bf16 %v2829_v33, %v2828_v9 }
 0x522   : > { %v2846_v12 = vpack.c.bf16 %v2827_v20, %v2826_v40 }
 0x524   : > { %6954 = vmatprep.mubr.msk.bf16.mxu1 %vm2328_vm3, %v2846_v12 }
 0x525   : > { %6955 = vmatmul.mubr.msk.bf16.gmra.mrb[128].mxu1 %vm2328_vm3, %v2847_v41 }
 0x52a   : > { %v6934_v25 = vpop.f32.mrb[132].mxu0 }
 0x52b   : > { %v2780_v13 = vadd.f32 %v6934_v25, %v8805_v30  ;;  %v2771_v43 = vpop.f32.mrb[133].mxu0 }
 0x52c   : > { %v2772_v46 = vadd.f32 %v8805_v30, %v2771_v43  ;;  %v6935_v47 = vpop.f32.mrb[134].mxu0 }
 0x52d   : > { %v2783_v35 = vadd.f32 %v6935_v47, %v8805_v30  ;;  %v2774_v49 = vpop.f32.mrb[135].mxu0  ;;  %v2832_v53 = vmax.f32 %v2780_v13, 0.0 }
 0x52e   : > { %v2775_v24 = vadd.f32 %v8805_v30, %v2774_v49  ;;  %v2830_v44 = vmax.f32 %v2772_v46, 0.0 }
 0x52f   : > { %v2833_v38 = vmax.f32 %v2783_v35, 0.0 }
 0x530   : > { %v2831_v10 = vmax.f32 %v2775_v24, 0.0 }
 0x531   : > { %v2849_v48 = vpack.c.bf16 %v2833_v38, %v2832_v53  ;;  %v7173_v53 = vld [vmem:[%s10047_s15 + $0x8] ss:$28 sps:$4 sm:$0xff]  }
 0x532   : > { %v2848_v57 = vpack.c.bf16 %v2831_v10, %v2830_v44  ;;  %v7181_v38 = vld [vmem:[%s10047_s15 + $0x44] ss:$28 sps:$4 sm:$0xff]   ;;  %v7187_v10 = vld [vmem:[%s10047_s15 + $0x7c] ss:$28 sps:$4 sm:$0xff]  }
 0x533   : > { %v7179_v44 = vld [vmem:[%s10047_s15 + $0x40] ss:$28 sps:$4 sm:$0xff]  }
 0x534   : > { %6958 = vmatprep.mubr.msk.bf16.mxu1 %vm2328_vm3, %v2848_v57  ;;  %v7185_v57 = vld [vmem:[%s10047_s15 + $0x78] ss:$28 sps:$4 sm:$0xff]  }
 0x535   : > { %6959 = vmatmul.mubr.msk.bf16.gmra.mrb[132].mxu1 %vm2328_vm3, %v2849_v48 }
 0x53a   : > { %v6938_v60 = vpop.f32.mrb[136].mxu0 }
 0x53b   : > { %v2796_v21 = vadd.f32 %v6938_v60, %v8805_v30  ;;  %v2787_v27 = vpop.f32.mrb[137].mxu0 }
 0x53c   : > { %v2788_v58 = vadd.f32 %v8805_v30, %v2787_v27  ;;  %v6939_v39 = vpop.f32.mrb[138].mxu0  ;;  %v7190_v27 = vld [vmem:[%s10047_s15 + $0xb4] ss:$28 sps:$4 sm:$0xff]  }
 0x53d   : > { %v2799_v59 = vadd.f32 %v6939_v39, %v8805_v30  ;;  %v2790_v62 = vpop.f32.mrb[139].mxu0  ;;  %v2836_v1 = vmax.f32 %v2796_v21, 0.0 }
 0x53e   : > { %v2791_v63 = vadd.f32 %v8805_v30, %v2790_v62  ;;  %v2834_v36 = vmax.f32 %v2788_v58, 0.0 }
 0x53f   : > { %v2837_v2 = vmax.f32 %v2799_v59, 0.0 }
 0x540   : > { %v2835_v8 = vmax.f32 %v2791_v63, 0.0 }
 0x541   : > { %v2851_v3 = vpack.c.bf16 %v2837_v2, %v2836_v1  ;;  %v7188_v1 = vld [vmem:[%s10047_s15 + $0xb0] ss:$28 sps:$4 sm:$0xff]  }
 0x542   : > { %v2850_v37 = vpack.c.bf16 %v2835_v8, %v2834_v36  ;;  %v7196_v8 = vld [vmem:[%s10047_s15 + $0xec] ss:$28 sps:$4 sm:$0xff]  }
 0x544   : > { %6962 = vmatprep.mubr.msk.bf16.mxu1 %vm2328_vm3, %v2850_v37 }
 0x545   : > { %6963 = vmatmul.mubr.msk.bf16.gmra.mrb[136].mxu1 %vm2328_vm3, %v2851_v3 }
 0x54a   : > { %v6942_v7 = vpop.f32.mrb[140].mxu0 }
 0x54b   : > { %v2812_v51 = vadd.f32 %v6942_v7, %v8805_v30  ;;  %v2803_v28 = vpop.f32.mrb[141].mxu0 }
 0x54c   : > { %v2804_v32 = vadd.f32 %v8805_v30, %v2803_v28  ;;  %v6943_v29 = vpop.f32.mrb[142].mxu0  ;;  %v7194_v28 = vld [vmem:[%s10047_s15 + $0xe8] ss:$28 sps:$4 sm:$0xff]  }
 0x54d   : > { %v2815_v6 = vadd.f32 %v6943_v29, %v8805_v30  ;;  %v2806_v11 = vpop.f32.mrb[143].mxu0  ;;  %v2840_v50 = vmax.f32 %v2812_v51, 0.0  ;;  %v7200_v29 = vld [vmem:[%s10047_s15 + $0x120] ss:$28 sps:$4 sm:$0xff]  }
 0x54e   : > { %v2807_v42 = vadd.f32 %v8805_v30, %v2806_v11  ;;  %v2838_v56 = vmax.f32 %v2804_v32, 0.0  ;;  %v7169_v30 = vld [vmem:[%s10047_s15 + $0x3c] ss:$28 sps:$4 sm:$0xff]   ;;  %v7202_v32 = vld [vmem:[%s10047_s15 + $0x124] ss:$28 sps:$4 sm:$0xff]  }
 0x54f   : > { %v2841_v45 = vmax.f32 %v2815_v6, 0.0  ;;  %3703 = vmatprep.subr.bf16.mxu1 %v7169_v30 }
 0x550   : > { %v2839_v55 = vmax.f32 %v2807_v42, 0.0  ;;  %3704 = vmatpush1.bf16.msra.mxu1 %v7167_v18 }
 0x551   : > { %v2853_v4 = vpack.c.bf16 %v2841_v45, %v2840_v50  ;;  %3705 = vmatprep.subr.bf16.mxu1 %v7172_v23 }
 0x552   : > { %v2852_v14 = vpack.c.bf16 %v2839_v55, %v2838_v56 }
 0x554   : > { %6966 = vmatprep.mubr.msk.bf16.mxu1 %vm2328_vm3, %v2852_v14  ;;  %3706 = vmatpush1.bf16.msra.mxu1 %v7170_v61 }
 0x555   : > { %6967 = vmatmul.mubr.msk.bf16.gmra.mrb[140].mxu1 %vm2328_vm3, %v2853_v4  ;;  %3707 = vmatprep.subr.bf16.mxu1 %v7178_v54 }
 0x558   : > { %3708 = vmatpush1.bf16.msra.mxu1 %v7176_v0 }
 0x559   : > { %3709 = vmatprep.subr.bf16.mxu1 %v7184_v26 }
 0x55c   : > { %3710 = vmatpush1.bf16.msra.mxu1 %v7182_v19 }
 0x55d   : > { %3711 = vmatprep.subr.bf16.mxu1 %v7193_v52 }
 0x560   : > { %3712 = vmatpush1.bf16.msra.mxu1 %v7191_v5 }
 0x561   : > { %3713 = vmatprep.subr.bf16.mxu1 %v7199_v31 }
 0x564   : > { %3714 = vmatpush1.bf16.msra.mxu1 %v7197_v22 }
 0x5d8   : > { %v6948_v9 = vpop.f32.mrb[120].mxu1 }
 0x5d9   : > { %v2950_v33 = vadd.f32 %v6948_v9, %v8891_v34  ;;  %v2941_v40 = vpop.f32.mrb[121].mxu1 }
 0x5da   : > { %v2942_v20 = vadd.f32 %v8891_v34, %v2941_v40  ;;  %v6949_v41 = vpop.f32.mrb[122].mxu1 }
 0x5db   : > { %v2953_v12 = vadd.f32 %v6949_v41, %v8891_v34  ;;  %v2944_v25 = vpop.f32.mrb[123].mxu1  ;;  %v3038_v43 = vmax.f32 %v2950_v33, 0.0 }
 0x5dc   : > { %v2945_v13 = vadd.f32 %v8891_v34, %v2944_v25  ;;  %v3036_v47 = vmax.f32 %v2942_v20, 0.0 }
 0x5dd   : > { %v3039_v46 = vmax.f32 %v2953_v12, 0.0 }
 0x5de   : > { %v3037_v35 = vmax.f32 %v2945_v13, 0.0 }
 0x5df   : > { %v3061_v49 = vpack.c.bf16 %v3039_v46, %v3038_v43 }
 0x5e0   : > { %v3060_v24 = vpack.c.bf16 %v3037_v35, %v3036_v47 }
 0x5e2   : > { %6978 = vmatprep.mubr.msk.bf16.mxu0 %vm2112_vm2, %v3060_v24 }
 0x5e3   : > { %6979 = vmatmul.mubr.msk.bf16.vlgmr.msra.gmra.mrb[144].mxu0 %vm2112_vm2, %v3061_v49 }
 0x5e4   : > { %3855 = vmatpush1.bf16.msra.mxu0 %v7173_v53 }
 0x5e5   : > { %3856 = vmatprep.subr.bf16.mxu0 %v7181_v38 }
 0x5e8   : > { %v6952_v48 = vpop.f32.mrb[124].mxu1  ;;  %3857 = vmatpush1.bf16.msra.mxu0 %v7179_v44 }
 0x5e9   : > { %v2966_v60 = vadd.f32 %v6952_v48, %v8891_v34  ;;  %v2957_v21 = vpop.f32.mrb[125].mxu1  ;;  %3858 = vmatprep.subr.bf16.mxu0 %v7187_v10 }
 0x5ea   : > { %v2958_v58 = vadd.f32 %v8891_v34, %v2957_v21  ;;  %v6953_v39 = vpop.f32.mrb[126].mxu1 }
 0x5eb   : > { %v2969_v59 = vadd.f32 %v6953_v39, %v8891_v34  ;;  %v2960_v62 = vpop.f32.mrb[127].mxu1  ;;  %v3042_v2 = vmax.f32 %v2966_v60, 0.0 }
 0x5ec   : > { %v2961_v63 = vadd.f32 %v8891_v34, %v2960_v62  ;;  %3859 = vmatpush1.bf16.msra.mxu0 %v7185_v57  ;;  %v3040_v3 = vmax.f32 %v2958_v58, 0.0 }
 0x5ed   : > { %v3043_v36 = vmax.f32 %v2969_v59, 0.0  ;;  %3860 = vmatprep.subr.bf16.mxu0 %v7190_v27 }
 0x5ee   : > { %v3041_v37 = vmax.f32 %v2961_v63, 0.0 }
 0x5ef   : > { %v3063_v7 = vpack.c.bf16 %v3043_v36, %v3042_v2 }
 0x5f0   : > { %v3062_v51 = vpack.c.bf16 %v3041_v37, %v3040_v3  ;;  %3861 = vmatpush1.bf16.msra.mxu0 %v7188_v1  ;;  %v7205_v3 = vld [vmem:[%s10047_s15 + $0x15c] ss:$28 sps:$4 sm:$0xff]  }
 0x5f1   : > { %3862 = vmatprep.subr.bf16.mxu0 %v7196_v8  ;;  %v7203_v37 = vld [vmem:[%s10047_s15 + $0x158] ss:$28 sps:$4 sm:$0xff]  }
 0x5f2   : > { %6982 = vmatprep.mubr.msk.bf16.mxu0 %vm2112_vm2, %v3062_v51  ;;  %v7206_v51 = vld [vmem:[%s10047_s15 + $0x188] ss:$28 sps:$4 sm:$0xff]  }
 0x5f3   : > { %6983 = vmatmul.mubr.msk.bf16.gmra.mrb[148].mxu0 %vm2112_vm2, %v3063_v7  ;;  %v7211_v7 = vld [vmem:[%s10047_s15 + $0x194] ss:$28 sps:$4 sm:$0xff]  }
 0x5f4   : > { %3863 = vmatpush1.bf16.msra.mxu0 %v7194_v28  ;;  %v7209_v28 = vld [vmem:[%s10047_s15 + $0x190] ss:$28 sps:$4 sm:$0xff]  }
 0x5f5   : > { %3864 = vmatprep.subr.bf16.mxu0 %v7202_v32  ;;  %v7981_v32 = vmov 0  }
 0x5f6   : > { %3733 = vmatprep.mubr.bf16.mxu1 %v7981_v32 }
 0x5f8   : > { %v6956_v6 = vpop.f32.mrb[128].mxu1  ;;  %3865 = vmatpush1.bf16.msra.mxu0 %v7200_v29  ;;  %v7214_v29 = vld [vmem:[%s10047_s15 + $0x14] ss:$28 sps:$4 sm:$0xff]  }
 0x5f9   : > { %v2982_v11 = vadd.f32 %v6956_v6, %v8891_v34  ;;  %v2973_v42 = vpop.f32.mrb[129].mxu1  ;;  %3866 = vmatprep.subr.bf16.mxu0 %v7205_v3  ;;  %v7227_v6 = vld [vmem:[%s10047_s15 + $0x18] ss:$28 sps:$4 sm:$0xff]  }
 0x5fa   : > { %v2974_v50 = vadd.f32 %v8891_v34, %v2973_v42  ;;  %v6957_v45 = vpop.f32.mrb[130].mxu1 }
 0x5fb   : > { %v2985_v56 = vadd.f32 %v6957_v45, %v8891_v34  ;;  %v2976_v55 = vpop.f32.mrb[131].mxu1  ;;  %v3046_v14 = vmax.f32 %v2982_v11, 0.0  ;;  %v8991_v11 = vld [vmem:[%s10046_s14] ss:$0 sm:$0xff] }
 0x5fc   : > { %v2977_v4 = vadd.f32 %v8891_v34, %v2976_v55  ;;  %v3044_v16 = vmax.f32 %v2974_v50, 0.0  ;;  %3867 = vmatpush1.bf16.msra.mxu0 %v7203_v37 }
 0x5fd   : > { %v3047_v15 = vmax.f32 %v2985_v56, 0.0  ;;  %3868 = vmatprep.subr.bf16.mxu0 %v7211_v7  ;;  %v7238_v7 = vld [vmem:[%s10047_s15 + $0x198] ss:$28 sps:$4 sm:$0xff]  }
 0x5fe   : > { %v3045_v30 = vmax.f32 %v2977_v4, 0.0 }
 0x5ff   : > { %v3065_v17 = vpack.c.bf16 %v3047_v15, %v3046_v14 }
 0x600   : > { %v3064_v18 = vpack.c.bf16 %v3045_v30, %v3044_v16  ;;  %3869 = vmatpush1.bf16.msra.mxu0 %v7209_v28 }
 0x601   : > { %7002 = vmatprep.subr.bf16.mxu0 %v7227_v6 }
 0x602   : > { %6986 = vmatprep.mubr.msk.bf16.mxu0 %vm2112_vm2, %v3064_v18 }
 0x603   : > { %6987 = vmatmul.mubr.msk.bf16.gmra.mrb[152].mxu0 %vm2112_vm2, %v3065_v17 }
 0x608   : > { %v6960_v23 = vpop.f32.mrb[132].mxu1 }
 0x609   : > { %v2998_v61 = vadd.f32 %v6960_v23, %v8891_v34  ;;  %v2989_v54 = vpop.f32.mrb[133].mxu1 }
 0x60a   : > { %v2990_v0 = vadd.f32 %v8891_v34, %v2989_v54  ;;  %v6961_v26 = vpop.f32.mrb[134].mxu1 }
 0x60b   : > { %v3001_v19 = vadd.f32 %v6961_v26, %v8891_v34  ;;  %v2992_v52 = vpop.f32.mrb[135].mxu1  ;;  %v3050_v31 = vmax.f32 %v2998_v61, 0.0  ;;  %v7212_v61 = vld [vmem:[%s10047_s15 + $0x10] ss:$28 sps:$4 sm:$0xff]  }
 0x60c   : > { %v2993_v5 = vadd.f32 %v8891_v34, %v2992_v52  ;;  %v3048_v9 = vmax.f32 %v2990_v0, 0.0  ;;  %v7217_v0 = vld [vmem:[%s10047_s15 + $0x4c] ss:$28 sps:$4 sm:$0xff]   ;;  %v7220_v52 = vld [vmem:[%s10047_s15 + $0x84] ss:$28 sps:$4 sm:$0xff]  }
 0x60d   : > { %v3051_v22 = vmax.f32 %v3001_v19, 0.0  ;;  %v7231_v26 = vld [vmem:[%s10047_s15 + $0x50] ss:$28 sps:$4 sm:$0xff]   ;;  %v7215_v19 = vld [vmem:[%s10047_s15 + $0x48] ss:$28 sps:$4 sm:$0xff]  }
 0x60e   : > { %v3049_v33 = vmax.f32 %v2993_v5, 0.0 }
 0x60f   : > { %v3067_v40 = vpack.c.bf16 %v3051_v22, %v3050_v31  ;;  %v7218_v31 = vld [vmem:[%s10047_s15 + $0x80] ss:$28 sps:$4 sm:$0xff]   ;;  %v7235_v22 = vld [vmem:[%s10047_s15 + $0x88] ss:$28 sps:$4 sm:$0xff]  }
 0x610   : > { %v3066_v20 = vpack.c.bf16 %v3049_v33, %v3048_v9 }
 0x612   : > { %6990 = vmatprep.mubr.msk.bf16.mxu0 %vm2112_vm2, %v3066_v20 }
 0x613   : > { %6991 = vmatmul.mubr.msk.bf16.gmra.mrb[156].mxu0 %vm2112_vm2, %v3067_v40  ;;  %v7223_v40 = vld [vmem:[%s10047_s15 + $0xbc] ss:$28 sps:$4 sm:$0xff]  }
 0x618   : > { %v6964_v41 = vpop.f32.mrb[136].mxu1 }
 0x619   : > { %v3014_v12 = vadd.f32 %v6964_v41, %v8891_v34  ;;  %v3005_v25 = vpop.f32.mrb[137].mxu1 }
 0x61a   : > { %v3006_v13 = vadd.f32 %v8891_v34, %v3005_v25  ;;  %v6965_v43 = vpop.f32.mrb[138].mxu1 }
 0x61b   : > { %v3017_v46 = vadd.f32 %v6965_v43, %v8891_v34  ;;  %v3008_v47 = vpop.f32.mrb[139].mxu1  ;;  %v3054_v49 = vmax.f32 %v3014_v12, 0.0  ;;  %v7236_v12 = vld [vmem:[%s10047_s15 + $0xc0] ss:$28 sps:$4 sm:$0xff]  }
 0x61c   : > { %v3009_v35 = vadd.f32 %v8891_v34, %v3008_v47  ;;  %v3052_v53 = vmax.f32 %v3006_v13, 0.0 }
 0x61d   : > { %v3055_v24 = vmax.f32 %v3017_v46, 0.0  ;;  %v7221_v46 = vld [vmem:[%s10047_s15 + $0xb8] ss:$28 sps:$4 sm:$0xff]  }
 0x61e   : > { %v3053_v38 = vmax.f32 %v3009_v35, 0.0 }
 0x61f   : > { %v3069_v44 = vpack.c.bf16 %v3055_v24, %v3054_v49  ;;  %v7226_v49 = vld [vmem:[%s10047_s15 + $0xf4] ss:$28 sps:$4 sm:$0xff]  }
 0x620   : > { %v3068_v10 = vpack.c.bf16 %v3053_v38, %v3052_v53 }
 0x622   : > { %6994 = vmatprep.mubr.msk.bf16.mxu0 %vm2112_vm2, %v3068_v10  ;;  %v7224_v10 = vld [vmem:[%s10047_s15 + $0xf0] ss:$28 sps:$4 sm:$0xff]  }
 0x623   : > { %6995 = vmatmul.mubr.msk.bf16.gmra.mrb[160].mxu0 %vm2112_vm2, %v3069_v44 }
 0x628   : > { %v6968_v48 = vpop.f32.mrb[140].mxu1 }
 0x629   : > { %v3030_v57 = vadd.f32 %v6968_v48, %v8891_v34  ;;  %v3021_v60 = vpop.f32.mrb[141].mxu1  ;;  %v7237_v48 = vld [vmem:[%s10047_s15 + $0xf8] ss:$28 sps:$4 sm:$0xff]  }
 0x62a   : > { %v3022_v21 = vadd.f32 %v8891_v34, %v3021_v60  ;;  %v6969_v27 = vpop.f32.mrb[142].mxu1  ;;  %v7241_v60 = vld [vmem:[%s10047_s15 + $0x130] ss:$28 sps:$4 sm:$0xff]  }
 0x62b   : > { %v3033_v58 = vadd.f32 %v6969_v27, %v8891_v34  ;;  %v3024_v39 = vpop.f32.mrb[143].mxu1  ;;  %v3058_v62 = vmax.f32 %v3030_v57, 0.0  ;;  %v7230_v57 = vld [vmem:[%s10047_s15 + $0x12c] ss:$28 sps:$4 sm:$0xff]   ;;  %v7234_v27 = vld [vmem:[%s10047_s15 + $0x164] ss:$28 sps:$4 sm:$0xff]  }
 0x62c   : > { %v3025_v59 = vadd.f32 %v8891_v34, %v3024_v39  ;;  %v3056_v1 = vmax.f32 %v3022_v21, 0.0  ;;  %v7208_v34 = vld [vmem:[%s10047_s15 + $0x18c] ss:$28 sps:$4 sm:$0xff]   ;;  %v7232_v39 = vld [vmem:[%s10047_s15 + $0x160] ss:$28 sps:$4 sm:$0xff]  }
 0x62d   : > { %v3059_v63 = vmax.f32 %v3033_v58, 0.0  ;;  %3715 = vmatprep.subr.bf16.mxu1 %v7208_v34  ;;  %v7228_v21 = vld [vmem:[%s10047_s15 + $0x128] ss:$28 sps:$4 sm:$0xff]  }
 0x62e   : > { %v3057_v2 = vmax.f32 %v3025_v59, 0.0  ;;  %3716 = vmatpush1.bf16.msra.mxu1 %v7206_v51  ;;  %v7242_v59 = vld [vmem:[%s10047_s15 + $0x168] ss:$28 sps:$4 sm:$0xff]  }
 0x62f   : > { %v3071_v36 = vpack.c.bf16 %v3059_v63, %v3058_v62  ;;  %4007 = vmatprep.subr.bf16.mxu1 %v7214_v29 }
 0x630   : > { %v3070_v8 = vpack.c.bf16 %v3057_v2, %v3056_v1  ;;  %v7240_v1 = vld [vmem:[%s10047_s15 + $0x19c] ss:$28 sps:$4 sm:$0xff]  }
 0x632   : > { %6998 = vmatprep.mubr.msk.bf16.mxu0 %vm2112_vm2, %v3070_v8  ;;  %v7243_v8 = vld [vmem:[%s10047_s15 + $0x1a0] ss:$28 sps:$4 sm:$0xff]  }
 0x633   : > { %6999 = vmatmul.mubr.msk.bf16.gmra.mrb[164].mxu0 %vm2112_vm2, %v3071_v36 }
 0x634   : > { %3886 = vmatprep.mubr.bf16.mxu0 %v7981_v32 }
 0x6b6   : > { %v6980_v42 = vpop.f32.mrb[144].mxu0 }
 0x6b7   : > { %v3190_v50 = vadd.f32 %v6980_v42, %v8991_v11  ;;  %v3181_v45 = vpop.f32.mrb[145].mxu0 }
 0x6b8   : > { %v3182_v56 = vadd.f32 %v8991_v11, %v3181_v45  ;;  %v6981_v55 = vpop.f32.mrb[146].mxu0 }
 0x6b9   : > { %v3193_v4 = vadd.f32 %v6981_v55, %v8991_v11  ;;  %v3184_v14 = vpop.f32.mrb[147].mxu0  ;;  %v3278_v16 = vmax.f32 %v3190_v50, 0.0 }
 0x6ba   : > { %v3185_v15 = vadd.f32 %v8991_v11, %v3184_v14  ;;  %v3276_v17 = vmax.f32 %v3182_v56, 0.0 }
 0x6bb   : > { %v3279_v30 = vmax.f32 %v3193_v4, 0.0 }
 0x6bc   : > { %v3277_v18 = vmax.f32 %v3185_v15, 0.0 }
 0x6bd   : > { %v8997_v23 = vpack.c.bf16 %v3279_v30, %v3278_v16 }
 0x6be   : > { %v9002_v54 = vpack.c.bf16 %v3277_v18, %v3276_v17 }
 0x6c0   : > { %3734 = vmatmul.mubr.bf16.vlgmr.msra.gmra.mrb[144].mxu1 %v9002_v54  ;;  %3887 = vmatmul.mubr.bf16.vlgmr.msra.gmra.mrb[168].mxu0 %v9002_v54 }
 0x6c1   : > { %4008 = vmatpush1.bf16.msra.mxu1 %v7212_v61  ;;  %3743 = vmatprep.mubr.bf16.mxu1 %v7981_v32 }
 0x6c2   : > { %3896 = vmatprep.mubr.bf16.mxu0 %v7981_v32  ;;  %4009 = vmatprep.subr.bf16.mxu1 %v7217_v0 }
 0x6c3   : > { %7003 = vmatpush3.bf16.msra.mxu0 %v7227_v6 }
 0x6c4   : > { %7004 = vmatprep.subr.bf16.mxu0 %v7231_v26 }
 0x6c5   : > { %4010 = vmatpush1.bf16.msra.mxu1 %v7215_v19 }
 0x6c6   : > { %v6984_v5 = vpop.f32.mrb[148].mxu0  ;;  %4011 = vmatprep.subr.bf16.mxu1 %v7220_v52 }
 0x6c7   : > { %v3206_v9 = vadd.f32 %v6984_v5, %v8991_v11  ;;  %v3197_v33 = vpop.f32.mrb[149].mxu0  ;;  %7005 = vmatpush3.bf16.msra.mxu0 %v7231_v26 }
 0x6c8   : > { %v3198_v20 = vadd.f32 %v8991_v11, %v3197_v33  ;;  %v6985_v41 = vpop.f32.mrb[150].mxu0  ;;  %3744 = vmatmul.mubr.bf16.gmra.mrb[148].mxu1 %v8997_v23  ;;  %3897 = vmatmul.mubr.bf16.gmra.mrb[172].mxu0 %v8997_v23 }
 0x6c9   : > { %v3209_v25 = vadd.f32 %v6985_v41, %v8991_v11  ;;  %v3200_v13 = vpop.f32.mrb[151].mxu0  ;;  %3753 = vmatprep.mubr.bf16.mxu1 %v7981_v32  ;;  %3906 = vmatprep.mubr.bf16.mxu0 %v7981_v32  ;;  %v3282_v47 = vmax.f32 %v3206_v9, 0.0 }
 0x6ca   : > { %v3201_v43 = vadd.f32 %v8991_v11, %v3200_v13  ;;  %4012 = vmatpush1.bf16.msra.mxu1 %v7218_v31  ;;  %7006 = vmatprep.subr.bf16.mxu0 %v7235_v22  ;;  %v3280_v24 = vmax.f32 %v3198_v20, 0.0 }
 0x6cb   : > { %v3283_v35 = vmax.f32 %v3209_v25, 0.0  ;;  %4013 = vmatprep.subr.bf16.mxu1 %v7223_v40  ;;  %7007 = vmatpush3.bf16.msra.mxu0 %v7235_v22 }
 0x6cc   : > { %v3281_v53 = vmax.f32 %v3201_v43, 0.0  ;;  %7008 = vmatprep.subr.bf16.mxu0 %v7236_v12 }
 0x6cd   : > { %v9046_v38 = vpack.c.bf16 %v3283_v35, %v3282_v47 }
 0x6ce   : > { %v9048_v44 = vpack.c.bf16 %v3281_v53, %v3280_v24  ;;  %4014 = vmatpush1.bf16.msra.mxu1 %v7221_v46 }
 0x6cf   : > { %4015 = vmatprep.subr.bf16.mxu1 %v7226_v49  ;;  %7009 = vmatpush3.bf16.msra.mxu0 %v7236_v12 }
 0x6d0   : > { %3754 = vmatmul.mubr.bf16.gmra.mrb[152].mxu1 %v9048_v44  ;;  %3907 = vmatmul.mubr.bf16.gmra.mrb[176].mxu0 %v9048_v44 }
 0x6d1   : > { %3763 = vmatprep.mubr.bf16.mxu1 %v7981_v32  ;;  %3916 = vmatprep.mubr.bf16.mxu0 %v7981_v32 }
 0x6d2   : > { %4016 = vmatpush1.bf16.msra.mxu1 %v7224_v10  ;;  %7010 = vmatprep.subr.bf16.mxu0 %v7237_v48 }
 0x6d3   : > { %4017 = vmatprep.subr.bf16.mxu1 %v7230_v57  ;;  %7011 = vmatpush3.bf16.msra.mxu0 %v7237_v48 }
 0x6d4   : > { %7012 = vmatprep.subr.bf16.mxu0 %v7241_v60 }
 0x6d6   : > { %v6988_v58 = vpop.f32.mrb[152].mxu0  ;;  %4018 = vmatpush1.bf16.msra.mxu1 %v7228_v21 }
 0x6d7   : > { %v3222_v62 = vadd.f32 %v6988_v58, %v8991_v11  ;;  %v3213_v63 = vpop.f32.mrb[153].mxu0  ;;  %4019 = vmatprep.subr.bf16.mxu1 %v7234_v27  ;;  %7013 = vmatpush3.bf16.msra.mxu0 %v7241_v60 }
 0x6d8   : > { %v3214_v2 = vadd.f32 %v8991_v11, %v3213_v63  ;;  %v6989_v36 = vpop.f32.mrb[154].mxu0  ;;  %3764 = vmatmul.mubr.bf16.gmra.mrb[156].mxu1 %v9046_v38  ;;  %3917 = vmatmul.mubr.bf16.gmra.mrb[180].mxu0 %v9046_v38 }
 0x6d9   : > { %v3225_v3 = vadd.f32 %v6989_v36, %v8991_v11  ;;  %v3216_v37 = vpop.f32.mrb[155].mxu0  ;;  %3773 = vmatprep.mubr.bf16.mxu1 %v7981_v32  ;;  %3926 = vmatprep.mubr.bf16.mxu0 %v7981_v32  ;;  %v3286_v51 = vmax.f32 %v3222_v62, 0.0 }
 0x6da   : > { %v3217_v34 = vadd.f32 %v8991_v11, %v3216_v37  ;;  %4020 = vmatpush1.bf16.msra.mxu1 %v7232_v39  ;;  %7014 = vmatprep.subr.bf16.mxu0 %v7242_v59  ;;  %v3284_v29 = vmax.f32 %v3214_v2, 0.0 }
 0x6db   : > { %v3287_v28 = vmax.f32 %v3225_v3, 0.0  ;;  %4021 = vmatprep.subr.bf16.mxu1 %v7240_v1  ;;  %7015 = vmatpush3.bf16.msra.mxu0 %v7242_v59 }
 0x6dc   : > { %v3285_v6 = vmax.f32 %v3217_v34, 0.0  ;;  %7016 = vmatprep.subr.bf16.mxu0 %v7243_v8 }
 0x6dd   : > { %v9095_v42 = vpack.c.bf16 %v3287_v28, %v3286_v51 }
 0x6de   : > { %v9097_v50 = vpack.c.bf16 %v3285_v6, %v3284_v29  ;;  %4022 = vmatpush1.bf16.msra.mxu1 %v7238_v7 }
 0x6df   : > { %7017 = vmatpush3.bf16.msra.mxu0 %v7243_v8 }
 0x6e0   : > { %3774 = vmatmul.mubr.bf16.gmra.mrb[160].mxu1 %v9097_v50  ;;  %3927 = vmatmul.mubr.bf16.gmra.mrb[184].mxu0 %v9097_v50 }
 0x6e1   : > { %3783 = vmatprep.mubr.bf16.mxu1 %v7981_v32  ;;  %3936 = vmatprep.mubr.bf16.mxu0 %v7981_v32 }
 0x6e6   : > { %v6992_v45 = vpop.f32.mrb[156].mxu0 }
 0x6e7   : > { %v3238_v56 = vadd.f32 %v6992_v45, %v8991_v11  ;;  %v3229_v55 = vpop.f32.mrb[157].mxu0 }
 0x6e8   : > { %v3230_v4 = vadd.f32 %v8991_v11, %v3229_v55  ;;  %v6993_v14 = vpop.f32.mrb[158].mxu0  ;;  %3784 = vmatmul.mubr.bf16.gmra.mrb[164].mxu1 %v9095_v42  ;;  %3937 = vmatmul.mubr.bf16.gmra.mrb[188].mxu0 %v9095_v42 }
 0x6e9   : > { %v3241_v15 = vadd.f32 %v6993_v14, %v8991_v11  ;;  %v3232_v16 = vpop.f32.mrb[159].mxu0  ;;  %3793 = vmatprep.mubr.bf16.mxu1 %v7981_v32  ;;  %3946 = vmatprep.mubr.bf16.mxu0 %v7981_v32  ;;  %v3290_v17 = vmax.f32 %v3238_v56, 0.0 }
 0x6ea   : > { %v3233_v30 = vadd.f32 %v8991_v11, %v3232_v16  ;;  %v3288_v61 = vmax.f32 %v3230_v4, 0.0 }
 0x6eb   : > { %v3291_v18 = vmax.f32 %v3241_v15, 0.0 }
 0x6ec   : > { %v3289_v0 = vmax.f32 %v3233_v30, 0.0 }
 0x6ed   : > { %v9111_v26 = vpack.c.bf16 %v3291_v18, %v3290_v17 }
 0x6ee   : > { %v9113_v19 = vpack.c.bf16 %v3289_v0, %v3288_v61 }
 0x6f0   : > { %3794 = vmatmul.mubr.bf16.gmra.mrb[168].mxu1 %v9113_v19  ;;  %3947 = vmatmul.mubr.bf16.gmra.mrb[192].mxu0 %v9113_v19 }
 0x6f1   : > { %3803 = vmatprep.mubr.bf16.mxu1 %v7981_v32  ;;  %3956 = vmatprep.mubr.bf16.mxu0 %v7981_v32 }
 0x6f6   : > { %v6996_v52 = vpop.f32.mrb[160].mxu0 }
 0x6f7   : > { %v3254_v5 = vadd.f32 %v6996_v52, %v8991_v11  ;;  %v3245_v31 = vpop.f32.mrb[161].mxu0 }
 0x6f8   : > { %v3246_v22 = vadd.f32 %v8991_v11, %v3245_v31  ;;  %v6997_v9 = vpop.f32.mrb[162].mxu0  ;;  %3804 = vmatmul.mubr.bf16.gmra.mrb[172].mxu1 %v9111_v26  ;;  %3957 = vmatmul.mubr.bf16.gmra.mrb[196].mxu0 %v9111_v26 }
 0x6f9   : > { %v3257_v33 = vadd.f32 %v6997_v9, %v8991_v11  ;;  %v3248_v40 = vpop.f32.mrb[163].mxu0  ;;  %3813 = vmatprep.mubr.bf16.mxu1 %v7981_v32  ;;  %3966 = vmatprep.mubr.bf16.mxu0 %v7981_v32  ;;  %v3294_v41 = vmax.f32 %v3254_v5, 0.0 }
 0x6fa   : > { %v3249_v20 = vadd.f32 %v8991_v11, %v3248_v40  ;;  %v3292_v25 = vmax.f32 %v3246_v22, 0.0 }
 0x6fb   : > { %v3295_v12 = vmax.f32 %v3257_v33, 0.0 }
 0x6fc   : > { %v3293_v13 = vmax.f32 %v3249_v20, 0.0 }
 0x6fd   : > { %v3309_v43 = vpack.c.bf16 %v3295_v12, %v3294_v41 }
 0x6fe   : > { %v3308_v46 = vpack.c.bf16 %v3293_v13, %v3292_v25 }
 0x700   : > { %3814 = vmatmul.mubr.bf16.gmra.mrb[176].mxu1 %v3308_v46  ;;  %3967 = vmatmul.mubr.bf16.gmra.mrb[200].mxu0 %v3308_v46 }
 0x701   : > { %3823 = vmatprep.mubr.bf16.mxu1 %v7981_v32  ;;  %3976 = vmatprep.mubr.bf16.mxu0 %v7981_v32 }
 0x706   : > { %v7000_v47 = vpop.f32.mrb[164].mxu0 }
 0x707   : > { %v3270_v35 = vadd.f32 %v7000_v47, %v8991_v11  ;;  %v3261_v49 = vpop.f32.mrb[165].mxu0 }
 0x708   : > { %v3262_v24 = vadd.f32 %v8991_v11, %v3261_v49  ;;  %v7001_v53 = vpop.f32.mrb[166].mxu0  ;;  %3824 = vmatmul.mubr.bf16.gmra.mrb[180].mxu1 %v3309_v43  ;;  %3977 = vmatmul.mubr.bf16.gmra.mrb[204].mxu0 %v3309_v43 }
 0x709   : > { %v3273_v10 = vadd.f32 %v7001_v53, %v8991_v11  ;;  %v3264_v48 = vpop.f32.mrb[167].mxu0  ;;  %3833 = vmatprep.mubr.bf16.mxu1 %v7981_v32  ;;  %3986 = vmatprep.mubr.bf16.mxu0 %v7981_v32  ;;  %v3298_v60 = vmax.f32 %v3270_v35, 0.0 }
 0x70a   : > { %v3265_v57 = vadd.f32 %v8991_v11, %v3264_v48  ;;  %v3296_v27 = vmax.f32 %v3262_v24, 0.0  ;;  %v3378_v11 = vlaneseq }
 0x70b   : > { %v3299_v21 = vmax.f32 %v3273_v10, 0.0 }
 0x70c   : > { %v3297_v58 = vmax.f32 %v3265_v57, 0.0 }
 0x70d   : > { %v3311_v39 = vpack.c.bf16 %v3299_v21, %v3298_v60 }
 0x70e   : > { %v3310_v59 = vpack.c.bf16 %v3297_v58, %v3296_v27 }
 0x710   : > { %3834 = vmatmul.mubr.bf16.gmra.mrb[184].mxu1 %v3310_v59  ;;  %3987 = vmatmul.mubr.bf16.gmra.mrb[208].mxu0 %v3310_v59 }
 0x711   : > { %3843 = vmatprep.mubr.bf16.mxu1 %v7981_v32  ;;  %3996 = vmatprep.mubr.bf16.mxu0 %v7981_v32 }
 0x718   : > { %3844 = vmatmul.mubr.bf16.gmra.mrb[188].mxu1 %v3311_v39  ;;  %3997 = vmatmul.mubr.bf16.gmra.mrb[212].mxu0 %v3311_v39 }
 0x719   : > { %7018 = vmatprep.mubr.bf16.mxu0 %v9002_v54  ;;  %4039 = vmatprep.mubr.bf16.mxu1 %v7981_v32 }
 0x720   : > { %4040 = vmatmul.mubr.bf16.vlgmr.msra.gmra.mrb[192].mxu1 %v9002_v54  ;;  %7019 = vmatmul.mubr.bf16.vlgmr.msra.gmra.mrb[216].mxu0 %v8997_v23 }
 0x721   : > { %7022 = vmatprep.mubr.bf16.mxu0 %v9048_v44  ;;  %4049 = vmatprep.mubr.bf16.mxu1 %v7981_v32 }
 0x728   : > { %4050 = vmatmul.mubr.bf16.gmra.mrb[196].mxu1 %v8997_v23  ;;  %7023 = vmatmul.mubr.bf16.gmra.mrb[220].mxu0 %v9046_v38  ;;  %v9165_v23 = vshrl.u32 %v3378_v11, 7 }
 0x729   : > { %7026 = vmatprep.mubr.bf16.mxu0 %v9097_v50  ;;  %4059 = vmatprep.mubr.bf16.mxu1 %v7981_v32 }
 0x72a   : > { %10079 = vst [vmem:[#allocation12_spill] sm:$0xff] %v9165_v23  ;;  %v3380_v54 = vsub.s32 0, %v9165_v23  ;;  %v3384_v62 = vsub.s32 1, %v9165_v23  ;;  %v3392_v63 = vsub.s32 3, %v9165_v23 }
 0x730   : > { %4060 = vmatmul.mubr.bf16.gmra.mrb[200].mxu1 %v9048_v44  ;;  %7027 = vmatmul.mubr.bf16.gmra.mrb[224].mxu0 %v9095_v42  ;;  %v3376_v44 = vld [vmem:[%s10048_s16] sm:$0x7f] }
 0x731   : > { %7030 = vmatprep.mubr.bf16.mxu0 %v9113_v19  ;;  %4069 = vmatprep.mubr.bf16.mxu1 %v7981_v32  ;;  %v9174_v1 = vrot.slane %v3376_v44, %v3380_v54  ;;  %v9180_v36 = vrot.slane %v3376_v44, %v3392_v63 }
 0x738   : > { %4070 = vmatmul.mubr.bf16.gmra.mrb[204].mxu1 %v9046_v38  ;;  %7031 = vmatmul.mubr.bf16.gmra.mrb[228].mxu0 %v9111_v26  ;;  %v3388_v38 = vsub.s32 2, %v9165_v23 }
 0x739   : > { %7034 = vmatprep.mubr.bf16.mxu0 %v3308_v46  ;;  %4079 = vmatprep.mubr.bf16.mxu1 %v7981_v32 }
 0x73a   : > { %v9176_v2 = vrot.slane %v3376_v44, %v3388_v38 }
 0x740   : > { %4080 = vmatmul.mubr.bf16.gmra.mrb[208].mxu1 %v9097_v50  ;;  %7035 = vmatmul.mubr.bf16.gmra.mrb[232].mxu0 %v3309_v43 }
 0x741   : > { %7038 = vmatprep.mubr.bf16.mxu0 %v3310_v59  ;;  %4089 = vmatprep.mubr.bf16.mxu1 %v7981_v32 }
 0x748   : > { %4090 = vmatmul.mubr.bf16.gmra.mrb[212].mxu1 %v9095_v42  ;;  %7039 = vmatmul.mubr.bf16.gmra.mrb[236].mxu0 %v3311_v39 }
 0x749   : > { %4099 = vmatprep.mubr.bf16.mxu1 %v7981_v32 }
 0x750   : > { %4100 = vmatmul.mubr.bf16.gmra.mrb[216].mxu1 %v9113_v19 }
 0x751   : > { %4109 = vmatprep.mubr.bf16.mxu1 %v7981_v32 }
 0x758   : > { %4110 = vmatmul.mubr.bf16.gmra.mrb[220].mxu1 %v9111_v26 }
 0x759   : > { %4119 = vmatprep.mubr.bf16.mxu1 %v7981_v32 }
 0x760   : > { %4120 = vmatmul.mubr.bf16.gmra.mrb[224].mxu1 %v3308_v46 }
 0x761   : > { %4129 = vmatprep.mubr.bf16.mxu1 %v7981_v32 }
 0x768   : > { %4130 = vmatmul.mubr.bf16.gmra.mrb[228].mxu1 %v3309_v43 }
 0x769   : > { %4139 = vmatprep.mubr.bf16.mxu1 %v7981_v32 }
 0x770   : > { %4140 = vmatmul.mubr.bf16.gmra.mrb[232].mxu1 %v3310_v59 }
 0x771   : > { %4149 = vmatprep.mubr.bf16.mxu1 %v7981_v32  ;;  %v9178_v32 = vrot.slane %v3376_v44, %v3384_v62 }
 0x778   : > { %4150 = vmatmul.mubr.bf16.gmra.mrb[236].mxu1 %v3311_v39 }
 0x793   : > { %v3735_v8 = vpop.f32.mrb[144].mxu1  ;;  %v3888_v3 = vpop.f32.mrb[168].mxu0 }
 0x794   : > { %v3736_v37 = vadd.f32 %v3735_v8, %v9174_v1  ;;  %v3889_v34 = vadd.f32 %v3888_v3, %v9176_v2  ;;  %v3737_v7 = vpop.f32.mrb[145].mxu1  ;;  %v3890_v51 = vpop.f32.mrb[169].mxu0 }
 0x795   : > { %v3738_v28 = vadd.f32 %v3737_v7, %v9178_v32  ;;  %v3891_v29 = vadd.f32 %v3890_v51, %v9180_v36  ;;  %v3739_v6 = vpop.f32.mrb[146].mxu1  ;;  %v3892_v42 = vpop.f32.mrb[170].mxu0 }
 0x796   : > { %v4289_v50 = vsub.f32 0.0, %v3736_v37  ;;  %v4291_v45 = vsub.f32 0.0, %v3889_v34  ;;  %v3740_v56 = vadd.f32 %v3739_v6, %v9174_v1  ;;  %v3893_v55 = vadd.f32 %v3892_v42, %v9176_v2  ;;  %v3741_v4 = vpop.f32.mrb[147].mxu1  ;;  %v3894_v14 = vpop.f32.mrb[171].mxu0 }
 0x797   : > { %v4290_v15 = vsub.f32 0.0, %v3738_v28  ;;  %v4292_v16 = vsub.f32 0.0, %v3891_v29  ;;  %v3742_v30 = vadd.f32 %v3741_v4, %v9178_v32  ;;  %v3895_v17 = vadd.f32 %v3894_v14, %v9180_v36 }
 0x798   : > { %v4457_v18 = vmul.f32 1.442695, %v4289_v50  ;;  %v4461_v61 = vmul.f32 1.442695, %v4291_v45  ;;  %v4296_v0 = vsub.f32 0.0, %v3740_v56  ;;  %v4298_v26 = vsub.f32 0.0, %v3893_v55 }
 0x799   : > { %v4459_v19 = vmul.f32 1.442695, %v4290_v15  ;;  %v4463_v52 = vmul.f32 1.442695, %v4292_v16  ;;  %v4297_v5 = vsub.f32 0.0, %v3742_v30  ;;  %v4299_v31 = vsub.f32 0.0, %v3895_v17 }
 0x79a   : > { %7244 = vpow2.f32 %v4457_v18  ;;  %v4471_v22 = vmul.f32 1.442695, %v4296_v0  ;;  %v4475_v9 = vmul.f32 1.442695, %v4298_v26 }
 0x79b   : > { %7246 = vpow2.f32 %v4461_v61  ;;  %v3745_v33 = vpop.f32.mrb[148].mxu1  ;;  %v3898_v40 = vpop.f32.mrb[172].mxu0  ;;  %v4473_v20 = vmul.f32 1.442695, %v4297_v5  ;;  %v4477_v43 = vmul.f32 1.442695, %v4299_v31 }
 0x79c   : > { %7248 = vpow2.f32 %v4459_v19  ;;  %v3746_v41 = vadd.f32 %v3745_v33, %v9174_v1  ;;  %v3899_v12 = vadd.f32 %v3898_v40, %v9176_v2  ;;  %v3747_v25 = vpop.f32.mrb[149].mxu1  ;;  %v3900_v13 = vpop.f32.mrb[173].mxu0 }
 0x79d   : > { %7250 = vpow2.f32 %v4463_v52  ;;  %v3748_v46 = vadd.f32 %v3747_v25, %v9178_v32  ;;  %v3901_v47 = vadd.f32 %v3900_v13, %v9180_v36  ;;  %v3749_v35 = vpop.f32.mrb[150].mxu1  ;;  %v3902_v49 = vpop.f32.mrb[174].mxu0 }
 0x79e   : > { %7252 = vpow2.f32 %v4471_v22  ;;  %v4303_v24 = vsub.f32 0.0, %v3746_v41  ;;  %v4305_v53 = vsub.f32 0.0, %v3899_v12  ;;  %v3750_v10 = vadd.f32 %v3749_v35, %v9174_v1  ;;  %v3751_v48 = vpop.f32.mrb[151].mxu1  ;;  %v3904_v57 = vpop.f32.mrb[175].mxu0 }
 0x79f   : > { %7254 = vpow2.f32 %v4475_v9  ;;  %v4304_v60 = vsub.f32 0.0, %v3748_v46  ;;  %v4306_v21 = vsub.f32 0.0, %v3901_v47  ;;  %v3903_v63 = vadd.f32 %v3902_v49, %v9176_v2 }
 0x7a0   : > { %7256 = vpow2.f32 %v4473_v20  ;;  %v4485_v27 = vmul.f32 1.442695, %v4303_v24  ;;  %v4489_v58 = vmul.f32 1.442695, %v4305_v53  ;;  %v4310_v39 = vsub.f32 0.0, %v3750_v10 }
 0x7a1   : > { %7258 = vpow2.f32 %v4477_v43  ;;  %v4487_v59 = vmul.f32 1.442695, %v4304_v60  ;;  %v4491_v11 = vmul.f32 1.442695, %v4306_v21  ;;  %v3752_v7 = vadd.f32 %v3751_v48, %v9178_v32 }
 0x7a2   : > { %7260 = vpow2.f32 %v4485_v27  ;;  %v4499_v54 = vmul.f32 1.442695, %v4310_v39  ;;  %v4312_v14 = vsub.f32 0.0, %v3903_v63  ;;  %v3905_v15 = vadd.f32 %v3904_v57, %v9180_v36 }
 0x7a3   : > { %7262 = vpow2.f32 %v4489_v58  ;;  %v3755_v38 = vpop.f32.mrb[152].mxu1  ;;  %v3908_v44 = vpop.f32.mrb[176].mxu0  ;;  %v4311_v17 = vsub.f32 0.0, %v3752_v7 }
 0x7a4   : > { %v7245_v62 = vpop.eup %7244  ;;  %7264 = vpow2.f32 %v4487_v59  ;;  %v3757_v8 = vpop.f32.mrb[153].mxu1  ;;  %v3756_v0 = vadd.f32 %v3755_v38, %v9174_v1  ;;  %v3909_v52 = vadd.f32 %v3908_v44, %v9176_v2  ;;  %v4503_v33 = vmul.f32 1.442695, %v4312_v14 }
 0x7a5   : > { %v3910_v3 = vpop.f32.mrb[177].mxu0  ;;  %v7247_v37 = vpop.eup %7246  ;;  %v4793_v34 = vadd.f32 1.0, %v7245_v62  ;;  %7266 = vpow2.f32 %v4491_v11  ;;  %v4313_v40 = vsub.f32 0.0, %v3905_v15  ;;  %v4501_v13 = vmul.f32 1.442695, %v4311_v17 }
 0x7a6   : > { %v3759_v51 = vpop.f32.mrb[154].mxu1  ;;  %v3912_v28 = vpop.f32.mrb[178].mxu0  ;;  %v4795_v6 = vadd.f32 1.0, %v7247_v37  ;;  %7268 = vpow2.f32 %v4499_v54  ;;  %v3758_v43 = vadd.f32 %v3757_v8, %v9178_v32  ;;  %v4317_v24 = vsub.f32 0.0, %v3756_v0 }
 0x7a7   : > { %v7249_v29 = vpop.eup %7248  ;;  %v3761_v42 = vpop.f32.mrb[155].mxu1  ;;  %7270 = vrcp.f32 %v4793_v34  ;;  %v3911_v53 = vadd.f32 %v3910_v3, %v9180_v36  ;;  %v4319_v21 = vsub.f32 0.0, %v3909_v52  ;;  %v3760_v27 = vadd.f32 %v3759_v51, %v9174_v1 }
 0x7a8   : > { %v7251_v50 = vpop.eup %7250  ;;  %v4794_v45 = vadd.f32 1.0, %v7249_v29  ;;  %v3914_v56 = vpop.f32.mrb[179].mxu0  ;;  %7272 = vrcp.f32 %v4795_v6  ;;  %v4505_v59 = vmul.f32 1.442695, %v4313_v40  ;;  %v3913_v11 = vadd.f32 %v3912_v28, %v9176_v2 }
 0x7a9   : > { %v7253_v55 = vpop.eup %7252  ;;  %v4796_v4 = vadd.f32 1.0, %v7251_v50  ;;  %v4318_v44 = vsub.f32 0.0, %v3758_v43  ;;  %v3762_v62 = vadd.f32 %v3761_v42, %v9178_v32  ;;  %v4513_v8 = vmul.f32 1.442695, %v4317_v24 }
 0x7aa   : > { %v7255_v16 = vpop.eup %7254  ;;  %7274 = vrcp.f32 %v4794_v45  ;;  %v4800_v30 = vadd.f32 1.0, %v7253_v55  ;;  %v4320_v3 = vsub.f32 0.0, %v3911_v53  ;;  %v3915_v37 = vadd.f32 %v3914_v56, %v9180_v36 }
 0x7ab   : > { %v7257_v18 = vpop.eup %7256  ;;  %7276 = vrcp.f32 %v4796_v4  ;;  %v4802_v61 = vadd.f32 1.0, %v7255_v16  ;;  %v3765_v5 = vpop.f32.mrb[156].mxu1  ;;  %v4517_v7 = vmul.f32 1.442695, %v4319_v21  ;;  %v4324_v51 = vsub.f32 0.0, %v3760_v27 }
 0x7ac   : > { %v7259_v26 = vpop.eup %7258  ;;  %7278 = vrcp.f32 %v4800_v30  ;;  %v4801_v19 = vadd.f32 1.0, %v7257_v18  ;;  %v3918_v31 = vpop.f32.mrb[180].mxu0  ;;  %v3766_v28 = vadd.f32 %v3765_v5, %v9174_v1  ;;  %v4326_v45 = vsub.f32 0.0, %v3913_v11 }
 0x7ad   : > { %v7261_v22 = vpop.eup %7260  ;;  %7280 = vrcp.f32 %v4802_v61  ;;  %v4803_v9 = vadd.f32 1.0, %v7259_v26  ;;  %v9200_v20 = vpop.f32.mrb[157].mxu1  ;;  %v3919_v56 = vadd.f32 %v3918_v31, %v9176_v2  ;;  %v4515_v16 = vmul.f32 1.442695, %v4318_v44 }
 0x7ae   : > { %v9202_v41 = vpop.f32.mrb[181].mxu0  ;;  %v7263_v12 = vpop.eup %7262  ;;  %7282 = vrcp.f32 %v4801_v19  ;;  %v4807_v25 = vadd.f32 1.0, %v7261_v22  ;;  %v4325_v30 = vsub.f32 0.0, %v3762_v62  ;;  %v4519_v0 = vmul.f32 1.442695, %v4320_v3 }
 0x7af   : > { %v9205_v46 = vpop.f32.mrb[158].mxu1  ;;  %v9207_v47 = vpop.f32.mrb[182].mxu0  ;;  %7284 = vrcp.f32 %v4803_v9  ;;  %v4809_v49 = vadd.f32 1.0, %v7263_v12  ;;  %v4327_v26 = vsub.f32 0.0, %v3915_v37  ;;  %v4527_v5 = vmul.f32 1.442695, %v4324_v51 }
 0x7b0   : > { %v7265_v35 = vpop.eup %7264  ;;  %v9210_v10 = vpop.f32.mrb[159].mxu1  ;;  %7286 = vrcp.f32 %v4807_v25  ;;  %v4331_v31 = vsub.f32 0.0, %v3766_v28  ;;  %v4531_v40 = vmul.f32 1.442695, %v4326_v45  ;;  %v4333_v12 = vsub.f32 0.0, %v3919_v56 }
 0x7b1   : > { %v9212_v48 = vpop.f32.mrb[183].mxu0  ;;  %v7267_v57 = vpop.eup %7266  ;;  %v4808_v60 = vadd.f32 1.0, %v7265_v35  ;;  %7288 = vrcp.f32 %v4809_v49  ;;  %v4529_v43 = vmul.f32 1.442695, %v4325_v30  ;;  %v4533_v49 = vmul.f32 1.442695, %v4327_v26 }
 0x7b2   : > { %v7269_v58 = vpop.eup %7268  ;;  %v4810_v39 = vadd.f32 1.0, %v7267_v57  ;;  %v4541_v53 = vmul.f32 1.442695, %v4331_v31 }
 0x7b3   : > { %v7271_v54 = vpop.eup %7270  ;;  %7290 = vrcp.f32 %v4808_v60  ;;  %v4814_v38 = vadd.f32 1.0, %v7269_v58  ;;  %v9225_v29 = vpop.f32.mrb[160].mxu1  ;;  %v4545_v58 = vmul.f32 1.442695, %v4333_v12 }
 0x7b4   : > { %v7273_v63 = vpop.eup %7272  ;;  %7292 = vrcp.f32 %v4810_v39  ;;  %v9227_v6 = vpop.f32.mrb[184].mxu0 }
 0x7b5   : > { %v7275_v34 = vpop.eup %7274  ;;  %7294 = vrcp.f32 %v4814_v38  ;;  %v9230_v55 = vpop.f32.mrb[161].mxu1 }
 0x7b6   : > { %v7277_v42 = vpop.eup %7276  ;;  %v6217_v50 = vpack.c.bf16 %v7275_v34, %v7271_v54  ;;  %7296 = vpow2.f32 %v4503_v33  ;;  %v9232_v4 = vpop.f32.mrb[185].mxu0 }
 0x7b7   : > { %v7279_v14 = vpop.eup %7278  ;;  %v6218_v15 = vpack.c.bf16 %v7277_v42, %v7273_v63  ;;  %7298 = vpow2.f32 %v4501_v13  ;;  %v9234_v17 = vpop.f32.mrb[162].mxu1  ;;  %v3768_v63 = vadd.f32 %v9200_v20, %v9178_v32  ;;  %v3770_v20 = vadd.f32 %v9205_v46, %v9174_v1 }
 0x7b8   : > { %v9236_v18 = vpop.f32.mrb[186].mxu0  ;;  %v7281_v61 = vpop.eup %7280  ;;  %5657 = vst [vmem:[%s9222_s17] sm:$0xff] %v6217_v50  ;;  %7300 = vpow2.f32 %v4505_v59  ;;  %v3772_v46 = vadd.f32 %v9210_v10, %v9178_v32 }
 0x7b9   : > { %v9239_v19 = vpop.f32.mrb[163].mxu1  ;;  %v7283_v52 = vpop.eup %7282  ;;  %5658 = vst [vmem:[%s9222_s17 + $0x8] sm:$0xff] %v6218_v15  ;;  %7302 = vpow2.f32 %v4513_v8 }
 0x7ba   : > { %v9242_v22 = vpop.f32.mrb[187].mxu0  ;;  %v7285_v9 = vpop.eup %7284  ;;  %v6221_v33 = vpack.c.bf16 %v7283_v52, %v7279_v14  ;;  %7304 = vpow2.f32 %v4517_v7  ;;  %v3921_v7 = vadd.f32 %v9202_v41, %v9180_v36  ;;  %v4332_v14 = vsub.f32 0.0, %v3768_v63 }
 0x7bb   : > { %v7287_v25 = vpop.eup %7286  ;;  %v6222_v13 = vpack.c.bf16 %v7285_v9, %v7281_v61  ;;  %7306 = vpow2.f32 %v4515_v16  ;;  %v9246_v57 = vpop.f32.mrb[164].mxu1  ;;  %v3923_v52 = vadd.f32 %v9207_v47, %v9176_v2  ;;  %v3925_v47 = vadd.f32 %v9212_v48, %v9180_v36 }
 0x7bc   : > { %v7289_v35 = vpop.eup %7288  ;;  %5662 = vst [vmem:[%s9222_s17 + $0x1c] sm:$0xff] %v6221_v33  ;;  %7308 = vpow2.f32 %v4519_v0  ;;  %v9248_v60 = vpop.f32.mrb[188].mxu0  ;;  %v4334_v30 = vsub.f32 0.0, %v3921_v7  ;;  %v4339_v63 = vsub.f32 0.0, %v3772_v46  ;;  %v3929_v7 = vadd.f32 %v9227_v6, %v9176_v2 }
 0x7bd   : > { %v7291_v24 = vpop.eup %7290  ;;  %5663 = vst [vmem:[%s9222_s17 + $0x24] sm:$0xff] %v6222_v13  ;;  %7310 = vpow2.f32 %v4527_v5  ;;  %v9250_v39 = vpop.f32.mrb[165].mxu1 }
 0x7be   : > { %v7293_v21 = vpop.eup %7292  ;;  %v6225_v27 = vpack.c.bf16 %v7291_v24, %v7287_v25  ;;  %7312 = vpow2.f32 %v4531_v40  ;;  %v9252_v59 = vpop.f32.mrb[189].mxu0  ;;  %v4338_v40 = vsub.f32 0.0, %v3770_v20 }
 0x7bf   : > { %v9254_v11 = vpop.eup %7294  ;;  %v6226_v54 = vpack.c.bf16 %v7293_v21, %v7289_v35  ;;  %7314 = vpow2.f32 %v4529_v43  ;;  %v9256_v38 = vpop.f32.mrb[166].mxu1  ;;  %v4543_v35 = vmul.f32 1.442695, %v4332_v14  ;;  %v4547_v21 = vmul.f32 1.442695, %v4334_v30 }
 0x7c0   : > { %v9258_v44 = vpop.f32.mrb[190].mxu0  ;;  %v7297_v62 = vpop.eup %7296  ;;  %5666 = vst [vmem:[%s9222_s17 + $0x38] sm:$0xff] %v6225_v27  ;;  %7316 = vpow2.f32 %v4533_v49  ;;  %v3776_v27 = vadd.f32 %v9225_v29, %v9174_v1  ;;  %v4555_v48 = vmul.f32 1.442695, %v4338_v40  ;;  %v4557_v30 = vmul.f32 1.442695, %v4339_v63 }
 0x7c1   : > { %v9263_v8 = vpop.f32.mrb[167].mxu1  ;;  %v9265_v3 = vpop.f32.mrb[191].mxu0  ;;  %5667 = vst [vmem:[%s9222_s17 + $0x40] sm:$0xff] %v6226_v54  ;;  %v4816_v34 = vadd.f32 1.0, %v7297_v62  ;;  %7318 = vpow2.f32 %v4541_v53  ;;  %v4340_v62 = vsub.f32 0.0, %v3923_v52 }
 0x7c2   : > { %v7299_v37 = vpop.eup %7298  ;;  %7320 = vpow2.f32 %v4545_v58 }
 0x7c3   : > { %v7301_v51 = vpop.eup %7300  ;;  %v4815_v28 = vadd.f32 1.0, %v7299_v37  ;;  %7322 = vrcp.f32 %v4816_v34  ;;  %v9272_v61 = vpop.f32.mrb[168].mxu1  ;;  %v4559_v6 = vmul.f32 1.442695, %v4340_v62 }
 0x7c4   : > { %v7303_v42 = vpop.eup %7302  ;;  %v4817_v50 = vadd.f32 1.0, %v7301_v51  ;;  %v9274_v41 = vpop.f32.mrb[192].mxu0 }
 0x7c5   : > { %v7305_v45 = vpop.eup %7304  ;;  %7324 = vrcp.f32 %v4815_v28  ;;  %v4821_v56 = vadd.f32 1.0, %v7303_v42  ;;  %v9280_v5 = vpop.f32.mrb[169].mxu1  ;;  %v4341_v42 = vsub.f32 0.0, %v3925_v47  ;;  %v3782_v47 = vadd.f32 %v9239_v19, %v9178_v32 }
 0x7c6   : > { %v7307_v15 = vpop.eup %7306  ;;  %7326 = vrcp.f32 %v4817_v50  ;;  %v4823_v16 = vadd.f32 1.0, %v7305_v45  ;;  %v9282_v31 = vpop.f32.mrb[193].mxu0  ;;  %v3778_v50 = vadd.f32 %v9230_v55, %v9178_v32  ;;  %v4345_v45 = vsub.f32 0.0, %v3776_v27 }
 0x7c7   : > { %v7309_v0 = vpop.eup %7308  ;;  %7328 = vrcp.f32 %v4821_v56  ;;  %v4822_v26 = vadd.f32 1.0, %v7307_v15  ;;  %v9284_v12 = vpop.f32.mrb[170].mxu1  ;;  %v3931_v56 = vadd.f32 %v9232_v4, %v9180_v36  ;;  %v4347_v4 = vsub.f32 0.0, %v3929_v7 }
 0x7c8   : > { %v7311_v9 = vpop.eup %7310  ;;  %7330 = vrcp.f32 %v4823_v16  ;;  %v4824_v33 = vadd.f32 1.0, %v7309_v0  ;;  %v9286_v25 = vpop.f32.mrb[194].mxu0  ;;  %v3780_v0 = vadd.f32 %v9234_v17, %v9174_v1  ;;  %v3949_v23 = vadd.f32 %v9274_v41, %v9176_v2 }
 0x7c9   : > { %v7313_v13 = vpop.eup %7312  ;;  %7332 = vrcp.f32 %v4822_v26  ;;  %v4828_v43 = vadd.f32 1.0, %v7311_v9  ;;  %v9290_v10 = vpop.f32.mrb[171].mxu1  ;;  %v3933_v9 = vadd.f32 %v9236_v18, %v9176_v2  ;;  %v4561_v18 = vmul.f32 1.442695, %v4341_v42 }
 0x7ca   : > { %v9292_v49 = vpop.f32.mrb[195].mxu0  ;;  %v7315_v24 = vpop.eup %7314  ;;  %7334 = vrcp.f32 %v4824_v33  ;;  %v4830_v53 = vadd.f32 1.0, %v7313_v13  ;;  %v4348_v27 = vsub.f32 0.0, %v3931_v56  ;;  %v4352_v62 = vsub.f32 0.0, %v3780_v0 }
 0x7cb   : > { %v7317_v58 = vpop.eup %7316  ;;  %7336 = vrcp.f32 %v4828_v43  ;;  %v4829_v54 = vadd.f32 1.0, %v7315_v24  ;;  %v9302_v14 = vpop.f32.mrb[172].mxu1  ;;  %v4346_v43 = vsub.f32 0.0, %v3778_v50  ;;  %v4573_v19 = vmul.f32 1.442695, %v4347_v4 }
 0x7cc   : > { %v7319_v37 = vpop.eup %7318  ;;  %7338 = vrcp.f32 %v4830_v53  ;;  %v4831_v34 = vadd.f32 1.0, %v7317_v58  ;;  %v9304_v15 = vpop.f32.mrb[196].mxu0  ;;  %v4575_v42 = vmul.f32 1.442695, %v4348_v27  ;;  %v3951_v41 = vadd.f32 %v9282_v31, %v9180_v36 }
 0x7cd   : > { %v7321_v51 = vpop.eup %7320  ;;  %7340 = vrcp.f32 %v4829_v54  ;;  %v4835_v28 = vadd.f32 1.0, %v7319_v37  ;;  %v9308_v26 = vpop.f32.mrb[173].mxu1  ;;  %v4569_v54 = vmul.f32 1.442695, %v4345_v45  ;;  %v4354_v37 = vsub.f32 0.0, %v3933_v9 }
 0x7ce   : > { %v7323_v29 = vpop.eup %7322  ;;  %7342 = vrcp.f32 %v4831_v34  ;;  %v4837_v20 = vadd.f32 1.0, %v7321_v51  ;;  %v9310_v55 = vpop.f32.mrb[197].mxu0  ;;  %v4571_v51 = vmul.f32 1.442695, %v4346_v43 }
 0x7cf   : > { %v7325_v16 = vpop.eup %7324  ;;  %7344 = vrcp.f32 %v4835_v28  ;;  %v9315_v33 = vpop.f32.mrb[174].mxu1  ;;  %v4353_v28 = vsub.f32 0.0, %v3782_v47 }
 0x7d0   : > { %v7327_v52 = vpop.eup %7326  ;;  %v6229_v46 = vpack.c.bf16 %v7325_v16, %v9254_v11  ;;  %7346 = vrcp.f32 %v4837_v20  ;;  %v9317_v40 = vpop.f32.mrb[198].mxu0  ;;  %v4583_v20 = vmul.f32 1.442695, %v4352_v62 }
 0x7d1   : > { %v7329_v13 = vpop.eup %7328  ;;  %v6230_v17 = vpack.c.bf16 %v7327_v52, %v7323_v29  ;;  %7348 = vpow2.f32 %v4543_v35  ;;  %v9321_v24 = vpop.f32.mrb[175].mxu1  ;;  %v4585_v9 = vmul.f32 1.442695, %v4353_v28 }
 0x7d2   : > { %v9323_v11 = vpop.f32.mrb[199].mxu0  ;;  %v7331_v53 = vpop.eup %7330  ;;  %5670 = vst [vmem:[%s9222_s17 + $0x54] sm:$0xff] %v6229_v46  ;;  %7350 = vpow2.f32 %v4547_v21 }
 0x7d3   : > { %v7333_v58 = vpop.eup %7332  ;;  %5671 = vst [vmem:[%s9222_s17 + $0x5c] sm:$0xff] %v6230_v17  ;;  %7352 = vpow2.f32 %v4555_v48  ;;  %v9328_v50 = vpop.f32.mrb[176].mxu1 }
 0x7d4   : > { %v7335_v35 = vpop.eup %7334  ;;  %v6233_v63 = vpack.c.bf16 %v7333_v58, %v7329_v13  ;;  %7354 = vpow2.f32 %v4559_v6  ;;  %v9330_v48 = vpop.f32.mrb[200].mxu0  ;;  %v3786_v58 = vadd.f32 %v9246_v57, %v9174_v1 }
 0x7d5   : > { %v7337_v34 = vpop.eup %7336  ;;  %v6234_v7 = vpack.c.bf16 %v7335_v35, %v7331_v53  ;;  %7356 = vpow2.f32 %v4557_v30  ;;  %v9333_v45 = vpop.f32.mrb[177].mxu1  ;;  %v4587_v30 = vmul.f32 1.442695, %v4354_v37  ;;  %v3935_v53 = vadd.f32 %v9242_v22, %v9180_v36 }
 0x7d6   : > { %v7339_v21 = vpop.eup %7338  ;;  %5674 = vst [vmem:[%s9222_s17 + $0x70] sm:$0xff] %v6233_v63  ;;  %7358 = vpow2.f32 %v4561_v18  ;;  %v9335_v56 = vpop.f32.mrb[201].mxu0  ;;  %v3939_v35 = vadd.f32 %v9248_v60, %v9176_v2  ;;  %v3788_v37 = vadd.f32 %v9250_v39, %v9178_v32  ;;  %v4359_v60 = vsub.f32 0.0, %v3786_v58 }
 0x7d7   : > { %v7341_v29 = vpop.eup %7340  ;;  %5675 = vst [vmem:[%s9222_s17 + $0x78] sm:$0xff] %v6234_v7  ;;  %7360 = vpow2.f32 %v4569_v54  ;;  %v9337_v0 = vpop.f32.mrb[178].mxu1 }
 0x7d8   : > { %v7343_v16 = vpop.eup %7342  ;;  %v6237_v6 = vpack.c.bf16 %v7341_v29, %v7337_v34  ;;  %7362 = vpow2.f32 %v4573_v19  ;;  %v9339_v52 = vpop.f32.mrb[202].mxu0 }
 0x7d9   : > { %v9341_v46 = vpop.eup %7344  ;;  %v6238_v4 = vpack.c.bf16 %v7343_v16, %v7339_v21  ;;  %7364 = vpow2.f32 %v4571_v51  ;;  %v9343_v13 = vpop.f32.mrb[179].mxu1  ;;  %v4355_v51 = vsub.f32 0.0, %v3935_v53  ;;  %v4360_v53 = vsub.f32 0.0, %v3788_v37 }
 0x7da   : > { %v9345_v17 = vpop.f32.mrb[203].mxu0  ;;  %v9347_v43 = vpop.eup %7346  ;;  %5678 = vst [vmem:[%s9222_s17 + $0x8c] sm:$0xff] %v6237_v6  ;;  %7366 = vpow2.f32 %v4575_v42  ;;  %v4361_v6 = vsub.f32 0.0, %v3939_v35 }
 0x7db   : > { %v7349_v47 = vpop.eup %7348  ;;  %5679 = vst [vmem:[%s9222_s17 + $0x94] sm:$0xff] %v6238_v4  ;;  %7368 = vpow2.f32 %v4583_v20  ;;  %v9359_v34 = vpop.f32.mrb[180].mxu1 }
 0x7dc   : > { %v7351_v18 = vpop.eup %7350  ;;  %v4836_v27 = vadd.f32 1.0, %v7349_v47  ;;  %7370 = vpow2.f32 %v4587_v30  ;;  %v9361_v28 = vpop.f32.mrb[204].mxu0  ;;  %v4601_v37 = vmul.f32 1.442695, %v4361_v6  ;;  %v3945_v6 = vadd.f32 %v9265_v3, %v9180_v36 }
 0x7dd   : > { %v7353_v54 = vpop.eup %7352  ;;  %v4838_v62 = vadd.f32 1.0, %v7351_v18  ;;  %7372 = vpow2.f32 %v4585_v9  ;;  %v9363_v57 = vpop.f32.mrb[181].mxu1 }
 0x7de   : > { %v7355_v63 = vpop.eup %7354  ;;  %7374 = vrcp.f32 %v4836_v27  ;;  %v4842_v19 = vadd.f32 1.0, %v7353_v54  ;;  %v9365_v29 = vpop.f32.mrb[205].mxu0  ;;  %v4589_v54 = vmul.f32 1.442695, %v4355_v51 }
 0x7df   : > { %v7357_v22 = vpop.eup %7356  ;;  %7376 = vrcp.f32 %v4838_v62  ;;  %v4844_v7 = vadd.f32 1.0, %v7355_v63  ;;  %v9367_v20 = vpop.f32.mrb[182].mxu1  ;;  %v3941_v62 = vadd.f32 %v9252_v59, %v9180_v36  ;;  %v3792_v59 = vadd.f32 %v9263_v8, %v9178_v32 }
 0x7e0   : > { %v7359_v21 = vpop.eup %7358  ;;  %7378 = vrcp.f32 %v4842_v19  ;;  %v4843_v42 = vadd.f32 1.0, %v7357_v22  ;;  %v9369_v30 = vpop.f32.mrb[206].mxu0  ;;  %v4597_v19 = vmul.f32 1.442695, %v4359_v60  ;;  %v3790_v22 = vadd.f32 %v9256_v38, %v9174_v1 }
 0x7e1   : > { %v7361_v16 = vpop.eup %7360  ;;  %7380 = vrcp.f32 %v4844_v7  ;;  %v4845_v39 = vadd.f32 1.0, %v7359_v21  ;;  %v9371_v4 = vpop.f32.mrb[183].mxu1  ;;  %v3796_v8 = vadd.f32 %v9272_v61, %v9174_v1 }
 0x7e2   : > { %v7363_v9 = vpop.eup %7362  ;;  %7382 = vrcp.f32 %v4843_v42  ;;  %v4849_v47 = vadd.f32 1.0, %v7361_v16  ;;  %v9373_v18 = vpop.f32.mrb[207].mxu0  ;;  %v3943_v42 = vadd.f32 %v9258_v44, %v9176_v2 }
 0x7e3   : > { %v7365_v27 = vpop.eup %7364  ;;  %7384 = vrcp.f32 %v4845_v39  ;;  %v4851_v58 = vadd.f32 1.0, %v7363_v9  ;;  %v4599_v39 = vmul.f32 1.442695, %v4360_v53  ;;  %v9383_v9 = vpop.f32.mrb[184].mxu1 }
 0x7e4   : > { %v7367_v63 = vpop.eup %7366  ;;  %7386 = vrcp.f32 %v4849_v47  ;;  %v4850_v35 = vadd.f32 1.0, %v7365_v27  ;;  %v9385_v60 = vpop.f32.mrb[208].mxu0  ;;  %v4362_v27 = vsub.f32 0.0, %v3941_v62  ;;  %v4368_v3 = vsub.f32 0.0, %v3943_v42 }
 0x7e5   : > { %v7369_v7 = vpop.eup %7368  ;;  %7388 = vrcp.f32 %v4851_v58  ;;  %v4852_v21 = vadd.f32 1.0, %v7367_v63  ;;  %v9389_v58 = vpop.f32.mrb[185].mxu1  ;;  %v4369_v42 = vsub.f32 0.0, %v3945_v6 }
 0x7e6   : > { %v7371_v16 = vpop.eup %7370  ;;  %7390 = vrcp.f32 %v4850_v35  ;;  %v4856_v51 = vadd.f32 1.0, %v7369_v7  ;;  %v9391_v44 = vpop.f32.mrb[209].mxu0  ;;  %v4366_v35 = vsub.f32 0.0, %v3790_v22 }
 0x7e7   : > { %v7373_v47 = vpop.eup %7372  ;;  %7392 = vrcp.f32 %v4852_v21  ;;  %v4858_v38 = vadd.f32 1.0, %v7371_v16  ;;  %10080 = vst [vmem:[#allocation13_spill] sm:$0xff] %v9391_v44  ;;  %v9395_v7 = vpop.f32.mrb[186].mxu1 }
 0x7e8   : > { %v7375_v63 = vpop.eup %7374  ;;  %7394 = vrcp.f32 %v4856_v51  ;;  %v4857_v53 = vadd.f32 1.0, %v7373_v47  ;;  %10081 = vst [vmem:[#allocation14_spill] sm:$0xff] %v9395_v7  ;;  %v9397_v21 = vpop.f32.mrb[210].mxu0  ;;  %v4367_v7 = vsub.f32 0.0, %v3792_v59  ;;  %v4615_v59 = vmul.f32 1.442695, %v4368_v3 }
 0x7e9   : > { %10082 = vst [vmem:[#allocation15_spill] sm:$0xff] %v9397_v21  ;;  %v7377_v62 = vpop.eup %7376  ;;  %v6241_v16 = vpack.c.bf16 %v7375_v63, %v9341_v46  ;;  %7396 = vrcp.f32 %v4858_v38  ;;  %v9402_v51 = vpop.f32.mrb[187].mxu1  ;;  %v3798_v21 = vadd.f32 %v9280_v5, %v9178_v32  ;;  %v4603_v46 = vmul.f32 1.442695, %v4362_v27 }
 0x7ea   : > { %v9404_v22 = vpop.f32.mrb[211].mxu0  ;;  %v7379_v47 = vpop.eup %7378  ;;  %v6242_v61 = vpack.c.bf16 %v7377_v62, %v9347_v43  ;;  %7398 = vrcp.f32 %v4857_v53  ;;  %v4611_v63 = vmul.f32 1.442695, %v4366_v35  ;;  %v4375_v62 = vsub.f32 0.0, %v3949_v23 }
 0x7eb   : > { %10083 = vst [vmem:[#allocation16_spill] sm:$0xff] %v9404_v22  ;;  %v7381_v44 = vpop.eup %7380  ;;  %5682 = vst [vmem:[%s9222_s17 + $0xa8] sm:$0xff] %v6241_v16  ;;  %7400 = vpow2.f32 %v4589_v54  ;;  %v4373_v22 = vsub.f32 0.0, %v3796_v8  ;;  %v4613_v54 = vmul.f32 1.442695, %v4367_v7  ;;  %v4374_v27 = vsub.f32 0.0, %v3798_v21 }
 0x7ec   : > { %v7383_v38 = vpop.eup %7382  ;;  %5683 = vst [vmem:[%s9222_s17 + $0xb0] sm:$0xff] %v6242_v61  ;;  %7402 = vpow2.f32 %v4597_v19  ;;  %v9413_v6 = vpop.f32.mrb[188].mxu1  ;;  %v4617_v19 = vmul.f32 1.442695, %v4369_v42  ;;  %v4376_v35 = vsub.f32 0.0, %v3951_v41 }
 0x7ed   : > { %v7385_v43 = vpop.eup %7384  ;;  %v6245_v53 = vpack.c.bf16 %v7383_v38, %v7379_v47  ;;  %7404 = vpow2.f32 %v4601_v37  ;;  %v9415_v31 = vpop.f32.mrb[212].mxu0  ;;  %v4629_v47 = vmul.f32 1.442695, %v4375_v62  ;;  %v3800_v62 = vadd.f32 %v9284_v12, %v9174_v1 }
 0x7ee   : > { %v7387_v5 = vpop.eup %7386  ;;  %v6246_v16 = vpack.c.bf16 %v7385_v43, %v7381_v44  ;;  %7406 = vpow2.f32 %v4599_v39  ;;  %v9418_v8 = vpop.f32.mrb[189].mxu1  ;;  %v4625_v39 = vmul.f32 1.442695, %v4373_v22  ;;  %v4627_v43 = vmul.f32 1.442695, %v4374_v27 }
 0x7ef   : > { %v7389_v61 = vpop.eup %7388  ;;  %5686 = vst [vmem:[%s9222_s17 + $0xc4] sm:$0xff] %v6245_v53  ;;  %7408 = vpow2.f32 %v4603_v46  ;;  %v9420_v37 = vpop.f32.mrb[213].mxu0  ;;  %v4631_v22 = vmul.f32 1.442695, %v4376_v35 }
 0x7f0   : > { %v7391_v23 = vpop.eup %7390  ;;  %5687 = vst [vmem:[%s9222_s17 + $0xcc] sm:$0xff] %v6246_v16  ;;  %7410 = vpow2.f32 %v4611_v63  ;;  %v9423_v44 = vpop.f32.mrb[190].mxu1 }
 0x7f1   : > { %v9425_v7 = vpop.f32.mrb[214].mxu0  ;;  %v7393_v21 = vpop.eup %7392  ;;  %v6249_v3 = vpack.c.bf16 %v7391_v23, %v7387_v5  ;;  %7412 = vpow2.f32 %v4615_v59 }
 0x7f2   : > { %v9427_v46 = vpop.f32.mrb[191].mxu1  ;;  %v9429_v42 = vpop.f32.mrb[215].mxu0  ;;  %v6250_v38 = vpack.c.bf16 %v7393_v21, %v7389_v61  ;;  %7414 = vpow2.f32 %v4613_v54  ;;  %v3953_v54 = vadd.f32 %v9286_v25, %v9176_v2 }
 0x7f3   : > { %v7395_v41 = vpop.eup %7394  ;;  %5690 = vst [vmem:[%s9222_s17 + $0xe0] sm:$0xff] %v6249_v3  ;;  %7416 = vpow2.f32 %v4617_v19  ;;  %v9439_v27 = vpop.f32.mrb[192].mxu1 }
 0x7f4   : > { %v9431_v53 = vpop.eup %7396  ;;  %5691 = vst [vmem:[%s9222_s17 + $0xe8] sm:$0xff] %v6250_v38  ;;  %7418 = vpow2.f32 %v4625_v39  ;;  %v9441_v61 = vpop.f32.mrb[216].mxu0  ;;  %v4380_v38 = vsub.f32 0.0, %v3800_v62 }
 0x7f5   : > { %v7399_v63 = vpop.eup %7398  ;;  %7420 = vpow2.f32 %v4629_v47  ;;  %v9444_v39 = vpop.f32.mrb[193].mxu1 }
 0x7f6   : > { %v7401_v5 = vpop.eup %7400  ;;  %v6253_v59 = vpack.c.bf16 %v7399_v63, %v7395_v41  ;;  %7422 = vpow2.f32 %v4627_v43  ;;  %v9446_v12 = vpop.f32.mrb[217].mxu0  ;;  %v3802_v43 = vadd.f32 %v9290_v10, %v9178_v32  ;;  %v3806_v10 = vadd.f32 %v9302_v14, %v9174_v1 }
 0x7f7   : > { %v7403_v16 = vpop.eup %7402  ;;  %v4859_v23 = vadd.f32 1.0, %v7401_v5  ;;  %7424 = vpow2.f32 %v4631_v22  ;;  %10084 = vst [vmem:[#allocation17_spill] sm:$0xff] %v9446_v12  ;;  %v9448_v47 = vpop.f32.mrb[194].mxu1 }
 0x7f8   : > { %v7405_v19 = vpop.eup %7404  ;;  %5694 = vst [vmem:[%s9222_s17 + $0xfc] sm:$0xff] %v6253_v59  ;;  %v4863_v35 = vadd.f32 1.0, %v7403_v16  ;;  %10085 = vst [vmem:[#allocation18_spill] sm:$0xff] %v9448_v47  ;;  %v9452_v63 = vpop.f32.mrb[218].mxu0  ;;  %v4382_v16 = vsub.f32 0.0, %v3953_v54 }
 0x7f9   : > { %v7407_v21 = vpop.eup %7406  ;;  %7426 = vrcp.f32 %v4859_v23  ;;  %v4865_v3 = vadd.f32 1.0, %v7405_v19  ;;  %10086 = vst [vmem:[#allocation19_spill] sm:$0xff] %v9452_v63  ;;  %v9454_v5 = vpop.f32.mrb[195].mxu1 }
 0x7fa   : > { %v7409_v41 = vpop.eup %7408  ;;  %7428 = vrcp.f32 %v4863_v35  ;;  %v4864_v25 = vadd.f32 1.0, %v7407_v21  ;;  %10087 = vst [vmem:[#allocation20_spill] sm:$0xff] %v9454_v5  ;;  %v9456_v23 = vpop.f32.mrb[219].mxu0  ;;  %v3955_v35 = vadd.f32 %v9292_v49, %v9180_v36  ;;  %v4643_v12 = vmul.f32 1.442695, %v4382_v16 }
 0x7fb   : > { %v7411_v22 = vpop.eup %7410  ;;  %7430 = vrcp.f32 %v4865_v3  ;;  %v4866_v59 = vadd.f32 1.0, %v7409_v41  ;;  %10088 = vst [vmem:[#allocation21_spill] sm:$0xff] %v9456_v23  ;;  %v4639_v3 = vmul.f32 1.442695, %v4380_v38  ;;  %v4381_v41 = vsub.f32 0.0, %v3802_v43  ;;  %v9466_v49 = vpop.f32.mrb[220].mxu0 }
 0x7fc   : > { %v7413_v19 = vpop.eup %7412  ;;  %7432 = vrcp.f32 %v4864_v25  ;;  %v4870_v47 = vadd.f32 1.0, %v7411_v22  ;;  %v3959_v25 = vadd.f32 %v9304_v15, %v9176_v2  ;;  %v9464_v22 = vpop.f32.mrb[196].mxu1  ;;  %10089 = vst [vmem:[#allocation22_spill] sm:$0xff] %v9466_v49  ;;  %v4383_v14 = vsub.f32 0.0, %v3955_v35 }
 0x7fd   : > { %v7415_v62 = vpop.eup %7414  ;;  %7434 = vrcp.f32 %v4866_v59  ;;  %v4872_v21 = vadd.f32 1.0, %v7413_v19  ;;  %v9470_v38 = vpop.f32.mrb[197].mxu1  ;;  %v3961_v15 = vadd.f32 %v9310_v55, %v9180_v36 }
 0x7fe   : > { %v7417_v63 = vpop.eup %7416  ;;  %7436 = vrcp.f32 %v4870_v47  ;;  %v4871_v5 = vadd.f32 1.0, %v7415_v62  ;;  %v3808_v47 = vadd.f32 %v9308_v26, %v9178_v32  ;;  %10090 = vst [vmem:[#allocation23_spill] sm:$0xff] %v9470_v38  ;;  %v9472_v43 = vpop.f32.mrb[221].mxu0  ;;  %v4387_v62 = vsub.f32 0.0, %v3806_v10 }
 0x7ff   : > { %v7419_v54 = vpop.eup %7418  ;;  %7438 = vrcp.f32 %v4872_v21  ;;  %v4873_v23 = vadd.f32 1.0, %v7417_v63  ;;  %10091 = vst [vmem:[#allocation24_spill] sm:$0xff] %v9472_v43  ;;  %v9476_v21 = vpop.f32.mrb[198].mxu1  ;;  %v3810_v26 = vadd.f32 %v9315_v33, %v9174_v1  ;;  %v4389_v55 = vsub.f32 0.0, %v3959_v25 }
 0x800   : > { %v7421_v59 = vpop.eup %7420  ;;  %7440 = vrcp.f32 %v4871_v5  ;;  %v4877_v19 = vadd.f32 1.0, %v7419_v54  ;;  %v9478_v49 = vpop.f32.mrb[222].mxu0  ;;  %v4641_v54 = vmul.f32 1.442695, %v4381_v41  ;;  %v4388_v41 = vsub.f32 0.0, %v3808_v47 }
 0x801   : > { %v7423_v63 = vpop.eup %7422  ;;  %7442 = vrcp.f32 %v4873_v23  ;;  %v4879_v16 = vadd.f32 1.0, %v7421_v59  ;;  %10092 = vst [vmem:[#allocation25_spill] sm:$0xff] %v9478_v49  ;;  %v9482_v38 = vpop.f32.mrb[199].mxu1  ;;  %v3963_v59 = vadd.f32 %v9317_v40, %v9176_v2  ;;  %v3812_v33 = vadd.f32 %v9321_v24, %v9178_v32 }
 0x802   : > { %v7425_v5 = vpop.eup %7424  ;;  %7444 = vrcp.f32 %v4877_v19  ;;  %v4878_v35 = vadd.f32 1.0, %v7423_v63  ;;  %10093 = vst [vmem:[#allocation26_spill] sm:$0xff] %v9482_v38  ;;  %v9484_v43 = vpop.f32.mrb[223].mxu0  ;;  %v4645_v38 = vmul.f32 1.442695, %v4383_v14  ;;  %v4394_v40 = vsub.f32 0.0, %v3810_v26 }
 0x803   : > { %10094 = vst [vmem:[#allocation27_spill] sm:$0xff] %v9484_v43  ;;  %v7427_v23 = vpop.eup %7426  ;;  %7446 = vrcp.f32 %v4879_v16  ;;  %v4880_v10 = vadd.f32 1.0, %v7425_v5  ;;  %v4390_v43 = vsub.f32 0.0, %v3961_v15  ;;  %v3965_v16 = vadd.f32 %v9323_v11, %v9180_v36  ;;  %v9498_v14 = vpop.f32.mrb[224].mxu0 }
 0x804   : > { %v7429_v49 = vpop.eup %7428  ;;  %v6254_v19 = vpack.c.bf16 %v7427_v23, %v9431_v53  ;;  %7448 = vrcp.f32 %v4878_v35  ;;  %v4653_v25 = vmul.f32 1.442695, %v4387_v62  ;;  %v3816_v53 = vadd.f32 %v9328_v50, %v9174_v1 }
 0x805   : > { %v7431_v63 = vpop.eup %7430  ;;  %7450 = vrcp.f32 %v4880_v10  ;;  %v4657_v24 = vmul.f32 1.442695, %v4389_v55  ;;  %v4396_v23 = vsub.f32 0.0, %v3963_v59  ;;  %v9496_v10 = vpop.f32.mrb[200].mxu1  ;;  %v4395_v62 = vsub.f32 0.0, %v3812_v33 }
 0x806   : > { %v7433_v5 = vpop.eup %7432  ;;  %5695 = vst [vmem:[%s9222_s17 + $0x104] sm:$0xff] %v6254_v19  ;;  %7452 = vpow2.f32 %v4639_v3  ;;  %v4655_v3 = vmul.f32 1.442695, %v4388_v41  ;;  %v9500_v26 = vpop.f32.mrb[201].mxu1 }
 0x807   : > { %v7435_v47 = vpop.eup %7434  ;;  %v6257_v35 = vpack.c.bf16 %v7433_v5, %v7429_v49  ;;  %7454 = vpow2.f32 %v4643_v12  ;;  %v9502_v19 = vpop.f32.mrb[225].mxu0  ;;  %v4659_v12 = vmul.f32 1.442695, %v4390_v43  ;;  %v4397_v49 = vsub.f32 0.0, %v3965_v16 }
 0x808   : > { %v7437_v11 = vpop.eup %7436  ;;  %v6258_v15 = vpack.c.bf16 %v7435_v47, %v7431_v63  ;;  %7456 = vpow2.f32 %v4641_v54  ;;  %v9505_v55 = vpop.f32.mrb[202].mxu1  ;;  %v4667_v5 = vmul.f32 1.442695, %v4394_v40  ;;  %v4401_v63 = vsub.f32 0.0, %v3816_v53 }
 0x809   : > { %v7439_v50 = vpop.eup %7438  ;;  %5698 = vst [vmem:[%s9222_s17 + $0x118] sm:$0xff] %v6257_v35  ;;  %7458 = vpow2.f32 %v4645_v38  ;;  %10095 = vst [vmem:[#allocation28_spill] sm:$0xff] %v9505_v55  ;;  %v9508_v54 = vpop.f32.mrb[226].mxu0  ;;  %v4671_v35 = vmul.f32 1.442695, %v4396_v23 }
 0x80a   : > { %v7441_v59 = vpop.eup %7440  ;;  %5699 = vst [vmem:[%s9222_s17 + $0x120] sm:$0xff] %v6258_v15  ;;  %7460 = vpow2.f32 %v4653_v25  ;;  %10096 = vst [vmem:[#allocation29_spill] sm:$0xff] %v9508_v54  ;;  %v9510_v41 = vpop.f32.mrb[203].mxu1  ;;  %v4669_v55 = vmul.f32 1.442695, %v4395_v62  ;;  %v3969_v62 = vadd.f32 %v9330_v48, %v9176_v2 }
 0x80b   : > { %10097 = vst [vmem:[#allocation30_spill] sm:$0xff] %v9510_v41  ;;  %v7443_v33 = vpop.eup %7442  ;;  %v6261_v47 = vpack.c.bf16 %v7441_v59, %v7437_v11  ;;  %7462 = vpow2.f32 %v4657_v24  ;;  %v9512_v38 = vpop.f32.mrb[227].mxu0  ;;  %v4673_v25 = vmul.f32 1.442695, %v4397_v49  ;;  %v4681_v53 = vmul.f32 1.442695, %v4401_v63 }
 0x80c   : > { %v7445_v43 = vpop.eup %7444  ;;  %v6262_v16 = vpack.c.bf16 %v7443_v33, %v7439_v50  ;;  %7464 = vpow2.f32 %v4655_v3  ;;  %v9516_v24 = vpop.f32.mrb[204].mxu1 }
 0x80d   : > { %v7447_v15 = vpop.eup %7446  ;;  %5702 = vst [vmem:[%s9222_s17 + $0x134] sm:$0xff] %v6261_v47  ;;  %7466 = vpow2.f32 %v4659_v12  ;;  %v9518_v23 = vpop.f32.mrb[228].mxu0 }
 0x80e   : > { %v7449_v40 = vpop.eup %7448  ;;  %5703 = vst [vmem:[%s9222_s17 + $0x13c] sm:$0xff] %v6262_v16  ;;  %7468 = vpow2.f32 %v4667_v5  ;;  %v9522_v50 = vpop.f32.mrb[205].mxu1 }
 0x80f   : > { %v7451_v41 = vpop.eup %7450  ;;  %v6265_v54 = vpack.c.bf16 %v7449_v40, %v7445_v43  ;;  %7470 = vpow2.f32 %v4671_v35  ;;  %v9524_v12 = vpop.f32.mrb[229].mxu0 }
 0x810   : > { %v7453_v11 = vpop.eup %7452  ;;  %v6266_v3 = vpack.c.bf16 %v7451_v41, %v7447_v15  ;;  %7472 = vpow2.f32 %v4669_v55  ;;  %v9527_v5 = vpop.f32.mrb[206].mxu1  ;;  %v3818_v55 = vadd.f32 %v9333_v45, %v9178_v32  ;;  %v4403_v15 = vsub.f32 0.0, %v3969_v62 }
 0x811   : > { %v7455_v49 = vpop.eup %7454  ;;  %5706 = vst [vmem:[%s9222_s17 + $0x150] sm:$0xff] %v6265_v54  ;;  %v4884_v59 = vadd.f32 1.0, %v7453_v11  ;;  %7474 = vpow2.f32 %v4673_v25  ;;  %v9529_v63 = vpop.f32.mrb[230].mxu0  ;;  %v3971_v25 = vadd.f32 %v9335_v56, %v9180_v36  ;;  %v3820_v45 = vadd.f32 %v9337_v0, %v9174_v1 }
 0x812   : > { %10098 = vst [vmem:[#allocation31_spill] sm:$0xff] %v9529_v63  ;;  %v7457_v33 = vpop.eup %7456  ;;  %5707 = vst [vmem:[%s9222_s17 + $0x158] sm:$0xff] %v6266_v3  ;;  %v4886_v47 = vadd.f32 1.0, %v7455_v49  ;;  %7476 = vpow2.f32 %v4681_v53  ;;  %v9534_v48 = vpop.f32.mrb[207].mxu1  ;;  %v4402_v49 = vsub.f32 0.0, %v3818_v55 }
 0x813   : > { %10099 = vst [vmem:[#allocation32_spill] sm:$0xff] %v9534_v48  ;;  %v9536_v41 = vpop.f32.mrb[231].mxu0  ;;  %v7459_v35 = vpop.eup %7458  ;;  %7478 = vrcp.f32 %v4884_v59  ;;  %v4885_v54 = vadd.f32 1.0, %v7457_v33  ;;  %v3973_v33 = vadd.f32 %v9339_v52, %v9176_v2 }
 0x814   : > { %10100 = vst [vmem:[#allocation33_spill] sm:$0xff] %v9536_v41  ;;  %v7461_v43 = vpop.eup %7460  ;;  %7480 = vrcp.f32 %v4886_v47  ;;  %v4887_v16 = vadd.f32 1.0, %v7459_v35  ;;  %v9544_v62 = vpop.f32.mrb[208].mxu1 }
 0x815   : > { %v7463_v40 = vpop.eup %7462  ;;  %7482 = vrcp.f32 %v4885_v54  ;;  %v4891_v53 = vadd.f32 1.0, %v7461_v43  ;;  %10101 = vst [vmem:[#allocation34_spill] sm:$0xff] %v9544_v62  ;;  %v9546_v47 = vpop.f32.mrb[232].mxu0  ;;  %v4685_v54 = vmul.f32 1.442695, %v4403_v15  ;;  %v4404_v43 = vsub.f32 0.0, %v3971_v25 }
 0x816   : > { %v7465_v11 = vpop.eup %7464  ;;  %7484 = vrcp.f32 %v4887_v16  ;;  %v4893_v3 = vadd.f32 1.0, %v7463_v40  ;;  %10102 = vst [vmem:[#allocation35_spill] sm:$0xff] %v9546_v47  ;;  %v9548_v0 = vpop.f32.mrb[209].mxu1  ;;  %v4408_v40 = vsub.f32 0.0, %v3820_v45  ;;  %v4683_v62 = vmul.f32 1.442695, %v4402_v49 }
 0x817   : > { %v7467_v41 = vpop.eup %7466  ;;  %7486 = vrcp.f32 %v4891_v53  ;;  %v4892_v59 = vadd.f32 1.0, %v7465_v11  ;;  %10103 = vst [vmem:[#allocation36_spill] sm:$0xff] %v9548_v0  ;;  %v3822_v53 = vadd.f32 %v9343_v13, %v9178_v32  ;;  %v3975_v47 = vadd.f32 %v9345_v17, %v9180_v36 }
 0x818   : > { %v7469_v56 = vpop.eup %7468  ;;  %7488 = vrcp.f32 %v4893_v3  ;;  %v4894_v35 = vadd.f32 1.0, %v7467_v41  ;;  %v4410_v15 = vsub.f32 0.0, %v3973_v33  ;;  %v3826_v25 = vadd.f32 %v9359_v34, %v9174_v1  ;;  %v9562_v33 = vpop.f32.mrb[210].mxu1 }
 0x819   : > { %v7471_v16 = vpop.eup %7470  ;;  %7490 = vrcp.f32 %v4892_v59  ;;  %v4898_v55 = vadd.f32 1.0, %v7469_v56  ;;  %v9556_v59 = vpop.f32.mrb[233].mxu0  ;;  %v4687_v13 = vmul.f32 1.442695, %v4404_v43  ;;  %v4409_v17 = vsub.f32 0.0, %v3822_v53  ;;  %10104 = vst [vmem:[#allocation37_spill] sm:$0xff] %v9562_v33 }
 0x81a   : > { %v7473_v11 = vpop.eup %7472  ;;  %7492 = vrcp.f32 %v4894_v35  ;;  %v4900_v52 = vadd.f32 1.0, %v7471_v16  ;;  %v3979_v35 = vadd.f32 %v9361_v28, %v9176_v2  ;;  %v4695_v0 = vmul.f32 1.442695, %v4408_v40 }
 0x81b   : > { %v7475_v3 = vpop.eup %7474  ;;  %7494 = vrcp.f32 %v4898_v55  ;;  %v4899_v41 = vadd.f32 1.0, %v7473_v11  ;;  %v3828_v55 = vadd.f32 %v9363_v57, %v9178_v32  ;;  %v9564_v11 = vpop.f32.mrb[234].mxu0  ;;  %v3981_v43 = vadd.f32 %v9365_v29, %v9180_v36 }
 0x81c   : > { %v7477_v45 = vpop.eup %7476  ;;  %7496 = vrcp.f32 %v4900_v52  ;;  %v4901_v56 = vadd.f32 1.0, %v7475_v3  ;;  %v4411_v52 = vsub.f32 0.0, %v3975_v47  ;;  %v4699_v28 = vmul.f32 1.442695, %v4410_v15  ;;  %v9570_v57 = vpop.f32.mrb[211].mxu1 }
 0x81d   : > { %v7479_v49 = vpop.eup %7478  ;;  %7498 = vrcp.f32 %v4899_v41  ;;  %v4905_v16 = vadd.f32 1.0, %v7477_v45  ;;  %v4415_v41 = vsub.f32 0.0, %v3826_v25  ;;  %v3830_v53 = vadd.f32 %v9367_v20, %v9174_v1  ;;  %10105 = vst [vmem:[#allocation38_spill] sm:$0xff] %v9570_v57  ;;  %v9572_v45 = vpop.f32.mrb[235].mxu0 }
 0x81e   : > { %v7481_v34 = vpop.eup %7480  ;;  %7500 = vrcp.f32 %v4901_v56  ;;  %v4417_v47 = vsub.f32 0.0, %v3979_v35  ;;  %v3983_v29 = vadd.f32 %v9369_v30, %v9176_v2  ;;  %v4697_v15 = vmul.f32 1.442695, %v4409_v17 }
 0x81f   : > { %v7483_v3 = vpop.eup %7482  ;;  %7502 = vrcp.f32 %v4905_v16  ;;  %v4416_v25 = vsub.f32 0.0, %v3828_v55  ;;  %v4701_v20 = vmul.f32 1.442695, %v4411_v52  ;;  %v4418_v57 = vsub.f32 0.0, %v3981_v43 }
 0x820   : > { %v7485_v33 = vpop.eup %7484  ;;  %v6269_v56 = vpack.c.bf16 %v7483_v3, %v7479_v49  ;;  %7504 = vpow2.f32 %v4685_v54  ;;  %v4709_v49 = vmul.f32 1.442695, %v4415_v41  ;;  %v4422_v54 = vsub.f32 0.0, %v3830_v53 }
 0x821   : > { %v7487_v40 = vpop.eup %7486  ;;  %v6270_v16 = vpack.c.bf16 %v7485_v33, %v7481_v34  ;;  %7506 = vpow2.f32 %v4683_v62  ;;  %v4713_v30 = vmul.f32 1.442695, %v4417_v47  ;;  %v4424_v33 = vsub.f32 0.0, %v3983_v29  ;;  %v9578_v34 = vpop.f32.mrb[212].mxu1 }
 0x822   : > { %v7489_v48 = vpop.eup %7488  ;;  %5710 = vst [vmem:[%s9222_s17 + $0x16c] sm:$0xff] %v6269_v56  ;;  %7508 = vpow2.f32 %v4687_v13  ;;  %v4711_v55 = vmul.f32 1.442695, %v4416_v25  ;;  %v9580_v13 = vpop.f32.mrb[236].mxu0 }
 0x823   : > { %v7491_v63 = vpop.eup %7490  ;;  %5711 = vst [vmem:[%s9222_s17 + $0x174] sm:$0xff] %v6270_v16  ;;  %7510 = vpow2.f32 %v4695_v0  ;;  %v4715_v0 = vmul.f32 1.442695, %v4418_v57  ;;  %v9583_v43 = vpop.f32.mrb[213].mxu1  ;;  %v4727_v29 = vmul.f32 1.442695, %v4424_v33 }
 0x824   : > { %v7493_v35 = vpop.eup %7492  ;;  %v6273_v3 = vpack.c.bf16 %v7491_v63, %v7487_v40  ;;  %7512 = vpow2.f32 %v4699_v28  ;;  %v9585_v41 = vpop.f32.mrb[237].mxu0  ;;  %v4723_v28 = vmul.f32 1.442695, %v4422_v54 }
 0x825   : > { %v7495_v62 = vpop.eup %7494  ;;  %v6274_v17 = vpack.c.bf16 %v7493_v35, %v7489_v48  ;;  %7514 = vpow2.f32 %v4697_v15  ;;  %v9588_v48 = vpop.f32.mrb[214].mxu1  ;;  %v3985_v35 = vadd.f32 %v9373_v18, %v9180_v36  ;;  %v3989_v18 = vadd.f32 %v9385_v60, %v9176_v2 }
 0x826   : > { %v7497_v52 = vpop.eup %7496  ;;  %5714 = vst [vmem:[%s9222_s17 + $0x188] sm:$0xff] %v6273_v3  ;;  %7516 = vpow2.f32 %v4701_v20  ;;  %v9590_v53 = vpop.f32.mrb[238].mxu0  ;;  %v3832_v20 = vadd.f32 %v9371_v4, %v9178_v32 }
 0x827   : > { %v7499_v63 = vpop.eup %7498  ;;  %5715 = vst [vmem:[%s9222_s17 + $0x190] sm:$0xff] %v6274_v17  ;;  %7518 = vpow2.f32 %v4709_v49  ;;  %v9592_v40 = vpop.f32.mrb[215].mxu1  ;;  %v3836_v17 = vadd.f32 %v9383_v9, %v9174_v1  ;;  %v3838_v9 = vadd.f32 %v9389_v58, %v9178_v32  ;;  %v10109_v58 = vld [vmem:[#allocation15_spill] sm:$0xff] }
 0x828   : > { %v7501_v56 = vpop.eup %7500  ;;  %v6277_v47 = vpack.c.bf16 %v7499_v63, %v7495_v62  ;;  %7520 = vpow2.f32 %v4713_v30  ;;  %10106 = vst [vmem:[#allocation39_spill] sm:$0xff] %v9592_v40  ;;  %v9594_v57 = vpop.f32.mrb[239].mxu0  ;;  %v4423_v4 = vsub.f32 0.0, %v3832_v20 }
 0x829   : > { %v9596_v16 = vpop.eup %7502  ;;  %v6278_v15 = vpack.c.bf16 %v7501_v56, %v7497_v52  ;;  %7522 = vpow2.f32 %v4711_v55 }
 0x82a   : > { %v7505_v25 = vpop.eup %7504  ;;  %5718 = vst [vmem:[%s9222_s17 + $0x1a4] sm:$0xff] %v6277_v47  ;;  %7524 = vpow2.f32 %v4715_v0 }
 0x82b   : > { %v7507_v49 = vpop.eup %7506  ;;  %5719 = vst [vmem:[%s9222_s17 + $0x1ac] sm:$0xff] %v6278_v15  ;;  %v4907_v54 = vadd.f32 1.0, %v7505_v25  ;;  %7526 = vpow2.f32 %v4723_v28  ;;  %v4425_v28 = vsub.f32 0.0, %v3985_v35  ;;  %v4429_v25 = vsub.f32 0.0, %v3836_v17  ;;  %v10108_v17 = vld [vmem:[#allocation14_spill] sm:$0xff] }
 0x82c   : > { %v7509_v3 = vpop.eup %7508  ;;  %v4906_v30 = vadd.f32 1.0, %v7507_v49  ;;  %7528 = vpow2.f32 %v4727_v29 }
 0x82d   : > { %v7511_v33 = vpop.eup %7510  ;;  %7530 = vrcp.f32 %v4907_v54  ;;  %v4908_v62 = vadd.f32 1.0, %v7509_v3  ;;  %v4725_v54 = vmul.f32 1.442695, %v4423_v4  ;;  %v10107_v3 = vld [vmem:[#allocation13_spill] sm:$0xff] }
 0x82e   : > { %v7513_v55 = vpop.eup %7512  ;;  %7532 = vrcp.f32 %v4906_v30  ;;  %v4912_v52 = vadd.f32 1.0, %v7511_v33  ;;  %v3991_v35 = vadd.f32 %v10107_v3, %v9180_v36  ;;  %v4729_v33 = vmul.f32 1.442695, %v4425_v28 }
 0x82f   : > { %v7515_v0 = vpop.eup %7514  ;;  %7534 = vrcp.f32 %v4908_v62  ;;  %v4914_v63 = vadd.f32 1.0, %v7513_v55  ;;  %v4431_v62 = vsub.f32 0.0, %v3989_v18  ;;  %v3842_v28 = vadd.f32 %v9402_v51, %v9178_v32 }
 0x830   : > { %v7517_v56 = vpop.eup %7516  ;;  %7536 = vrcp.f32 %v4912_v52  ;;  %v4913_v47 = vadd.f32 1.0, %v7515_v0  ;;  %v3840_v0 = vadd.f32 %v10108_v17, %v9174_v1  ;;  %v10110_v17 = vld [vmem:[#allocation16_spill] sm:$0xff] }
 0x831   : > { %v7519_v29 = vpop.eup %7518  ;;  %7538 = vrcp.f32 %v4914_v63  ;;  %v4915_v15 = vadd.f32 1.0, %v7517_v56  ;;  %v3993_v63 = vadd.f32 %v10109_v58, %v9176_v2  ;;  %v3995_v40 = vadd.f32 %v10110_v17, %v9180_v36 }
 0x832   : > { %v7521_v49 = vpop.eup %7520  ;;  %7540 = vrcp.f32 %v4913_v47  ;;  %v4919_v20 = vadd.f32 1.0, %v7519_v29  ;;  %v4737_v47 = vmul.f32 1.442695, %v4429_v25  ;;  %v4430_v29 = vsub.f32 0.0, %v3838_v9 }
 0x833   : > { %v7523_v30 = vpop.eup %7522  ;;  %7542 = vrcp.f32 %v4915_v15  ;;  %v4921_v60 = vadd.f32 1.0, %v7521_v49  ;;  %v4432_v49 = vsub.f32 0.0, %v3991_v35  ;;  %v4438_v25 = vsub.f32 0.0, %v3993_v63  ;;  %v9627_v63 = vpop.f32.mrb[216].mxu1 }
 0x834   : > { %v7525_v55 = vpop.eup %7524  ;;  %7544 = vrcp.f32 %v4919_v20  ;;  %v4920_v52 = vadd.f32 1.0, %v7523_v30  ;;  %v4741_v30 = vmul.f32 1.442695, %v4431_v62  ;;  %v3846_v9 = vadd.f32 %v9413_v6, %v9174_v1 }
 0x835   : > { %v7527_v56 = vpop.eup %7526  ;;  %7546 = vrcp.f32 %v4921_v60  ;;  %v4922_v4 = vadd.f32 1.0, %v7525_v55  ;;  %v4436_v60 = vsub.f32 0.0, %v3840_v0  ;;  %v4739_v51 = vmul.f32 1.442695, %v4430_v29 }
 0x836   : > { %v7529_v3 = vpop.eup %7528  ;;  %7548 = vrcp.f32 %v4920_v52  ;;  %v4926_v15 = vadd.f32 1.0, %v7527_v56  ;;  %v3999_v62 = vadd.f32 %v9415_v31, %v9176_v2  ;;  %v3848_v0 = vadd.f32 %v9418_v8, %v9178_v32 }
 0x837   : > { %v7531_v18 = vpop.eup %7530  ;;  %7550 = vrcp.f32 %v4922_v4  ;;  %v4928_v20 = vadd.f32 1.0, %v7529_v3  ;;  %v4437_v4 = vsub.f32 0.0, %v3842_v28  ;;  %v4743_v6 = vmul.f32 1.442695, %v4432_v49 }
 0x838   : > { %v7533_v58 = vpop.eup %7532  ;;  %7552 = vrcp.f32 %v4926_v15  ;;  %v9630_v15 = vpop.f32.mrb[217].mxu1  ;;  %v4751_v31 = vmul.f32 1.442695, %v4436_v60  ;;  %v4445_v17 = vsub.f32 0.0, %v3999_v62 }
 0x839   : > { %v7535_v55 = vpop.eup %7534  ;;  %v6281_v35 = vpack.c.bf16 %v7533_v58, %v9596_v16  ;;  %7554 = vrcp.f32 %v4928_v20  ;;  %v4439_v16 = vsub.f32 0.0, %v3995_v40  ;;  %v9633_v28 = vpop.f32.mrb[218].mxu1  ;;  %v10111_v58 = vld [vmem:[#allocation12_spill] sm:$0xff] }
 0x83a   : > { %v7537_v52 = vpop.eup %7536  ;;  %v6282_v56 = vpack.c.bf16 %v7535_v55, %v7531_v18  ;;  %7556 = vpow2.f32 %v4725_v54  ;;  %v4755_v18 = vmul.f32 1.442695, %v4438_v25  ;;  %v4443_v54 = vsub.f32 0.0, %v3846_v9  ;;  %v9636_v49 = vpop.f32.mrb[219].mxu1 }
 0x83b   : > { %v7539_v3 = vpop.eup %7538  ;;  %5722 = vst [vmem:[%s9222_s17 + $0x1c0] sm:$0xff] %v6281_v35  ;;  %7558 = vpow2.f32 %v4729_v33  ;;  %v3404_v33 = vsub.s32 6, %v10111_v58  ;;  %v4753_v35 = vmul.f32 1.442695, %v4437_v4  ;;  %v4757_v25 = vmul.f32 1.442695, %v4439_v16 }
 0x83c   : > { %v7541_v29 = vpop.eup %7540  ;;  %5723 = vst [vmem:[%s9222_s17 + $0x1c8] sm:$0xff] %v6282_v56  ;;  %7560 = vpow2.f32 %v4737_v47  ;;  %v4444_v47 = vsub.f32 0.0, %v3848_v0 }
 0x83d   : > { %v7543_v20 = vpop.eup %7542  ;;  %v6285_v8 = vpack.c.bf16 %v7541_v29, %v7537_v52  ;;  %7562 = vpow2.f32 %v4741_v30  ;;  %v4765_v52 = vmul.f32 1.442695, %v4443_v54  ;;  %v4001_v30 = vadd.f32 %v9420_v37, %v9180_v36  ;;  %v9649_v29 = vpop.f32.mrb[220].mxu1 }
 0x83e   : > { %v7545_v40 = vpop.eup %7544  ;;  %v6286_v55 = vpack.c.bf16 %v7543_v20, %v7539_v3  ;;  %7564 = vpow2.f32 %v4739_v51  ;;  %v4769_v3 = vmul.f32 1.442695, %v4445_v17  ;;  %v7916_v51 = vld [vmem:[%s10048_s16] sm:$0x7f]  ;;  %v4767_v16 = vmul.f32 1.442695, %v4444_v47 }
 0x83f   : > { %v7547_v60 = vpop.eup %7546  ;;  %5726 = vst [vmem:[%s9222_s17 + $0x1dc] sm:$0xff] %v6285_v8  ;;  %7566 = vpow2.f32 %v4743_v6  ;;  %v9645_v4 = vrot.slane %v7916_v51, %v3404_v33  ;;  %v3850_v37 = vadd.f32 %v9423_v44, %v9174_v1  ;;  %v9660_v54 = vpop.f32.mrb[221].mxu1  ;;  %v4003_v8 = vadd.f32 %v9425_v7, %v9176_v2 }
 0x840   : > { %v7549_v9 = vpop.eup %7548  ;;  %5727 = vst [vmem:[%s9222_s17 + $0x1e4] sm:$0xff] %v6286_v55  ;;  %7568 = vpow2.f32 %v4751_v31  ;;  %v3396_v17 = vsub.s32 4, %v10111_v58  ;;  %v9666_v33 = vpop.f32.mrb[222].mxu1  ;;  %v4446_v1 = vsub.f32 0.0, %v4001_v30  ;;  %v3852_v44 = vadd.f32 %v9427_v46, %v9178_v32 }
 0x841   : > { %v7551_v62 = vpop.eup %7550  ;;  %v6289_v56 = vpack.c.bf16 %v7549_v9, %v7545_v40  ;;  %7570 = vpow2.f32 %v4755_v18  ;;  %v9658_v18 = vadd.f32 %v9556_v59, %v9645_v4  ;;  %v9670_v59 = vpop.f32.mrb[223].mxu1  ;;  %v4450_v7 = vsub.f32 0.0, %v3850_v37 }
 0x842   : > { %v9647_v0 = vpop.eup %7552  ;;  %v6290_v6 = vpack.c.bf16 %v7551_v62, %v7547_v60  ;;  %7572 = vpow2.f32 %v4753_v35  ;;  %v3400_v60 = vsub.s32 5, %v10111_v58  ;;  %v9675_v9 = vadd.f32 %v9564_v11, %v9645_v4  ;;  %v9685_v37 = vpop.f32.mrb[224].mxu1 }
 0x843   : > { %v9651_v31 = vpop.eup %7554  ;;  %5730 = vst [vmem:[%s9222_s17 + $0x1f8] sm:$0xff] %v6289_v56  ;;  %7574 = vpow2.f32 %v4757_v25  ;;  %v4452_v62 = vsub.f32 0.0, %v4003_v8  ;;  %v9677_v32 = vrot.slane %v7916_v51, %v3396_v17  ;;  %v9683_v11 = vadd.f32 %v9572_v45, %v9645_v4 }
 0x844   : > { %v7557_v20 = vpop.eup %7556  ;;  %5731 = vst [vmem:[%s9222_s17 + $0x200] sm:$0xff] %v6290_v6  ;;  %7576 = vpow2.f32 %v4765_v52  ;;  %v4451_v6 = vsub.f32 0.0, %v3852_v44  ;;  %v4779_v17 = vmul.f32 1.442695, %v4450_v7 }
 0x845   : > { %v7559_v40 = vpop.eup %7558  ;;  %v4927_v55 = vadd.f32 1.0, %v7557_v20  ;;  %7578 = vpow2.f32 %v4769_v3  ;;  %v4771_v3 = vmul.f32 1.442695, %v4446_v1  ;;  %v9679_v20 = vrot.slane %v7916_v51, %v3400_v60  ;;  %v9689_v1 = vpop.f32.mrb[225].mxu1 }
 0x846   : > { %v7561_v35 = vpop.eup %7560  ;;  %v4929_v47 = vadd.f32 1.0, %v7559_v40  ;;  %7580 = vpow2.f32 %v4767_v16  ;;  %v4783_v51 = vmul.f32 1.442695, %v4452_v62  ;;  %v9693_v45 = vpop.f32.mrb[226].mxu1 }
 0x847   : > { %v7563_v25 = vpop.eup %7562  ;;  %7582 = vrcp.f32 %v4927_v55  ;;  %v4933_v2 = vadd.f32 1.0, %v7561_v35  ;;  %v4005_v55 = vadd.f32 %v9429_v42, %v9180_v36  ;;  %v9699_v36 = vadd.f32 %v9580_v13, %v9645_v4  ;;  %v9701_v42 = vpop.f32.mrb[227].mxu1 }
 0x848   : > { %v7565_v52 = vpop.eup %7564  ;;  %7584 = vrcp.f32 %v4929_v47  ;;  %v4935_v30 = vadd.f32 1.0, %v7563_v25  ;;  %v4042_v47 = vadd.f32 %v9439_v27, %v9677_v32  ;;  %10112 = vst [vmem:[#allocation13_spill] sm:$0xff] %v9701_v42  ;;  %v4044_v27 = vadd.f32 %v9444_v39, %v9679_v20 }
 0x849   : > { %v7567_v46 = vpop.eup %7566  ;;  %7586 = vrcp.f32 %v4933_v2  ;;  %v4934_v56 = vadd.f32 1.0, %v7565_v52  ;;  %v4203_v2 = vadd.f32 %v9441_v61, %v9645_v4 }
 0x84a   : > { %v7569_v58 = vpop.eup %7568  ;;  %7588 = vrcp.f32 %v4935_v30  ;;  %v4936_v16 = vadd.f32 1.0, %v7567_v46  ;;  %v4781_v30 = vmul.f32 1.442695, %v4451_v6 }
 0x84b   : > { %v7571_v40 = vpop.eup %7570  ;;  %7590 = vrcp.f32 %v4934_v56  ;;  %v4940_v8 = vadd.f32 1.0, %v7569_v58  ;;  %v4453_v56 = vsub.f32 0.0, %v4005_v55  ;;  %v10113_v58 = vld [vmem:[#allocation17_spill] sm:$0xff]  ;;  %v4309_v39 = vsub.f32 0.0, %v4203_v2  ;;  %v10117_v2 = vld [vmem:[#allocation20_spill] sm:$0xff] }
 0x84c   : > { %v7573_v44 = vpop.eup %7572  ;;  %7592 = vrcp.f32 %v4936_v16  ;;  %v4942_v35 = vadd.f32 1.0, %v7571_v40  ;;  %v4195_v61 = vadd.f32 %v10113_v58, %v9645_v4  ;;  %v4293_v40 = vsub.f32 0.0, %v4042_v47 }
 0x84d   : > { %v7575_v60 = vpop.eup %7574  ;;  %7594 = vrcp.f32 %v4940_v8  ;;  %v4941_v25 = vadd.f32 1.0, %v7573_v44  ;;  %v9709_v8 = vadd.f32 %v9585_v41, %v9645_v4  ;;  %v4048_v58 = vadd.f32 %v10117_v2, %v9679_v20 }
 0x84e   : > { %v7577_v7 = vpop.eup %7576  ;;  %7596 = vrcp.f32 %v4942_v35  ;;  %v4943_v52 = vadd.f32 1.0, %v7575_v60  ;;  %v10114_v35 = vld [vmem:[#allocation18_spill] sm:$0xff] }
 0x84f   : > { %v7579_v62 = vpop.eup %7578  ;;  %7598 = vrcp.f32 %v4941_v25  ;;  %v4947_v46 = vadd.f32 1.0, %v7577_v7  ;;  %v4046_v60 = vadd.f32 %v10114_v35, %v9677_v32  ;;  %v4294_v7 = vsub.f32 0.0, %v4044_v27  ;;  %v10119_v35 = vld [vmem:[#allocation21_spill] sm:$0xff] }
 0x850   : > { %v7581_v16 = vpop.eup %7580  ;;  %7600 = vrcp.f32 %v4943_v52  ;;  %v4949_v13 = vadd.f32 1.0, %v7579_v62  ;;  %v10115_v52 = vld [vmem:[#allocation19_spill] sm:$0xff]  ;;  %v9716_v62 = vpop.f32.mrb[228].mxu1 }
 0x851   : > { %v7583_v44 = vpop.eup %7582  ;;  %7602 = vrcp.f32 %v4947_v46  ;;  %v4948_v6 = vadd.f32 1.0, %v7581_v16  ;;  %v4206_v47 = vadd.f32 %v10115_v52, %v9645_v4  ;;  %10116 = vst [vmem:[#allocation14_spill] sm:$0xff] %v9716_v62  ;;  %v9723_v16 = vadd.f32 %v9590_v53, %v9645_v4 }
 0x852   : > { %v7585_v55 = vpop.eup %7584  ;;  %v6293_v25 = vpack.c.bf16 %v7583_v44, %v9647_v0  ;;  %7604 = vrcp.f32 %v4949_v13  ;;  %v9725_v0 = vpop.f32.mrb[229].mxu1  ;;  %v4785_v13 = vmul.f32 1.442695, %v4453_v56  ;;  %v4295_v44 = vsub.f32 0.0, %v4195_v61 }
 0x853   : > { %v7587_v41 = vpop.eup %7586  ;;  %v6294_v46 = vpack.c.bf16 %v7585_v55, %v9651_v31  ;;  %7606 = vrcp.f32 %v4948_v6  ;;  %10118 = vst [vmem:[#allocation15_spill] sm:$0xff] %v9725_v0  ;;  %v4198_v52 = vadd.f32 %v10119_v35, %v9645_v4  ;;  %v9730_v62 = vpop.f32.mrb[230].mxu1  ;;  %v4465_v6 = vmul.f32 1.442695, %v4293_v40 }
 0x854   : > { %v7589_v27 = vpop.eup %7588  ;;  %5734 = vst [vmem:[%s9222_s17 + $0x214] sm:$0xff] %v6293_v25  ;;  %7608 = vpow2.f32 %v4771_v3  ;;  %10120 = vst [vmem:[#allocation16_spill] sm:$0xff] %v9730_v62  ;;  %v4300_v55 = vsub.f32 0.0, %v4046_v60  ;;  %v9735_v53 = vadd.f32 %v9594_v57, %v9645_v4  ;;  %v9737_v2 = vpop.f32.mrb[231].mxu1  ;;  %v4497_v61 = vmul.f32 1.442695, %v4309_v39 }
 0x855   : > { %v7591_v31 = vpop.eup %7590  ;;  %5735 = vst [vmem:[%s9222_s17 + $0x21c] sm:$0xff] %v6294_v46  ;;  %7610 = vpow2.f32 %v4779_v17  ;;  %10121 = vst [vmem:[#allocation12_spill] sm:$0xff] %v9737_v2  ;;  %v4316_v25 = vsub.f32 0.0, %v4206_v47  ;;  %v4467_v46 = vmul.f32 1.442695, %v4294_v7  ;;  %v4301_v17 = vsub.f32 0.0, %v4048_v58 }
 0x856   : > { %v7593_v3 = vpop.eup %7592  ;;  %v6297_v56 = vpack.c.bf16 %v7591_v31, %v7587_v41  ;;  %7612 = vpow2.f32 %v4783_v51  ;;  %v4469_v40 = vmul.f32 1.442695, %v4295_v44  ;;  %v4302_v60 = vsub.f32 0.0, %v4198_v52  ;;  %v9741_v47 = vpop.f32.mrb[232].mxu1 }
 0x857   : > { %v7595_v35 = vpop.eup %7594  ;;  %v6298_v62 = vpack.c.bf16 %v7593_v3, %v7589_v27  ;;  %7614 = vpow2.f32 %v4781_v30  ;;  %v4479_v2 = vmul.f32 1.442695, %v4300_v55  ;;  %v4511_v39 = vmul.f32 1.442695, %v4316_v25  ;;  %v9743_v58 = vpop.f32.mrb[233].mxu1 }
 0x858   : > { %v7597_v0 = vpop.eup %7596  ;;  %5738 = vst [vmem:[%s9222_s17 + $0x230] sm:$0xff] %v6297_v56  ;;  %7616 = vpow2.f32 %v4785_v13  ;;  %v4481_v41 = vmul.f32 1.442695, %v4301_v17  ;;  %v9748_v13 = vpop.f32.mrb[234].mxu1 }
 0x859   : > { %v7599_v57 = vpop.eup %7598  ;;  %5739 = vst [vmem:[%s9222_s17 + $0x238] sm:$0xff] %v6298_v62  ;;  %7618 = vpow2.f32 %v4465_v6  ;;  %v4483_v62 = vmul.f32 1.442695, %v4302_v60  ;;  %v9751_v52 = vpop.f32.mrb[235].mxu1 }
 0x85a   : > { %v7601_v42 = vpop.eup %7600  ;;  %v6301_v51 = vpack.c.bf16 %v7599_v57, %v7595_v35  ;;  %7620 = vpow2.f32 %v4497_v61  ;;  %v10122_v61 = vld [vmem:[#allocation22_spill] sm:$0xff]  ;;  %v9760_v57 = vpop.f32.mrb[236].mxu1 }
 0x85b   : > { %v7603_v30 = vpop.eup %7602  ;;  %v6302_v7 = vpack.c.bf16 %v7601_v42, %v7597_v0  ;;  %7622 = vpow2.f32 %v4467_v46  ;;  %v4052_v42 = vadd.f32 %v9464_v22, %v9677_v32  ;;  %v4219_v25 = vadd.f32 %v10122_v61, %v9645_v4  ;;  %v10123_v46 = vld [vmem:[#allocation23_spill] sm:$0xff] }
 0x85c   : > { %v9745_v27 = vpop.eup %7604  ;;  %5742 = vst [vmem:[%s9222_s17 + $0x24c] sm:$0xff] %v6301_v51  ;;  %7624 = vpow2.f32 %v4469_v40  ;;  %v4054_v17 = vadd.f32 %v10123_v46, %v9679_v20 }
 0x85d   : > { %v7607_v44 = vpop.eup %7606  ;;  %5743 = vst [vmem:[%s9222_s17 + $0x254] sm:$0xff] %v6302_v7  ;;  %7626 = vpow2.f32 %v4479_v2  ;;  %v4307_v22 = vsub.f32 0.0, %v4052_v42 }
 0x85e   : > { %v7609_v31 = vpop.eup %7608  ;;  %v6305_v6 = vpack.c.bf16 %v7607_v44, %v7603_v30  ;;  %7628 = vpow2.f32 %v4511_v39  ;;  %v10124_v30 = vld [vmem:[#allocation24_spill] sm:$0xff]  ;;  %v4308_v42 = vsub.f32 0.0, %v4054_v17 }
 0x85f   : > { %v7611_v0 = vpop.eup %7610  ;;  %v4950_v55 = vadd.f32 1.0, %v7609_v31  ;;  %7630 = vpow2.f32 %v4481_v41  ;;  %v4211_v7 = vadd.f32 %v10124_v30, %v9645_v4  ;;  %v9764_v41 = vpop.f32.mrb[237].mxu1  ;;  %v4337_v31 = vsub.f32 0.0, %v4219_v25  ;;  %v10128_v25 = vld [vmem:[#allocation25_spill] sm:$0xff] }
 0x860   : > { %v7613_v3 = vpop.eup %7612  ;;  %5746 = vst [vmem:[%s9222_s17 + $0x268] sm:$0xff] %v6305_v6  ;;  %v4954_v56 = vadd.f32 1.0, %v7611_v0  ;;  %7632 = vpow2.f32 %v4483_v62  ;;  %10125 = vst [vmem:[#allocation17_spill] sm:$0xff] %v9764_v41  ;;  %v9766_v6 = vpop.f32.mrb[238].mxu1 }
 0x861   : > { %v7615_v35 = vpop.eup %7614  ;;  %7634 = vrcp.f32 %v4950_v55  ;;  %v4956_v2 = vadd.f32 1.0, %v7613_v3  ;;  %10126 = vst [vmem:[#allocation18_spill] sm:$0xff] %v9766_v6  ;;  %v9768_v3 = vpop.f32.mrb[239].mxu1  ;;  %v4553_v17 = vmul.f32 1.442695, %v4337_v31 }
 0x862   : > { %v7617_v40 = vpop.eup %7616  ;;  %7636 = vrcp.f32 %v4954_v56  ;;  %v4955_v60 = vadd.f32 1.0, %v7615_v35  ;;  %10127 = vst [vmem:[#allocation19_spill] sm:$0xff] %v9768_v3  ;;  %v4493_v35 = vmul.f32 1.442695, %v4307_v22 }
 0x863   : > { %v7619_v51 = vpop.eup %7618  ;;  %7638 = vrcp.f32 %v4956_v2  ;;  %v4957_v39 = vadd.f32 1.0, %v7617_v40  ;;  %v4056_v2 = vadd.f32 %v9476_v21, %v9677_v32  ;;  %v10130_v21 = vld [vmem:[#allocation27_spill] sm:$0xff] }
 0x864   : > { %v7621_v62 = vpop.eup %7620  ;;  %7640 = vrcp.f32 %v4955_v60  ;;  %v4797_v44 = vadd.f32 1.0, %v7619_v51  ;;  %v4323_v60 = vsub.f32 0.0, %v4211_v7  ;;  %v4222_v51 = vadd.f32 %v10128_v25, %v9645_v4 }
 0x865   : > { %v7623_v0 = vpop.eup %7622  ;;  %7642 = vrcp.f32 %v4957_v39  ;;  %v4813_v55 = vadd.f32 1.0, %v7621_v62  ;;  %v10129_v62 = vld [vmem:[#allocation26_spill] sm:$0xff]  ;;  %v4214_v6 = vadd.f32 %v10130_v21, %v9645_v4  ;;  %v4062_v25 = vadd.f32 %v9496_v10, %v9677_v32 }
 0x866   : > { %v7625_v56 = vpop.eup %7624  ;;  %7644 = vrcp.f32 %v4797_v44  ;;  %v4798_v61 = vadd.f32 1.0, %v7623_v0  ;;  %v4058_v3 = vadd.f32 %v10129_v62, %v9679_v20  ;;  %v4495_v0 = vmul.f32 1.442695, %v4308_v42 }
 0x867   : > { %v7627_v46 = vpop.eup %7626  ;;  %7646 = vrcp.f32 %v4813_v55  ;;  %v4799_v40 = vadd.f32 1.0, %v7625_v56  ;;  %v4314_v56 = vsub.f32 0.0, %v4056_v2  ;;  %v4330_v10 = vsub.f32 0.0, %v4214_v6 }
 0x868   : > { %v7629_v30 = vpop.eup %7628  ;;  %7648 = vrcp.f32 %v4798_v61  ;;  %v4804_v39 = vadd.f32 1.0, %v7627_v46  ;;  %v4344_v46 = vsub.f32 0.0, %v4222_v51  ;;  %v4315_v62 = vsub.f32 0.0, %v4058_v3 }
 0x869   : > { %v7631_v44 = vpop.eup %7630  ;;  %7650 = vrcp.f32 %v4799_v40  ;;  %v4820_v22 = vadd.f32 1.0, %v7629_v30  ;;  %v4235_v40 = vadd.f32 %v9498_v14, %v9645_v4  ;;  %v4507_v14 = vmul.f32 1.442695, %v4314_v56 }
 0x86a   : > { %v7633_v55 = vpop.eup %7632  ;;  %7652 = vrcp.f32 %v4804_v39  ;;  %v4805_v7 = vadd.f32 1.0, %v7631_v44  ;;  %v4064_v39 = vadd.f32 %v9500_v26, %v9679_v20  ;;  %v4525_v44 = vmul.f32 1.442695, %v4323_v60 }
 0x86b   : > { %v7635_v61 = vpop.eup %7634  ;;  %7654 = vrcp.f32 %v4820_v22  ;;  %v4806_v31 = vadd.f32 1.0, %v7633_v55  ;;  %v4227_v22 = vadd.f32 %v9502_v19, %v9645_v4  ;;  %v4321_v51 = vsub.f32 0.0, %v4062_v25 }
 0x86c   : > { %v7637_v30 = vpop.eup %7636  ;;  %v6306_v42 = vpack.c.bf16 %v7635_v61, %v9745_v27  ;;  %7656 = vrcp.f32 %v4805_v7  ;;  %v10131_v27 = vld [vmem:[#allocation28_spill] sm:$0xff]  ;;  %v4567_v26 = vmul.f32 1.442695, %v4344_v46  ;;  %v4365_v61 = vsub.f32 0.0, %v4235_v40 }
 0x86d   : > { %v7639_v2 = vpop.eup %7638  ;;  %7658 = vrcp.f32 %v4806_v31  ;;  %v4066_v55 = vadd.f32 %v10131_v27, %v9677_v32  ;;  %v4509_v31 = vmul.f32 1.442695, %v4315_v62  ;;  %v4322_v19 = vsub.f32 0.0, %v4064_v39 }
 0x86e   : > { %v7641_v21 = vpop.eup %7640  ;;  %5747 = vst [vmem:[%s9222_s17 + $0x270] sm:$0xff] %v6306_v42  ;;  %7660 = vpow2.f32 %v4493_v35  ;;  %v4539_v35 = vmul.f32 1.442695, %v4330_v10  ;;  %v4351_v56 = vsub.f32 0.0, %v4227_v22 }
 0x86f   : > { %v7643_v3 = vpop.eup %7642  ;;  %v6309_v7 = vpack.c.bf16 %v7641_v21, %v7637_v30  ;;  %7662 = vpow2.f32 %v4553_v17  ;;  %v4521_v17 = vmul.f32 1.442695, %v4321_v51  ;;  %v4328_v46 = vsub.f32 0.0, %v4066_v55 }
 0x870   : > { %v7645_v60 = vpop.eup %7644  ;;  %v6310_v6 = vpack.c.bf16 %v7643_v3, %v7639_v2  ;;  %7664 = vpow2.f32 %v4495_v0  ;;  %v4609_v0 = vmul.f32 1.442695, %v4365_v61  ;;  %v4523_v2 = vmul.f32 1.442695, %v4322_v19  ;;  %v10132_v3 = vld [vmem:[#allocation29_spill] sm:$0xff] }
 0x871   : > { %v7647_v41 = vpop.eup %7646  ;;  %5750 = vst [vmem:[%s9222_s17 + $0x284] sm:$0xff] %v6309_v7  ;;  %7666 = vpow2.f32 %v4525_v44  ;;  %v4535_v21 = vmul.f32 1.442695, %v4328_v46  ;;  %v9801_v7 = vadd.f32 %v10132_v3, %v9645_v4 }
 0x872   : > { %v7649_v25 = vpop.eup %7648  ;;  %5751 = vst [vmem:[%s9222_s17 + $0x28c] sm:$0xff] %v6310_v6  ;;  %v6228_v30 = vpack.c.bf16 %v7647_v41, %v7647_v41  ;;  %7668 = vpow2.f32 %v4507_v14  ;;  %v4581_v41 = vmul.f32 1.442695, %v4351_v56 }
 0x873   : > { %v7651_v40 = vpop.eup %7650  ;;  %v6219_v42 = vpack.c.bf16 %v7649_v25, %v7645_v60  ;;  %7670 = vpow2.f32 %v4567_v26  ;;  %v10133_v60 = vld [vmem:[#allocation30_spill] sm:$0xff]  ;;  %v9812_v25 = vadd.f32 %v9512_v38, %v9645_v4  ;;  %v4372_v46 = vsub.f32 0.0, %v9801_v7 }
 0x874   : > { %v7653_v62 = vpop.eup %7652  ;;  %5669 = vst.msk [vmem:[%s9222_s17 + $0x50] sm:$0xf] %vm5660_vm4, %v6228_v30  ;;  %v6220_v39 = vpack.c.bf16 %v7651_v40, %v7651_v40  ;;  %7672 = vpow2.f32 %v4509_v31  ;;  %v9806_v6 = vadd.f32 %v10133_v60, %v9679_v20  ;;  %v9819_v40 = vadd.f32 %v9516_v24, %v9677_v32 }
 0x875   : > { %v7655_v44 = vpop.eup %7654  ;;  %5659 = vst [vmem:[%s9222_s17 + $0x10] sm:$0xff] %v6219_v42  ;;  %7674 = vpow2.f32 %v4539_v35  ;;  %v9831_v24 = vadd.f32 %v9518_v23, %v9645_v4 }
 0x876   : > { %v7657_v10 = vpop.eup %7656  ;;  %5661 = vst.msk [vmem:[%s9222_s17 + $0x18] sm:$0xf] %vm5660_vm4, %v6220_v39  ;;  %v6232_v22 = vpack.c.bf16 %v7655_v44, %v7655_v44  ;;  %7676 = vpow2.f32 %v4521_v17 }
 0x877   : > { %v7659_v14 = vpop.eup %7658  ;;  %v6223_v51 = vpack.c.bf16 %v7657_v10, %v7653_v62  ;;  %7678 = vpow2.f32 %v4609_v0  ;;  %v4329_v0 = vsub.f32 0.0, %v9806_v6 }
 0x878   : > { %v7661_v27 = vpop.eup %7660  ;;  %5673 = vst.msk [vmem:[%s9222_s17 + $0x6c] sm:$0xf] %vm5660_vm4, %v6232_v22  ;;  %v6224_v55 = vpack.c.bf16 %v7659_v14, %v7659_v14  ;;  %7680 = vpow2.f32 %v4523_v2 }
 0x879   : > { %v7663_v26 = vpop.eup %7662  ;;  %5664 = vst [vmem:[%s9222_s17 + $0x2c] sm:$0xff] %v6223_v51  ;;  %v4811_v61 = vadd.f32 1.0, %v7661_v27  ;;  %7682 = vpow2.f32 %v4581_v41 }
 0x87a   : > { %v7665_v31 = vpop.eup %7664  ;;  %5665 = vst.msk [vmem:[%s9222_s17 + $0x34] sm:$0xf] %vm5660_vm4, %v6224_v55  ;;  %v4841_v19 = vadd.f32 1.0, %v7663_v26  ;;  %7684 = vpow2.f32 %v4535_v21 }
 0x87b   : > { %v7667_v35 = vpop.eup %7666  ;;  %7686 = vrcp.f32 %v4811_v61  ;;  %v4812_v56 = vadd.f32 1.0, %v7665_v31 }
 0x87c   : > { %v7669_v30 = vpop.eup %7668  ;;  %7688 = vrcp.f32 %v4841_v19  ;;  %v4827_v17 = vadd.f32 1.0, %v7667_v35 }
 0x87d   : > { %v7671_v42 = vpop.eup %7670  ;;  %7690 = vrcp.f32 %v4812_v56  ;;  %v4818_v38 = vadd.f32 1.0, %v7669_v30 }
 0x87e   : > { %v7673_v62 = vpop.eup %7672  ;;  %7692 = vrcp.f32 %v4827_v17  ;;  %v4848_v39 = vadd.f32 1.0, %v7671_v42 }
 0x87f   : > { %7930 = shalt.err (!%p7927_p3)
}
 0x880   : > { %s7931_s21 = scalar_lea.hbm %s9827_s29, 1536  ;;  %s7935_s30 = scalar_lea.hbm %s10136_s19, 3072 }
 0x881   : > { %p7932_p4 = scmp.ne.s32.totalorder %s9827_s29, %s7931_s21  ;;  %p7936_p9 = scmp.lt.u32.totalorder %s9827_s29, %s10136_s19 }
 0x882   : > { %p7937_p10 = scmp.lt.u32.totalorder %s7935_s30, %s7931_s21  ;;  %p7939_p12 = scmp.lt.u32.totalorder %s7931_s21, %s9827_s29 }
 0x883   : > { %p7933_p7 = pnand %p7932_p4, %p8118_p5 }
 0x884   : > { %p7938_p11 = por %p7937_p10, %p7936_p9 }
 0x885   : > { %p7934_p8 = pneg %p7933_p7 }
 0x886   : > { %p7940_p13 = por %p7939_p12, %p7938_p11 }
 0x888   : > { %p7941_p0 = pnand %p7940_p13, %p7934_p8 }
 0x88a   : > { %7944 = shalt.err (!%p7941_p0)
}
 0x88b   : > { %s7983_s27 = smov 64   ;;  %s7984_s20 = smov 4   ;;  %v7675_v23 = vpop.eup %7674  ;;  %7694 = vrcp.f32 %v4818_v38  ;;  %v4819_v2 = vadd.f32 1.0, %v7673_v62  ;;  %v4358_v44 = vsub.f32 0.0, %v9812_v25  ;;  %v4623_v22 = vmul.f32 1.442695, %v4372_v46 }
 0x88c   : > { %7047 = dma.vmem_to_hbm [thread:$0]  (%p8118_p5), %s9821_s24, 1536, %s9827_s29, %s9835_s1, %s7983_s27, %s7983_s27, %s7984_s20   ;;  %v7677_v41 = vpop.eup %7676  ;;  %7696 = vrcp.f32 %v4848_v39  ;;  %v4834_v10 = vadd.f32 1.0, %v7675_v23  ;;  %v4335_v21 = vsub.f32 0.0, %v9819_v40  ;;  %v4537_v27 = vmul.f32 1.442695, %v4329_v0 }
 0x88d   : > { %v7679_v14 = vpop.eup %7678  ;;  %7698 = vrcp.f32 %v4819_v2  ;;  %v4825_v51 = vadd.f32 1.0, %v7677_v41  ;;  %v4074_v55 = vadd.f32 %v9522_v50, %v9679_v20  ;;  %v4393_v26 = vsub.f32 0.0, %v9831_v24  ;;  %v10137_v50 = vld [vmem:[#allocation31_spill] sm:$0xff] }
 0x88e   : > { %v7681_v3 = vpop.eup %7680  ;;  %7700 = vrcp.f32 %v4834_v10  ;;  %v4869_v7 = vadd.f32 1.0, %v7679_v14  ;;  %v4243_v61 = vadd.f32 %v9524_v12, %v9645_v4  ;;  %v4595_v31 = vmul.f32 1.442695, %v4358_v44  ;;  %v10138_v12 = vld [vmem:[#allocation32_spill] sm:$0xff]  ;;  %v10140_v44 = vld [vmem:[#allocation34_spill] sm:$0xff] }
 0x88f   : > { %v7683_v60 = vpop.eup %7682  ;;  %7702 = vrcp.f32 %v4825_v51  ;;  %v4826_v6 = vadd.f32 1.0, %v7681_v3  ;;  %v4076_v19 = vadd.f32 %v9527_v5, %v9677_v32  ;;  %v4549_v25 = vmul.f32 1.442695, %v4335_v21  ;;  %v10139_v5 = vld [vmem:[#allocation33_spill] sm:$0xff]  ;;  %v10141_v51 = vld [vmem:[#allocation35_spill] sm:$0xff] }
 0x890   : > { %v7685_v35 = vpop.eup %7684  ;;  %7704 = vrcp.f32 %v4869_v7  ;;  %v4855_v56 = vadd.f32 1.0, %v7683_v60  ;;  %v4254_v30 = vadd.f32 %v10137_v50, %v9645_v4  ;;  %v4336_v40 = vsub.f32 0.0, %v4074_v55 }
 0x891   : > { %v7687_v17 = vpop.eup %7686  ;;  %7706 = vrcp.f32 %v4826_v6  ;;  %v4832_v46 = vadd.f32 1.0, %v7685_v35  ;;  %v4078_v42 = vadd.f32 %v10138_v12, %v9679_v20  ;;  %v4665_v0 = vmul.f32 1.442695, %v4393_v26 }
 0x892   : > { %v7689_v38 = vpop.eup %7688  ;;  %7708 = vrcp.f32 %v4855_v56  ;;  %v4379_v62 = vsub.f32 0.0, %v4243_v61  ;;  %v4246_v39 = vadd.f32 %v10139_v5, %v9645_v4  ;;  %v4342_v2 = vsub.f32 0.0, %v4076_v19 }
 0x893   : > { %v7691_v24 = vpop.eup %7690  ;;  %v6244_v23 = vpack.c.bf16 %v7689_v38, %v7689_v38  ;;  %7710 = vrcp.f32 %v4832_v46  ;;  %v4082_v41 = vadd.f32 %v10140_v44, %v9677_v32  ;;  %v4400_v14 = vsub.f32 0.0, %v4254_v30 }
 0x894   : > { %v7693_v10 = vpop.eup %7692  ;;  %v6227_v21 = vpack.c.bf16 %v7691_v24, %v7687_v17  ;;  %7712 = vpow2.f32 %v4623_v22  ;;  %v4267_v55 = vadd.f32 %v10141_v51, %v9645_v4  ;;  %v4551_v26 = vmul.f32 1.442695, %v4336_v40 }
 0x895   : > { %v7695_v3 = vpop.eup %7694  ;;  %5685 = vst.msk [vmem:[%s9222_s17 + $0xc0] sm:$0xf] %vm5660_vm4, %v6244_v23  ;;  %v6236_v7 = vpack.c.bf16 %v7693_v10, %v7693_v10  ;;  %7714 = vpow2.f32 %v4537_v27  ;;  %v4343_v61 = vsub.f32 0.0, %v4078_v42  ;;  %v4637_v6 = vmul.f32 1.442695, %v4379_v62 }
 0x896   : > { %v7697_v60 = vpop.eup %7696  ;;  %5668 = vst [vmem:[%s9222_s17 + $0x48] sm:$0xff] %v6227_v21  ;;  %7716 = vpow2.f32 %v4595_v31  ;;  %v4386_v19 = vsub.f32 0.0, %v4246_v39  ;;  %v4563_v4 = vmul.f32 1.442695, %v4342_v2  ;;  %v4349_v56 = vsub.f32 0.0, %v4082_v41 }
 0x897   : > { %v7699_v35 = vpop.eup %7698  ;;  %5677 = vst.msk [vmem:[%s9222_s17 + $0x88] sm:$0xf] %vm5660_vm4, %v6236_v7  ;;  %v6248_v22 = vpack.c.bf16 %v7697_v60, %v7697_v60  ;;  %7718 = vpow2.f32 %v4549_v25  ;;  %v4679_v27 = vmul.f32 1.442695, %v4400_v14  ;;  %v4421_v17 = vsub.f32 0.0, %v4267_v55  ;;  %v10142_v14 = vld [vmem:[#allocation36_spill] sm:$0xff] }
 0x898   : > { %v7701_v50 = vpop.eup %7700  ;;  %v6231_v30 = vpack.c.bf16 %v7699_v35, %v7695_v3  ;;  %7720 = vpow2.f32 %v4665_v0  ;;  %v4565_v40 = vmul.f32 1.442695, %v4343_v61  ;;  %v4651_v25 = vmul.f32 1.442695, %v4386_v19  ;;  %v10143_v61 = vld [vmem:[#allocation37_spill] sm:$0xff] }
 0x899   : > { %v7703_v46 = vpop.eup %7702  ;;  %5689 = vst.msk [vmem:[%s9222_s17 + $0xdc] sm:$0xf] %vm5660_vm4, %v6248_v22  ;;  %v6240_v31 = vpack.c.bf16 %v7701_v50, %v7701_v50  ;;  %7722 = vpow2.f32 %v4551_v26  ;;  %v4577_v0 = vmul.f32 1.442695, %v4349_v56  ;;  %v4721_v39 = vmul.f32 1.442695, %v4421_v17 }
 0x89a   : > { %v7705_v12 = vpop.eup %7704  ;;  %5672 = vst [vmem:[%s9222_s17 + $0x64] sm:$0xff] %v6231_v30  ;;  %7724 = vpow2.f32 %v4637_v6  ;;  %v4084_v51 = vadd.f32 %v10142_v14, %v9679_v20  ;;  %v4086_v60 = vadd.f32 %v10143_v61, %v9677_v32  ;;  %v4407_v30 = vsub.f32 0.0, %v9658_v18 }
 0x89b   : > { %v7707_v42 = vpop.eup %7706  ;;  %5681 = vst.msk [vmem:[%s9222_s17 + $0xa4] sm:$0xf] %vm5660_vm4, %v6240_v31  ;;  %v6260_v38 = vpack.c.bf16 %v7705_v12, %v7705_v12  ;;  %7726 = vpow2.f32 %v4563_v4 }
 0x89c   : > { %v7709_v62 = vpop.eup %7708  ;;  %v6235_v5 = vpack.c.bf16 %v7707_v42, %v7703_v46  ;;  %7728 = vpow2.f32 %v4679_v27  ;;  %v4350_v4 = vsub.f32 0.0, %v4084_v51  ;;  %v10144_v27 = vld [vmem:[#allocation38_spill] sm:$0xff]  ;;  %v4428_v42 = vsub.f32 0.0, %v9675_v9 }
 0x89d   : > { %v9888_v24 = vpop.eup %7710  ;;  %5701 = vst.msk [vmem:[%s9222_s17 + $0x130] sm:$0xf] %vm5660_vm4, %v6260_v38  ;;  %v6252_v23 = vpack.c.bf16 %v7709_v62, %v7709_v62  ;;  %7730 = vpow2.f32 %v4565_v40  ;;  %v4088_v17 = vadd.f32 %v10144_v27, %v9679_v20  ;;  %v4356_v40 = vsub.f32 0.0, %v4086_v60 }
 0x89e   : > { %v7713_v2 = vpop.eup %7712  ;;  %5676 = vst [vmem:[%s9222_s17 + $0x80] sm:$0xff] %v6235_v5  ;;  %7732 = vpow2.f32 %v4651_v25  ;;  %v4579_v62 = vmul.f32 1.442695, %v4350_v4  ;;  %v4092_v5 = vadd.f32 %v9578_v34, %v9677_v32  ;;  %v4735_v51 = vmul.f32 1.442695, %v4428_v42 }
 0x89f   : > { %v7715_v44 = vpop.eup %7714  ;;  %5693 = vst.msk [vmem:[%s9222_s17 + $0xf8] sm:$0xf] %vm5660_vm4, %v6252_v23  ;;  %v4876_v41 = vadd.f32 1.0, %v7713_v2  ;;  %7734 = vpow2.f32 %v4577_v0  ;;  %v4693_v23 = vmul.f32 1.442695, %v4407_v30  ;;  %v4357_v2 = vsub.f32 0.0, %v4088_v17 }
 0x8a0   : > { %v7717_v10 = vpop.eup %7716  ;;  %v4833_v21 = vadd.f32 1.0, %v7715_v44  ;;  %7736 = vpow2.f32 %v4721_v39 }
 0x8a1   : > { %v7719_v55 = vpop.eup %7718  ;;  %7738 = vrcp.f32 %v4876_v41  ;;  %v4862_v3 = vadd.f32 1.0, %v7717_v10  ;;  %v4591_v10 = vmul.f32 1.442695, %v4356_v40  ;;  %v4456_v40 = vsub.f32 0.0, %v9723_v16 }
 0x8a2   : > { %v7721_v7 = vpop.eup %7720  ;;  %7740 = vrcp.f32 %v4833_v21  ;;  %v4839_v26 = vadd.f32 1.0, %v7719_v55  ;;  %v4094_v21 = vadd.f32 %v9583_v43, %v9679_v20  ;;  %v4414_v55 = vsub.f32 0.0, %v9683_v11 }
 0x8a3   : > { %v7723_v6 = vpop.eup %7722  ;;  %7742 = vrcp.f32 %v4862_v3  ;;  %v4897_v19 = vadd.f32 1.0, %v7721_v7  ;;  %v4363_v7 = vsub.f32 0.0, %v4092_v5  ;;  %v4593_v43 = vmul.f32 1.442695, %v4357_v2 }
 0x8a4   : > { %v7725_v35 = vpop.eup %7724  ;;  %7744 = vrcp.f32 %v4839_v26  ;;  %v4840_v22 = vadd.f32 1.0, %v7723_v6  ;;  %v4096_v26 = vadd.f32 %v9588_v48, %v9677_v32  ;;  %v4449_v6 = vsub.f32 0.0, %v9699_v36 }
 0x8a5   : > { %v7727_v56 = vpop.eup %7726  ;;  %7746 = vrcp.f32 %v4897_v19  ;;  %v4883_v50 = vadd.f32 1.0, %v7725_v35  ;;  %v4364_v35 = vsub.f32 0.0, %v4094_v21  ;;  %v4707_v48 = vmul.f32 1.442695, %v4414_v55 }
 0x8a6   : > { %v7729_v46 = vpop.eup %7728  ;;  %7748 = vrcp.f32 %v4840_v22  ;;  %v4846_v31 = vadd.f32 1.0, %v7727_v56  ;;  %v10145_v22 = vld [vmem:[#allocation39_spill] sm:$0xff]  ;;  %v4605_v30 = vmul.f32 1.442695, %v4363_v7  ;;  %v4370_v27 = vsub.f32 0.0, %v4096_v26 }
 0x8a7   : > { %v7731_v12 = vpop.eup %7730  ;;  %7750 = vrcp.f32 %v4883_v50  ;;  %v4904_v25 = vadd.f32 1.0, %v7729_v46  ;;  %v4098_v4 = vadd.f32 %v10145_v22, %v9679_v20  ;;  %v4102_v55 = vadd.f32 %v9627_v63, %v9677_v32 }
 0x8a8   : > { %v7733_v38 = vpop.eup %7732  ;;  %7752 = vrcp.f32 %v4846_v31  ;;  %v4847_v0 = vadd.f32 1.0, %v7731_v12  ;;  %v4777_v31 = vmul.f32 1.442695, %v4449_v6  ;;  %v4619_v16 = vmul.f32 1.442695, %v4370_v27 }
 0x8a9   : > { %v7735_v18 = vpop.eup %7734  ;;  %7754 = vrcp.f32 %v4904_v25  ;;  %v4890_v39 = vadd.f32 1.0, %v7733_v38  ;;  %v4371_v42 = vsub.f32 0.0, %v4098_v4  ;;  %v4104_v7 = vadd.f32 %v9630_v15, %v9679_v20 }
 0x8aa   : > { %v7737_v44 = vpop.eup %7736  ;;  %7756 = vrcp.f32 %v4847_v0  ;;  %v4853_v41 = vadd.f32 1.0, %v7735_v18  ;;  %v4442_v6 = vsub.f32 0.0, %v9735_v53 }
 0x8ab   : > { %v7739_v9 = vpop.eup %7738  ;;  %7758 = vrcp.f32 %v4890_v39  ;;  %v4925_v14 = vadd.f32 1.0, %v7737_v44 }
 0x8ac   : > { %v7741_v34 = vpop.eup %7740  ;;  %v6264_v3 = vpack.c.bf16 %v7739_v9, %v7739_v9  ;;  %7760 = vrcp.f32 %v4853_v41  ;;  %v4621_v41 = vmul.f32 1.442695, %v4371_v42 }
 0x8ad   : > { %v7743_v61 = vpop.eup %7742  ;;  %v6239_v60 = vpack.c.bf16 %v7741_v34, %v9888_v24  ;;  %7762 = vrcp.f32 %v4925_v14  ;;  %v4435_v24 = vsub.f32 0.0, %v9709_v8  ;;  %v4607_v8 = vmul.f32 1.442695, %v4364_v35 }
 0x8ae   : > { %v7745_v19 = vpop.eup %7744  ;;  %5705 = vst.msk [vmem:[%s9222_s17 + $0x14c] sm:$0xf] %vm5660_vm4, %v6264_v3  ;;  %v6256_v11 = vpack.c.bf16 %v7743_v61, %v7743_v61  ;;  %7764 = vpow2.f32 %v4579_v62  ;;  %v4377_v35 = vsub.f32 0.0, %v4102_v55 }
 0x8af   : > { %v7747_v56 = vpop.eup %7746  ;;  %5680 = vst [vmem:[%s9222_s17 + $0x9c] sm:$0xff] %v6239_v60  ;;  %7766 = vpow2.f32 %v4693_v23  ;;  %v4749_v0 = vmul.f32 1.442695, %v4435_v24  ;;  %v4791_v23 = vmul.f32 1.442695, %v4456_v40  ;;  %v4108_v24 = vadd.f32 %v9636_v49, %v9679_v20 }
 0x8b0   : > { %v7749_v50 = vpop.eup %7748  ;;  %5697 = vst.msk [vmem:[%s9222_s17 + $0x114] sm:$0xf] %vm5660_vm4, %v6256_v11  ;;  %v6276_v36 = vpack.c.bf16 %v7747_v56, %v7747_v56  ;;  %7768 = vpow2.f32 %v4591_v10  ;;  %v4378_v56 = vsub.f32 0.0, %v4104_v7 }
 0x8b1   : > { %v7751_v17 = vpop.eup %7750  ;;  %v6243_v46 = vpack.c.bf16 %v7749_v50, %v7745_v19  ;;  %7770 = vpow2.f32 %v4735_v51  ;;  %v4106_v19 = vadd.f32 %v9633_v28, %v9677_v32  ;;  %v4385_v42 = vsub.f32 0.0, %v4108_v24 }
 0x8b2   : > { %v7753_v12 = vpop.eup %7752  ;;  %5717 = vst.msk [vmem:[%s9222_s17 + $0x1a0] sm:$0xf] %vm5660_vm4, %v6276_v36  ;;  %v6268_v25 = vpack.c.bf16 %v7751_v17, %v7751_v17  ;;  %7772 = vpow2.f32 %v4593_v43  ;;  %v4763_v36 = vmul.f32 1.442695, %v4442_v6  ;;  %v4633_v17 = vmul.f32 1.442695, %v4377_v35 }
 0x8b3   : > { %v7755_v38 = vpop.eup %7754  ;;  %5684 = vst [vmem:[%s9222_s17 + $0xb8] sm:$0xff] %v6243_v46  ;;  %7774 = vpow2.f32 %v4707_v48  ;;  %v4112_v46 = vadd.f32 %v9649_v29, %v9677_v32  ;;  %v4118_v29 = vadd.f32 %v9670_v59, %v9679_v20 }
 0x8b4   : > { %v7757_v62 = vpop.eup %7756  ;;  %5709 = vst.msk [vmem:[%s9222_s17 + $0x168] sm:$0xf] %vm5660_vm4, %v6268_v25  ;;  %v6280_v5 = vpack.c.bf16 %v7755_v38, %v7755_v38  ;;  %7776 = vpow2.f32 %v4605_v30  ;;  %v4384_v30 = vsub.f32 0.0, %v4106_v19  ;;  %v4114_v25 = vadd.f32 %v9660_v54, %v9679_v20 }
 0x8b5   : > { %v7759_v18 = vpop.eup %7758  ;;  %v6247_v39 = vpack.c.bf16 %v7757_v62, %v7753_v12  ;;  %7778 = vpow2.f32 %v4777_v31  ;;  %v4635_v12 = vmul.f32 1.442695, %v4378_v56  ;;  %v4116_v38 = vadd.f32 %v9666_v33, %v9677_v32 }
 0x8b6   : > { %v9926_v2 = vpop.eup %7760  ;;  %5721 = vst.msk [vmem:[%s9222_s17 + $0x1bc] sm:$0xf] %vm5660_vm4, %v6280_v5  ;;  %v6272_v44 = vpack.c.bf16 %v7759_v18, %v7759_v18  ;;  %7780 = vpow2.f32 %v4607_v8  ;;  %v4647_v5 = vmul.f32 1.442695, %v4384_v30  ;;  %v4122_v54 = vadd.f32 %v9685_v37, %v9677_v32 }
 0x8b7   : > { %v7763_v10 = vpop.eup %7762  ;;  %5688 = vst [vmem:[%s9222_s17 + $0xd4] sm:$0xff] %v6247_v39  ;;  %7782 = vpow2.f32 %v4749_v0  ;;  %v4391_v39 = vsub.f32 0.0, %v4112_v46  ;;  %v4392_v33 = vsub.f32 0.0, %v4114_v25  ;;  %v4398_v59 = vsub.f32 0.0, %v4116_v38 }
 0x8b8   : > { %v7765_v21 = vpop.eup %7764  ;;  %5713 = vst.msk [vmem:[%s9222_s17 + $0x184] sm:$0xf] %vm5660_vm4, %v6272_v44  ;;  %v6292_v9 = vpack.c.bf16 %v7763_v10, %v7763_v10  ;;  %7784 = vpow2.f32 %v4619_v16  ;;  %v4649_v37 = vmul.f32 1.442695, %v4385_v42  ;;  %v4405_v7 = vsub.f32 0.0, %v4122_v54 }
 0x8b9   : > { %v7767_v14 = vpop.eup %7766  ;;  %v4854_v51 = vadd.f32 1.0, %v7765_v21  ;;  %7786 = vpow2.f32 %v4791_v23  ;;  %v4675_v19 = vmul.f32 1.442695, %v4398_v59 }
 0x8ba   : > { %v7769_v34 = vpop.eup %7768  ;;  %5733 = vst.msk [vmem:[%s9222_s17 + $0x210] sm:$0xf] %vm5660_vm4, %v6292_v9  ;;  %v4911_v3 = vadd.f32 1.0, %v7767_v14  ;;  %7788 = vpow2.f32 %v4621_v41  ;;  %v4124_v41 = vadd.f32 %v9689_v1, %v9679_v20  ;;  %v4126_v9 = vadd.f32 %v9693_v45, %v9677_v32 }
 0x8bb   : > { %v7771_v26 = vpop.eup %7770  ;;  %7790 = vrcp.f32 %v4854_v51  ;;  %v4860_v61 = vadd.f32 1.0, %v7769_v34  ;;  %v4399_v51 = vsub.f32 0.0, %v4118_v29  ;;  %v4663_v45 = vmul.f32 1.442695, %v4392_v33 }
 0x8bc   : > { %v7773_v60 = vpop.eup %7772  ;;  %7792 = vrcp.f32 %v4911_v3  ;;  %v4932_v43 = vadd.f32 1.0, %v7771_v26  ;;  %v4661_v3 = vmul.f32 1.442695, %v4391_v39 }
 0x8bd   : > { %v7775_v63 = vpop.eup %7774  ;;  %7794 = vrcp.f32 %v4860_v61  ;;  %v4861_v11 = vadd.f32 1.0, %v7773_v60  ;;  %v4406_v60 = vsub.f32 0.0, %v4124_v41  ;;  %v4677_v35 = vmul.f32 1.442695, %v4399_v51 }
 0x8be   : > { %v7777_v22 = vpop.eup %7776  ;;  %7796 = vrcp.f32 %v4932_v43  ;;  %v4918_v4 = vadd.f32 1.0, %v7775_v63  ;;  %v4412_v63 = vsub.f32 0.0, %v4126_v9 }
 0x8bf   : > { %v7779_v15 = vpop.eup %7778  ;;  %7798 = vrcp.f32 %v4861_v11  ;;  %v4867_v48 = vadd.f32 1.0, %v7777_v22 }
 0x8c0   : > { %v7781_v50 = vpop.eup %7780  ;;  %7800 = vrcp.f32 %v4918_v4  ;;  %v4953_v53 = vadd.f32 1.0, %v7779_v15  ;;  %v4689_v15 = vmul.f32 1.442695, %v4405_v7  ;;  %v4703_v30 = vmul.f32 1.442695, %v4412_v63 }
 0x8c1   : > { %v7783_v28 = vpop.eup %7782  ;;  %7802 = vrcp.f32 %v4867_v48  ;;  %v4868_v27 = vadd.f32 1.0, %v7781_v50  ;;  %v4691_v50 = vmul.f32 1.442695, %v4406_v60 }
 0x8c2   : > { %v7785_v31 = vpop.eup %7784  ;;  %7804 = vrcp.f32 %v4953_v53  ;;  %v4939_v40 = vadd.f32 1.0, %v7783_v28 }
 0x8c3   : > { %v7787_v49 = vpop.eup %7786  ;;  %7806 = vrcp.f32 %v4868_v27  ;;  %v4874_v8 = vadd.f32 1.0, %v7785_v31 }
 0x8c4   : > { %v7789_v0 = vpop.eup %7788  ;;  %7808 = vrcp.f32 %v4939_v40  ;;  %v4960_v62 = vadd.f32 1.0, %v7787_v49  ;;  %v10147_v49 = vld [vmem:[#allocation14_spill] sm:$0xff] }
 0x8c5   : > { %v7791_v16 = vpop.eup %7790  ;;  %7810 = vrcp.f32 %v4874_v8  ;;  %v4875_v18 = vadd.f32 1.0, %v7789_v0  ;;  %v4132_v8 = vadd.f32 %v10147_v49, %v9677_v32  ;;  %v10148_v0 = vld [vmem:[#allocation15_spill] sm:$0xff] }
 0x8c6   : > { %v7793_v23 = vpop.eup %7792  ;;  %v6251_v44 = vpack.c.bf16 %v7791_v16, %v9926_v2  ;;  %7812 = vrcp.f32 %v4960_v62  ;;  %v10146_v2 = vld [vmem:[#allocation13_spill] sm:$0xff]  ;;  %v4134_v62 = vadd.f32 %v10148_v0, %v9679_v20  ;;  %v10149_v16 = vld [vmem:[#allocation16_spill] sm:$0xff] }
 0x8c7   : > { %v7795_v10 = vpop.eup %7794  ;;  %v6284_v21 = vpack.c.bf16 %v7793_v23, %v7793_v23  ;;  %7814 = vrcp.f32 %v4875_v18  ;;  %v4128_v55 = vadd.f32 %v10146_v2, %v9679_v20  ;;  %v4136_v18 = vadd.f32 %v10149_v16, %v9677_v32  ;;  %v10150_v23 = vld [vmem:[#allocation12_spill] sm:$0xff] }
 0x8c8   : > { %v7797_v14 = vpop.eup %7796  ;;  %5692 = vst [vmem:[%s9222_s17 + $0xf0] sm:$0xff] %v6251_v44  ;;  %7816 = vpow2.f32 %v4763_v36  ;;  %v4138_v44 = vadd.f32 %v10150_v23, %v9679_v20  ;;  %v4420_v9 = vsub.f32 0.0, %v4134_v62 }
 0x8c9   : > { %v7799_v34 = vpop.eup %7798  ;;  %5725 = vst.msk [vmem:[%s9222_s17 + $0x1d8] sm:$0xf] %vm5660_vm4, %v6284_v21  ;;  %v6296_v1 = vpack.c.bf16 %v7797_v14, %v7797_v14  ;;  %7818 = vpow2.f32 %v4633_v17  ;;  %v4413_v22 = vsub.f32 0.0, %v4128_v55  ;;  %v4426_v51 = vsub.f32 0.0, %v4136_v18 }
 0x8ca   : > { %v7801_v26 = vpop.eup %7800  ;;  %v6255_v61 = vpack.c.bf16 %v7799_v34, %v7795_v10  ;;  %7820 = vpow2.f32 %v4635_v12  ;;  %v4419_v10 = vsub.f32 0.0, %v4132_v8  ;;  %v4427_v34 = vsub.f32 0.0, %v4138_v44 }
 0x8cb   : > { %v7803_v43 = vpop.eup %7802  ;;  %5737 = vst.msk [vmem:[%s9222_s17 + $0x22c] sm:$0xf] %vm5660_vm4, %v6296_v1  ;;  %v6288_v6 = vpack.c.bf16 %v7801_v26, %v7801_v26  ;;  %7822 = vpow2.f32 %v4647_v5  ;;  %v4705_v27 = vmul.f32 1.442695, %v4413_v22  ;;  %v4142_v1 = vadd.f32 %v9741_v47, %v9677_v32 }
 0x8cc   : > { %v7805_v11 = vpop.eup %7804  ;;  %5696 = vst [vmem:[%s9222_s17 + $0x10c] sm:$0xff] %v6255_v61  ;;  %7824 = vpow2.f32 %v4649_v37  ;;  %v4717_v26 = vmul.f32 1.442695, %v4419_v10  ;;  %v4144_v61 = vadd.f32 %v9743_v58, %v9679_v20  ;;  %v4148_v47 = vadd.f32 %v9751_v52, %v9679_v20  ;;  %v10152_v52 = vld [vmem:[#allocation18_spill] sm:$0xff] }
 0x8cd   : > { %v7807_v4 = vpop.eup %7806  ;;  %5729 = vst.msk [vmem:[%s9222_s17 + $0x1f4] sm:$0xf] %vm5660_vm4, %v6288_v6  ;;  %v6308_v56 = vpack.c.bf16 %v7805_v11, %v7805_v11  ;;  %7826 = vpow2.f32 %v4661_v3  ;;  %v4146_v6 = vadd.f32 %v9748_v13, %v9677_v32  ;;  %v4731_v11 = vmul.f32 1.442695, %v4426_v51  ;;  %v10151_v13 = vld [vmem:[#allocation17_spill] sm:$0xff] }
 0x8ce   : > { %v7809_v48 = vpop.eup %7808  ;;  %v6259_v24 = vpack.c.bf16 %v7807_v4, %v7803_v43  ;;  %7828 = vpow2.f32 %v4663_v45  ;;  %v4719_v43 = vmul.f32 1.442695, %v4420_v9  ;;  %v4433_v4 = vsub.f32 0.0, %v4142_v1 }
 0x8cf   : > { %v7811_v53 = vpop.eup %7810  ;;  %5749 = vst.msk [vmem:[%s9222_s17 + $0x280] sm:$0xf] %vm5660_vm4, %v6308_v56  ;;  %v6300_v36 = vpack.c.bf16 %v7809_v48, %v7809_v48  ;;  %7830 = vpow2.f32 %v4675_v19  ;;  %v4152_v58 = vadd.f32 %v9760_v57, %v9677_v32  ;;  %v4434_v48 = vsub.f32 0.0, %v4144_v61 }
 0x8d0   : > { %v7813_v28 = vpop.eup %7812  ;;  %5700 = vst [vmem:[%s9222_s17 + $0x128] sm:$0xff] %v6259_v24  ;;  %7832 = vpow2.f32 %v4677_v35  ;;  %v4154_v24 = vadd.f32 %v10151_v13, %v9679_v20  ;;  %v4441_v57 = vsub.f32 0.0, %v4148_v47 }
 0x8d1   : > { %v7815_v17 = vpop.eup %7814  ;;  %5741 = vst.msk [vmem:[%s9222_s17 + $0x248] sm:$0xf] %vm5660_vm4, %v6300_v36  ;;  %v6312_v46 = vpack.c.bf16 %v7813_v28, %v7813_v28  ;;  %7834 = vpow2.f32 %v4689_v15  ;;  %v4440_v36 = vsub.f32 0.0, %v4146_v6  ;;  %v4747_v8 = vmul.f32 1.442695, %v4434_v48 }
 0x8d2   : > { %v7817_v31 = vpop.eup %7816  ;;  %v6263_v40 = vpack.c.bf16 %v7815_v17, %v7811_v53  ;;  %7836 = vpow2.f32 %v4691_v50  ;;  %v10153_v17 = vld [vmem:[#allocation19_spill] sm:$0xff] }
 0x8d3   : > { %v7819_v12 = vpop.eup %7818  ;;  %5753 = vst.msk [vmem:[%s9222_s17 + $0x29c] sm:$0xf] %vm5660_vm4, %v6312_v46  ;;  %v4946_v25 = vadd.f32 1.0, %v7817_v31  ;;  %7838 = vpow2.f32 %v4703_v30  ;;  %v4156_v30 = vadd.f32 %v10152_v52, %v9677_v32  ;;  %v4158_v46 = vadd.f32 %v10153_v17, %v9679_v20 }
 0x8d4   : > { %v7821_v42 = vpop.eup %7820  ;;  %5704 = vst [vmem:[%s9222_s17 + $0x144] sm:$0xff] %v6263_v40  ;;  %v4881_v38 = vadd.f32 1.0, %v7819_v12  ;;  %7840 = vpow2.f32 %v4705_v27  ;;  %v4733_v27 = vmul.f32 1.442695, %v4427_v34  ;;  %v4745_v12 = vmul.f32 1.442695, %v4433_v4 }
 0x8d5   : > { %v7823_v5 = vpop.eup %7822  ;;  %7842 = vrcp.f32 %v4946_v25  ;;  %v4882_v29 = vadd.f32 1.0, %v7821_v42  ;;  %v4447_v25 = vsub.f32 0.0, %v4152_v58  ;;  %v4448_v32 = vsub.f32 0.0, %v4154_v24 }
 0x8d6   : > { %v7825_v39 = vpop.eup %7824  ;;  %7844 = vrcp.f32 %v4881_v38  ;;  %v4888_v54 = vadd.f32 1.0, %v7823_v5  ;;  %v4759_v0 = vmul.f32 1.442695, %v4440_v36  ;;  %v4454_v62 = vsub.f32 0.0, %v4156_v30 }
 0x8d7   : > { %v7827_v33 = vpop.eup %7826  ;;  %7846 = vrcp.f32 %v4882_v29  ;;  %v4889_v41 = vadd.f32 1.0, %v7825_v39  ;;  %v4761_v5 = vmul.f32 1.442695, %v4441_v57  ;;  %v4455_v29 = vsub.f32 0.0, %v4158_v46 }
 0x8d8   : > { %v7829_v21 = vpop.eup %7828  ;;  %7848 = vrcp.f32 %v4888_v54  ;;  %v4895_v59 = vadd.f32 1.0, %v7827_v33  ;;  %v4773_v39 = vmul.f32 1.442695, %v4447_v25  ;;  %v4775_v23 = vmul.f32 1.442695, %v4448_v32 }
 0x8d9   : > { %v7831_v14 = vpop.eup %7830  ;;  %7850 = vrcp.f32 %v4889_v41  ;;  %v4896_v37 = vadd.f32 1.0, %v7829_v21  ;;  %v4787_v41 = vmul.f32 1.442695, %v4454_v62  ;;  %v4789_v21 = vmul.f32 1.442695, %v4455_v29 }
 0x8da   : > { %v7833_v2 = vpop.eup %7832  ;;  %7852 = vrcp.f32 %v4895_v59  ;;  %v4902_v55 = vadd.f32 1.0, %v7831_v14 }
 0x8db   : > { %v7835_v3 = vpop.eup %7834  ;;  %7854 = vrcp.f32 %v4896_v37  ;;  %v4903_v7 = vadd.f32 1.0, %v7833_v2 }
 0x8dc   : > { %v7837_v45 = vpop.eup %7836  ;;  %7856 = vrcp.f32 %v4902_v55  ;;  %v4909_v60 = vadd.f32 1.0, %v7835_v3 }
 0x8dd   : > { %v7839_v19 = vpop.eup %7838  ;;  %7858 = vrcp.f32 %v4903_v7  ;;  %v4910_v63 = vadd.f32 1.0, %v7837_v45 }
 0x8de   : > { %v7841_v35 = vpop.eup %7840  ;;  %7860 = vrcp.f32 %v4909_v60  ;;  %v4916_v22 = vadd.f32 1.0, %v7839_v19 }
 0x8df   : > { %v7843_v56 = vpop.eup %7842  ;;  %7862 = vrcp.f32 %v4910_v63  ;;  %v4917_v15 = vadd.f32 1.0, %v7841_v35 }
 0x8e0   : > { %v7845_v50 = vpop.eup %7844  ;;  %v6304_v53 = vpack.c.bf16 %v7843_v56, %v7843_v56  ;;  %7864 = vrcp.f32 %v4916_v22 }
 0x8e1   : > { %v7847_v28 = vpop.eup %7846  ;;  %7866 = vrcp.f32 %v4917_v15 }
 0x8e2   : > { %v7849_v31 = vpop.eup %7848  ;;  %5745 = vst.msk [vmem:[%s9222_s17 + $0x264] sm:$0xf] %vm5660_vm4, %v6304_v53  ;;  %v6267_v40 = vpack.c.bf16 %v7847_v28, %v7845_v50  ;;  %7868 = vpow2.f32 %v4717_v26 }
 0x8e3   : > { %v7851_v49 = vpop.eup %7850  ;;  %7870 = vpow2.f32 %v4719_v43 }
 0x8e4   : > { %v7853_v42 = vpop.eup %7852  ;;  %5708 = vst [vmem:[%s9222_s17 + $0x160] sm:$0xff] %v6267_v40  ;;  %v6271_v38 = vpack.c.bf16 %v7851_v49, %v7849_v31  ;;  %7872 = vpow2.f32 %v4731_v11 }
 0x8e5   : > { %v7855_v20 = vpop.eup %7854  ;;  %7874 = vpow2.f32 %v4733_v27 }
 0x8e6   : > { %v7857_v16 = vpop.eup %7856  ;;  %5712 = vst [vmem:[%s9222_s17 + $0x17c] sm:$0xff] %v6271_v38  ;;  %v6275_v18 = vpack.c.bf16 %v7855_v20, %v7853_v42  ;;  %7876 = vpow2.f32 %v4745_v12 }
 0x8e7   : > { %v7859_v54 = vpop.eup %7858  ;;  %7878 = vpow2.f32 %v4747_v8 }
 0x8e8   : > { %v7861_v44 = vpop.eup %7860  ;;  %5716 = vst [vmem:[%s9222_s17 + $0x198] sm:$0xff] %v6275_v18  ;;  %v6279_v33 = vpack.c.bf16 %v7859_v54, %v7857_v16  ;;  %7880 = vpow2.f32 %v4759_v0 }
 0x8e9   : > { %v7863_v10 = vpop.eup %7862  ;;  %7882 = vpow2.f32 %v4761_v5 }
 0x8ea   : > { %v7865_v59 = vpop.eup %7864  ;;  %5720 = vst [vmem:[%s9222_s17 + $0x1b4] sm:$0xff] %v6279_v33  ;;  %v6283_v9 = vpack.c.bf16 %v7863_v10, %v7861_v44  ;;  %7884 = vpow2.f32 %v4773_v39 }
 0x8eb   : > { %v7867_v14 = vpop.eup %7866  ;;  %7886 = vpow2.f32 %v4775_v23 }
 0x8ec   : > { %v7869_v37 = vpop.eup %7868  ;;  %5724 = vst [vmem:[%s9222_s17 + $0x1d0] sm:$0xff] %v6283_v9  ;;  %v6287_v51 = vpack.c.bf16 %v7867_v14, %v7865_v59  ;;  %7888 = vpow2.f32 %v4787_v41 }
 0x8ed   : > { %v7871_v2 = vpop.eup %7870  ;;  %v4923_v55 = vadd.f32 1.0, %v7869_v37  ;;  %7890 = vpow2.f32 %v4789_v21 }
 0x8ee   : > { %v7873_v34 = vpop.eup %7872  ;;  %5728 = vst [vmem:[%s9222_s17 + $0x1ec] sm:$0xff] %v6287_v51  ;;  %v4924_v1 = vadd.f32 1.0, %v7871_v2 }
 0x8ef   : > { %v7875_v3 = vpop.eup %7874  ;;  %7892 = vrcp.f32 %v4923_v55  ;;  %v4930_v7 = vadd.f32 1.0, %v7873_v34 }
 0x8f0   : > { %v7877_v26 = vpop.eup %7876  ;;  %7894 = vrcp.f32 %v4924_v1  ;;  %v4931_v61 = vadd.f32 1.0, %v7875_v3 }
 0x8f1   : > { %v7879_v45 = vpop.eup %7878  ;;  %7896 = vrcp.f32 %v4930_v7  ;;  %v4937_v60 = vadd.f32 1.0, %v7877_v26 }
 0x8f2   : > { %v7881_v43 = vpop.eup %7880  ;;  %7898 = vrcp.f32 %v4931_v61  ;;  %v4938_v6 = vadd.f32 1.0, %v7879_v45 }
 0x8f3   : > { %v7883_v19 = vpop.eup %7882  ;;  %7900 = vrcp.f32 %v4937_v60  ;;  %v4944_v63 = vadd.f32 1.0, %v7881_v43 }
 0x8f4   : > { %v7885_v11 = vpop.eup %7884  ;;  %7902 = vrcp.f32 %v4938_v6  ;;  %v4945_v47 = vadd.f32 1.0, %v7883_v19 }
 0x8f5   : > { %v7887_v35 = vpop.eup %7886  ;;  %7904 = vrcp.f32 %v4944_v63  ;;  %v4951_v22 = vadd.f32 1.0, %v7885_v11 }
 0x8f6   : > { %v7889_v4 = vpop.eup %7888  ;;  %7906 = vrcp.f32 %v4945_v47  ;;  %v4952_v58 = vadd.f32 1.0, %v7887_v35 }
 0x8f7   : > { %v7891_v56 = vpop.eup %7890  ;;  %7908 = vrcp.f32 %v4951_v22  ;;  %v4958_v15 = vadd.f32 1.0, %v7889_v4 }
 0x8f8   : > { %7910 = vrcp.f32 %v4952_v58  ;;  %v4959_v48 = vadd.f32 1.0, %v7891_v56 }
 0x8f9   : > { %v7893_v13 = vpop.eup %7892  ;;  %7912 = vrcp.f32 %v4958_v15 }
 0x8fa   : > { %v7895_v24 = vpop.eup %7894  ;;  %7914 = vrcp.f32 %v4959_v48 }
 0x8fb   : > { %v7897_v50 = vpop.eup %7896  ;;  %v6291_v53 = vpack.c.bf16 %v7895_v24, %v7893_v13 }
 0x8fc   : > { %v7899_v36 = vpop.eup %7898 }
 0x8fd   : > { %v7901_v52 = vpop.eup %7900  ;;  %5732 = vst [vmem:[%s9222_s17 + $0x208] sm:$0xff] %v6291_v53  ;;  %v6295_v30 = vpack.c.bf16 %v7899_v36, %v7897_v50 }
 0x8fe   : > { %v7903_v28 = vpop.eup %7902 }
 0x8ff   : > { %v7905_v27 = vpop.eup %7904  ;;  %5736 = vst [vmem:[%s9222_s17 + $0x224] sm:$0xff] %v6295_v30  ;;  %v6299_v57 = vpack.c.bf16 %v7903_v28, %v7901_v52 }
 0x900   : > { %v7907_v17 = vpop.eup %7906 }
 0x901   : > { %v7909_v46 = vpop.eup %7908  ;;  %5740 = vst [vmem:[%s9222_s17 + $0x240] sm:$0xff] %v6299_v57  ;;  %v6303_v31 = vpack.c.bf16 %v7907_v17, %v7905_v27 }
 0x902   : > { %v7911_v40 = vpop.eup %7910 }
 0x903   : > { %v7913_v12 = vpop.eup %7912  ;;  %5744 = vst [vmem:[%s9222_s17 + $0x25c] sm:$0xff] %v6303_v31  ;;  %v6307_v25 = vpack.c.bf16 %v7911_v40, %v7909_v46 }
 0x904   : > { %v7915_v49 = vpop.eup %7914 }
 0x905   : > { %5748 = vst [vmem:[%s9222_s17 + $0x278] sm:$0xff] %v6307_v25  ;;  %v6311_v8 = vpack.c.bf16 %v7915_v49, %v7913_v12 }
 0x907   : > { %5752 = vst [vmem:[%s9222_s17 + $0x294] sm:$0xff] %v6311_v8 }
 0x908 PF: > { %s10154_s24 = sld [smem:[#allocation7_spill]]  ;;  %s10155_s25 = sld [smem:[#allocation5_spill]] }
 0x90e   : > { %p7053_p5 = scmp.ge.s32.totalorder %s10154_s24, 2  ;;  %s5793_s1 = sand.u32 1, %s10155_s25  }
 0x90f   : > { %s5794_s21 = scalar_lea.sflag [#allocation3], %s5793_s1 }
 0x910   : > { %p7050_p1 = pnand %p7053_p5, %p8122_p6 }
 0x912   : > { %7962 = dma.done.wait (!%p7050_p1), %s5794_s21, 1536  }
 0x913   : > { %7964 = vsyncadd (!%p7050_p1), %s5794_s21, 4294965760  ;;  %s10157_s30 = sld [smem:[#allocation8_spill]]  ;;  %s10158_s0 = sld [smem:[#allocation6_spill]] }
 0x914   : > { %s10159_s29 = sld [smem:[#allocation9_spill]]  ;;  %s10160_s27 = smov %s7971_s28 }
 0x919   : > { %p29_p2 = scmp.ge.s32.totalorder %s10157_s30, 4   ;;  %s10161_s28 = smov %s10158_s0 }
 0x91b   :  { %31 = sbr.rel (!%p29_p2) target bundleno = 8 (0x8), region = 135 }
 0x922   :  { %5808 = vsyncpa [#allocation3], 1 }
 0x923   :  { %5810 = vsyncpa [#allocation3 + $0x1], 1 }

</bundles_post_ra>
